<compile_context>
chip_gen: v5e
topology: v5e:2x2
jax: 0.10.0
libtpu: 0.0.40
codegen_flags: <defaults>
</compile_context>

<pallas_src>
import functools

import jax
import jax.numpy as jnp
from jax.experimental import pallas as pl
from jax.experimental.pallas import tpu as pltpu


def _lrelu(x, slope=0.2):
    # LeakyReLU(slope) == max(x, slope*x) for 0 < slope < 1: mul+max (2 VALU ops)
    # instead of cmp+mul+select -- this sits on the serial path between MXU layers.
    return jnp.maximum(x, slope * x)


def func_rep_kernel(xT_ref, w_inT_ref, b_all_ref, w_hT_ref, w_out_ref, b_out_ref,
                    o_ref, *, ydim):
    # xT_ref:    (P, xdim, TN)           f32   coordinates, N on the lane axis
    # w_inT_ref: (P, wdim, xdim)         f32   per-batch W_in^T
    # b_all_ref: (num_layers, P*wdim, 1) f32   [b_in, b_1, ..., b_{num_layers-1}]
    # w_hT_ref:  (H, P*wdim, P*wdim)     bf16  block-diagonal packed hidden W^T
    # w_out_ref: (P*wdim, 1) f32 if ydim==1, else (P*ydim, P*wdim) f32 block-diag W_out^T
    # b_out_ref: (P*ydim, 1)             f32
    # o_ref:     (P*ydim, TN)            f32   lane-dense output tile
    P, xdim, _ = xT_ref.shape
    wdim = w_inT_ref.shape[1]
    H = w_hT_ref.shape[0]

    # --- input layer: tiny K (=xdim) -> per-batch VPU broadcast MACs (MXU stays free) ---
    parts = []
    for p in range(P):
        xT_p = xT_ref[p]                           # (xdim, TN)
        w_p = w_inT_ref[p]                         # (wdim, xdim)
        acc = w_p[:, 0:1] * xT_p[0:1, :]
        for k in range(1, xdim):
            acc = acc + w_p[:, k:k + 1] * xT_p[k:k + 1, :]
        parts.append(acc)                          # (wdim, TN)
    h = parts[0] if P == 1 else jnp.concatenate(parts, axis=0)      # (P*wdim, TN)
    h = _lrelu(h + b_all_ref[0])

    # --- hidden layers: block-diag (P*wdim, P*wdim) @ (P*wdim, TN) on the MXU,
    #     bf16 inputs / f32 accumulation; bias + lrelu stay in f32 ---
    for i in range(H):
        h = jnp.dot(w_hT_ref[i], h.astype(jnp.bfloat16),
                    preferred_element_type=jnp.float32)
        h = _lrelu(h + b_all_ref[1 + i])

    # --- output layer ---
    if ydim == 1:
        # VPU multiply + per-batch sublane reduce -> lane-dense rows, MXU free, full f32
        prod = h * w_out_ref[...]                  # (P*wdim, TN) * (P*wdim, 1)
        for p in range(P):
            row = jnp.sum(prod[p * wdim:(p + 1) * wdim, :], axis=0, keepdims=True)
            o_ref[p:p + 1, :] = jnp.tanh(row + b_out_ref[p:p + 1, :]).astype(o_ref.dtype)
    else:
        # small block-diagonal f32 dot keeps full precision at the output for ~zero cost
        out = jnp.dot(w_out_ref[...], h, preferred_element_type=jnp.float32)
        o_ref[...] = jnp.tanh(out + b_out_ref[...]).astype(o_ref.dtype)


def _default_batch_pack():
    """Block-diagonal 2-batch packing only pays on 256-wide MXUs (v6e / v7x);
    on 128-wide MXUs (v2-v5) a 128x128 weight is already the native MXU shape."""
    try:
        kind = jax.devices()[0].device_kind.lower()
    except Exception:
        return 1
    return 2 if any(tag in kind for tag in ("v6", "v7", "tpu7")) else 1


def functional_representation(ws, x, *, num_layers=3, tile_n=512, batch_pack=None):
    """ws: dict of per-batch flattened weights (PyTorch layout); x: (B,N,xdim) -> (B,N,ydim)."""
    B, N, xdim = x.shape
    wdim = ws['b_in'].shape[-1]
    ydim = ws['b_out'].shape[-1]
    assert num_layers >= 2
    H = num_layers - 1
    f32 = jnp.float32

    # --- batch packing factor (fills the 256-wide MXU on v6e/v7x; 1 elsewhere) ---
    P = _default_batch_pack() if batch_pack is None else int(batch_pack)
    if P < 1 or B % P != 0 or P * wdim > 256:
        P = 1
    G = B // P
    Pw = P * wdim

    # --- layout plumbing (once per call, in XLA): the kernel works on h^T ---
    w_inT = jnp.transpose(ws['w_in'].reshape(B, xdim, wdim), (0, 2, 1))
    w_inT = w_inT.reshape(G, P, wdim, xdim).astype(f32)                      # (G,P,wdim,xdim)

    w_hT = jnp.stack(
        [jnp.transpose(ws['w_%d' % i].reshape(B, wdim, wdim), (0, 2, 1))
         for i in range(1, num_layers)], axis=1)                             # (B,H,wdim,wdim)
    w_hT = w_hT.reshape(G, P, H, wdim, wdim)
    eye = jnp.eye(P, dtype=w_hT.dtype)
    w_hT = jnp.einsum('pq,gphij->ghpiqj', eye, w_hT)                         # block-diag pairing
    w_hT = w_hT.reshape(G, H, Pw, Pw).astype(jnp.bfloat16)

    # all width-wdim biases consolidated into ONE input: [b_in, b_1, ..., b_{H}]
    b_all = jnp.stack([ws['b_in']] + [ws['b_%d' % i] for i in range(1, num_layers)],
                      axis=1)                                                # (B,L,wdim)
    b_all = jnp.transpose(b_all.reshape(G, P, num_layers, wdim), (0, 2, 1, 3))
    b_all = b_all.reshape(G, num_layers, Pw, 1).astype(f32)

    if ydim == 1:
        w_out = ws['w_out'].reshape(G, Pw, 1).astype(f32)                    # packed column
        w_out_spec = pl.BlockSpec((None, Pw, 1), lambda g, n: (g, 0, 0))
    else:
        w_outT = jnp.transpose(ws['w_out'].reshape(B, wdim, ydim), (0, 2, 1))
        w_outT = w_outT.reshape(G, P, ydim, wdim)
        w_out = jnp.einsum('pq,gpyi->gpyqi', jnp.eye(P, dtype=w_outT.dtype), w_outT)
        w_out = w_out.reshape(G, P * ydim, Pw).astype(f32)                   # block-diag W_out^T
        w_out_spec = pl.BlockSpec((None, P * ydim, Pw), lambda g, n: (g, 0, 0))
    b_out = ws['b_out'].reshape(G, P * ydim, 1).astype(f32)

    # coordinates transposed so N sits on lanes; pad N up to a tile multiple
    TN = max(128, (tile_n // 128) * 128)
    TN = min(TN, ((N + 127) // 128) * 128)        # don't over-pad a short N
    xT = jnp.transpose(x, (0, 2, 1)).reshape(G, P, xdim, N).astype(f32)
    n_pad = (-N) % TN
    if n_pad:
        xT = jnp.pad(xT, ((0, 0), (0, 0), (0, 0), (0, n_pad)))
    Np = N + n_pad

    grid = (G, Np // TN)        # batch group OUTER: weight blocks DMA'd once per group

    out_t = pl.pallas_call(
        functools.partial(func_rep_kernel, ydim=ydim),
        out_shape=jax.ShapeDtypeStruct((G, P * ydim, Np), jnp.float32),
        grid=grid,
        in_specs=[
            pl.BlockSpec((None, P, xdim, TN), lambda g, n: (g, 0, 0, n)),        # x^T tile
            pl.BlockSpec((None, P, wdim, xdim), lambda g, n: (g, 0, 0, 0)),      # W_in^T
            pl.BlockSpec((None, num_layers, Pw, 1), lambda g, n: (g, 0, 0, 0)),  # biases
            pl.BlockSpec((None, H, Pw, Pw), lambda g, n: (g, 0, 0, 0)),          # hidden W^T
            w_out_spec,                                                          # W_out
            pl.BlockSpec((None, P * ydim, 1), lambda g, n: (g, 0, 0)),           # b_out
        ],
        out_specs=pl.BlockSpec((None, P * ydim, TN), lambda g, n: (g, 0, n)),
        compiler_params=pltpu.CompilerParams(
            # batch axis "parallel" so a 2-TC (v7x) split lands on batch and the
            # per-batch weight slab stays core-resident; N axis kept "arbitrary".
            dimension_semantics=("parallel", "arbitrary")),
    )(xT, w_inT, b_all, w_hT, w_out, b_out)

    out_t = out_t[:, :, :N].reshape(B, ydim, N)
    if ydim == 1:
        return out_t.reshape(B, N, ydim)          # pure relabel; no transpose copy pass
    return jnp.transpose(out_t, (0, 2, 1))


def reference_forward(ws, x, *, num_layers=3, mxu_dtype=None):
    """Pure-JAX mirror of the PyTorch forward. mxu_dtype=jnp.bfloat16 emulates the
    kernel's bf16-at-MXU casting for a tight numerical comparison."""
    B, N, xdim = x.shape
    wdim = ws['b_in'].shape[-1]
    ydim = ws['b_out'].shape[-1]
    h = jnp.einsum('bnx,bxw->bnw', x, ws['w_in'].reshape(B, xdim, wdim))
    h = _lrelu(h + ws['b_in'].reshape(B, 1, wdim))
    for i in range(1, num_layers):
        W = ws['w_%d' % i].reshape(B, wdim, wdim)
        if mxu_dtype is not None:
            hm = jnp.einsum('bnk,bkw->bnw', h.astype(mxu_dtype), W.astype(mxu_dtype),
                            preferred_element_type=jnp.float32)
        else:
            hm = jnp.einsum('bnk,bkw->bnw', h, W)
        h = _lrelu(hm + ws['b_%d' % i].reshape(B, 1, wdim))
    h = jnp.einsum('bnk,bky->bny', h, ws['w_out'].reshape(B, wdim, ydim))
    return jnp.tanh(h + ws['b_out'].reshape(B, 1, ydim))


def init_ws(key, B, xdim, wdim, ydim, num_layers):
    ks = jax.random.split(key, 2 * (num_layers + 1))
    ws = {}
    ws['w_in'] = jax.random.normal(ks[0], (B, xdim * wdim), jnp.float32) / jnp.sqrt(float(xdim))
    ws['b_in'] = 0.1 * jax.random.normal(ks[1], (B, wdim), jnp.float32)
    for i in range(1, num_layers):
        ws['w_%d' % i] = (jax.random.normal(ks[2 * i], (B, wdim * wdim), jnp.float32)
                          / jnp.sqrt(float(wdim)))
        ws['b_%d' % i] = 0.1 * jax.random.normal(ks[2 * i + 1], (B, wdim), jnp.float32)
    ws['w_out'] = (jax.random.normal(ks[-2], (B, wdim * ydim), jnp.float32)
                   / jnp.sqrt(float(wdim)))
    ws['b_out'] = 0.1 * jax.random.normal(ks[-1], (B, ydim), jnp.float32)
    return ws


if __name__ == "__main__":
    B, N = 2, 512
    xdim, ydim, wdim, num_layers = 3, 1, 128, 3

    key = jax.random.PRNGKey(0)
    kx, kw = jax.random.split(key)
    x = jax.random.normal(kx, (B, N, xdim), jnp.float32)
    ws = init_ws(kw, B, xdim, wdim, ydim, num_layers)

    try:
        out = functional_representation(ws, x, num_layers=num_layers)
    except Exception:
        # Conservative fallback: disable 2-batch MXU packing (e.g. an unexpected chip).
        out = functional_representation(ws, x, num_layers=num_layers, batch_pack=1)
    out = jax.block_until_ready(out)
    assert out.shape == (B, N, ydim)

    # Tight check vs a reference matching the kernel's bf16-at-MXU numerics.
    ref_bf16 = reference_forward(ws, x, num_layers=num_layers, mxu_dtype=jnp.bfloat16)
    assert jnp.allclose(out, ref_bf16, atol=5e-3, rtol=5e-3)

    # Loose sanity check vs the pure-f32 module semantics (bf16 only at the MXU).
    ref_f32 = reference_forward(ws, x, num_layers=num_layers)
    assert jnp.allclose(out, ref_f32, atol=5e-2, rtol=5e-2)

    print("KERNEL_OK")
</pallas_src>

<mosaic_0001>
module attributes {stable_mosaic.version = 11 : i64} {
  func.func @func_rep_kernel(%arg0: i32, %arg1: i32, %arg2: memref<1x1x3x512xf32, #tpu.memory_space<vmem>>, %arg3: memref<1x1x128x3xf32, #tpu.memory_space<vmem>>, %arg4: memref<1x3x128x1xf32, #tpu.memory_space<vmem>>, %arg5: memref<1x2x128x128xbf16, #tpu.memory_space<vmem>>, %arg6: memref<1x128x1xf32, #tpu.memory_space<vmem>>, %arg7: memref<1x1x1xf32, #tpu.memory_space<vmem>>, %arg8: memref<1x1x512xf32, #tpu.memory_space<vmem>>) attributes {dimension_semantics = [#tpu.dimension_semantics<parallel>, #tpu.dimension_semantics<arbitrary>], iteration_bounds = array<i64: 2, 1>, scalar_prefetch = 0 : i64, scratch_operands = 0 : i64, tpu.core_type = #tpu.core_type<tc>, window_params = [{transform_indices = @transform_0, window_bounds = array<i64: 1, 1, 3, 512>}, {transform_indices = @transform_1, window_bounds = array<i64: 1, 1, 128, 3>}, {transform_indices = @transform_2, window_bounds = array<i64: 1, 3, 128, 1>}, {transform_indices = @transform_3, window_bounds = array<i64: 1, 2, 128, 128>}, {transform_indices = @transform_4, window_bounds = array<i64: 1, 128, 1>}, {transform_indices = @transform_5, window_bounds = array<i64: 1, 1, 1>}, {transform_indices = @transform_6, window_bounds = array<i64: 1, 1, 512>}]} {
    %c0 = arith.constant 0 : index
    %c0_0 = arith.constant 0 : index
    %c0_1 = arith.constant 0 : index
    %c0_2 = arith.constant 0 : index
    %0 = vector.load %arg2[%c0, %c0_0, %c0_1, %c0_2] : memref<1x1x3x512xf32, #tpu.memory_space<vmem>>, vector<1x1x3x512xf32>
    %1 = vector.shape_cast %0 : vector<1x1x3x512xf32> to vector<3x512xf32>
    %c0_3 = arith.constant 0 : index
    %c0_4 = arith.constant 0 : index
    %c0_5 = arith.constant 0 : index
    %c0_6 = arith.constant 0 : index
    %2 = vector.load %arg3[%c0_3, %c0_4, %c0_5, %c0_6] : memref<1x1x128x3xf32, #tpu.memory_space<vmem>>, vector<1x1x128x3xf32>
    %3 = vector.shape_cast %2 : vector<1x1x128x3xf32> to vector<128x3xf32>
    %4 = vector.extract_strided_slice %3 {offsets = [0, 0], sizes = [128, 1], strides = [1, 1]} : vector<128x3xf32> to vector<128x1xf32>
    %5 = vector.extract_strided_slice %1 {offsets = [0, 0], sizes = [1, 512], strides = [1, 1]} : vector<3x512xf32> to vector<1x512xf32>
    %6 = vector.broadcast %4 : vector<128x1xf32> to vector<128x512xf32>
    %7 = vector.broadcast %5 : vector<1x512xf32> to vector<128x512xf32>
    %8 = arith.mulf %6, %7 : vector<128x512xf32>
    %9 = vector.extract_strided_slice %3 {offsets = [0, 1], sizes = [128, 1], strides = [1, 1]} : vector<128x3xf32> to vector<128x1xf32>
    %10 = vector.extract_strided_slice %1 {offsets = [1, 0], sizes = [1, 512], strides = [1, 1]} : vector<3x512xf32> to vector<1x512xf32>
    %11 = vector.broadcast %9 : vector<128x1xf32> to vector<128x512xf32>
    %12 = vector.broadcast %10 : vector<1x512xf32> to vector<128x512xf32>
    %13 = arith.mulf %11, %12 : vector<128x512xf32>
    %14 = arith.addf %8, %13 : vector<128x512xf32>
    %15 = vector.extract_strided_slice %3 {offsets = [0, 2], sizes = [128, 1], strides = [1, 1]} : vector<128x3xf32> to vector<128x1xf32>
    %16 = vector.extract_strided_slice %1 {offsets = [2, 0], sizes = [1, 512], strides = [1, 1]} : vector<3x512xf32> to vector<1x512xf32>
    %17 = vector.broadcast %15 : vector<128x1xf32> to vector<128x512xf32>
    %18 = vector.broadcast %16 : vector<1x512xf32> to vector<128x512xf32>
    %19 = arith.mulf %17, %18 : vector<128x512xf32>
    %20 = arith.addf %14, %19 : vector<128x512xf32>
    %c0_7 = arith.constant 0 : index
    %c0_8 = arith.constant 0 : index
    %c0_9 = arith.constant 0 : index
    %c0_10 = arith.constant 0 : index
    %21 = vector.load %arg4[%c0_7, %c0_8, %c0_9, %c0_10] : memref<1x3x128x1xf32, #tpu.memory_space<vmem>>, vector<1x1x128x1xf32>
    %22 = vector.shape_cast %21 : vector<1x1x128x1xf32> to vector<128x1xf32>
    %23 = vector.broadcast %22 : vector<128x1xf32> to vector<128x512xf32>
    %24 = arith.addf %20, %23 : vector<128x512xf32>
    %cst = arith.constant 2.000000e-01 : f32
    %25 = vector.broadcast %cst : f32 to vector<128x512xf32>
    %26 = arith.mulf %25, %24 : vector<128x512xf32>
    %27 = arith.maximumf %24, %26 : vector<128x512xf32>
    %c0_11 = arith.constant 0 : index
    %c0_12 = arith.constant 0 : index
    %c0_13 = arith.constant 0 : index
    %c0_14 = arith.constant 0 : index
    %28 = vector.load %arg5[%c0_11, %c0_12, %c0_13, %c0_14] : memref<1x2x128x128xbf16, #tpu.memory_space<vmem>>, vector<1x1x128x128xbf16>
    %29 = vector.shape_cast %28 : vector<1x1x128x128xbf16> to vector<128x128xbf16>
    %30 = arith.truncf %27 : vector<128x512xf32> to vector<128x512xbf16>
    %cst_15 = arith.constant dense<0.000000e+00> : vector<128x512xf32>
    %31 = tpu.matmul %29, %30, %cst_15 {dimension_numbers = #tpu.dot_dimension_numbers<[1], [0], [0], [1], [0, 0, 1, 1], [], []>} : vector<128x128xbf16>, vector<128x512xbf16>, vector<128x512xf32> -> vector<128x512xf32>
    %c0_16 = arith.constant 0 : index
    %c1 = arith.constant 1 : index
    %c0_17 = arith.constant 0 : index
    %c0_18 = arith.constant 0 : index
    %32 = vector.load %arg4[%c0_16, %c1, %c0_17, %c0_18] : memref<1x3x128x1xf32, #tpu.memory_space<vmem>>, vector<1x1x128x1xf32>
    %33 = vector.shape_cast %32 : vector<1x1x128x1xf32> to vector<128x1xf32>
    %34 = vector.broadcast %33 : vector<128x1xf32> to vector<128x512xf32>
    %35 = arith.addf %31, %34 : vector<128x512xf32>
    %cst_19 = arith.constant 2.000000e-01 : f32
    %36 = vector.broadcast %cst_19 : f32 to vector<128x512xf32>
    %37 = arith.mulf %36, %35 : vector<128x512xf32>
    %38 = arith.maximumf %35, %37 : vector<128x512xf32>
    %c0_20 = arith.constant 0 : index
    %c1_21 = arith.constant 1 : index
    %c0_22 = arith.constant 0 : index
    %c0_23 = arith.constant 0 : index
    %39 = vector.load %arg5[%c0_20, %c1_21, %c0_22, %c0_23] : memref<1x2x128x128xbf16, #tpu.memory_space<vmem>>, vector<1x1x128x128xbf16>
    %40 = vector.shape_cast %39 : vector<1x1x128x128xbf16> to vector<128x128xbf16>
    %41 = arith.truncf %38 : vector<128x512xf32> to vector<128x512xbf16>
    %cst_24 = arith.constant dense<0.000000e+00> : vector<128x512xf32>
    %42 = tpu.matmul %40, %41, %cst_24 {dimension_numbers = #tpu.dot_dimension_numbers<[1], [0], [0], [1], [0, 0, 1, 1], [], []>} : vector<128x128xbf16>, vector<128x512xbf16>, vector<128x512xf32> -> vector<128x512xf32>
    %c0_25 = arith.constant 0 : index
    %c2 = arith.constant 2 : index
    %c0_26 = arith.constant 0 : index
    %c0_27 = arith.constant 0 : index
    %43 = vector.load %arg4[%c0_25, %c2, %c0_26, %c0_27] : memref<1x3x128x1xf32, #tpu.memory_space<vmem>>, vector<1x1x128x1xf32>
    %44 = vector.shape_cast %43 : vector<1x1x128x1xf32> to vector<128x1xf32>
    %45 = vector.broadcast %44 : vector<128x1xf32> to vector<128x512xf32>
    %46 = arith.addf %42, %45 : vector<128x512xf32>
    %cst_28 = arith.constant 2.000000e-01 : f32
    %47 = vector.broadcast %cst_28 : f32 to vector<128x512xf32>
    %48 = arith.mulf %47, %46 : vector<128x512xf32>
    %49 = arith.maximumf %46, %48 : vector<128x512xf32>
    %c0_29 = arith.constant 0 : index
    %c0_30 = arith.constant 0 : index
    %c0_31 = arith.constant 0 : index
    %50 = vector.load %arg6[%c0_29, %c0_30, %c0_31] : memref<1x128x1xf32, #tpu.memory_space<vmem>>, vector<1x128x1xf32>
    %51 = vector.shape_cast %50 : vector<1x128x1xf32> to vector<128x1xf32>
    %52 = vector.broadcast %51 : vector<128x1xf32> to vector<128x512xf32>
    %53 = arith.mulf %49, %52 : vector<128x512xf32>
    %cst_32 = arith.constant dense<0.000000e+00> : vector<512xf32>
    %54 = vector.multi_reduction <add>, %53, %cst_32 [0] : vector<128x512xf32> to vector<512xf32>
    %55 = vector.shape_cast %54 : vector<512xf32> to vector<1x512xf32>
    %c0_33 = arith.constant 0 : index
    %c0_34 = arith.constant 0 : index
    %c0_35 = arith.constant 0 : index
    %56 = vector.load %arg7[%c0_33, %c0_34, %c0_35] : memref<1x1x1xf32, #tpu.memory_space<vmem>>, vector<1x1x1xf32>
    %57 = vector.shape_cast %56 : vector<1x1x1xf32> to vector<1x1xf32>
    %58 = vector.broadcast %57 : vector<1x1xf32> to vector<1x512xf32>
    %59 = arith.addf %55, %58 : vector<1x512xf32>
    %60 = math.tanh %59 : vector<1x512xf32>
    %c0_36 = arith.constant 0 : index
    %c0_37 = arith.constant 0 : index
    %c0_38 = arith.constant 0 : index
    %61 = vector.load %arg8[%c0_36, %c0_37, %c0_38] : memref<1x1x512xf32, #tpu.memory_space<vmem>>, vector<1x1x512xf32>
    %62 = vector.shape_cast %61 : vector<1x1x512xf32> to vector<1x512xf32>
    %63 = vector.shape_cast %60 : vector<1x512xf32> to vector<1x1x512xf32>
    tpu.vector_store %arg8[%c0_36, %c0_37, %c0_38], %63 {strides = array<i32>} : memref<1x1x512xf32, #tpu.memory_space<vmem>>, vector<1x1x512xf32>,
    return
  }
  func.func @transform_0(%arg0: i32, %arg1: i32) -> (i32, i32, i32, i32) {
    %c0_i32 = arith.constant 0 : i32
    %c0_i32_0 = arith.constant 0 : i32
    %c0_i32_1 = arith.constant 0 : i32
    return %arg0, %c0_i32, %c0_i32_0, %arg1 : i32, i32, i32, i32
  }
  func.func @transform_1(%arg0: i32, %arg1: i32) -> (i32, i32, i32, i32) {
    %c0_i32 = arith.constant 0 : i32
    %c0_i32_0 = arith.constant 0 : i32
    %c0_i32_1 = arith.constant 0 : i32
    %c0_i32_2 = arith.constant 0 : i32
    return %arg0, %c0_i32, %c0_i32_0, %c0_i32_1 : i32, i32, i32, i32
  }
  func.func @transform_2(%arg0: i32, %arg1: i32) -> (i32, i32, i32, i32) {
    %c0_i32 = arith.constant 0 : i32
    %c0_i32_0 = arith.constant 0 : i32
    %c0_i32_1 = arith.constant 0 : i32
    %c0_i32_2 = arith.constant 0 : i32
    return %arg0, %c0_i32, %c0_i32_0, %c0_i32_1 : i32, i32, i32, i32
  }
  func.func @transform_3(%arg0: i32, %arg1: i32) -> (i32, i32, i32, i32) {
    %c0_i32 = arith.constant 0 : i32
    %c0_i32_0 = arith.constant 0 : i32
    %c0_i32_1 = arith.constant 0 : i32
    %c0_i32_2 = arith.constant 0 : i32
    return %arg0, %c0_i32, %c0_i32_0, %c0_i32_1 : i32, i32, i32, i32
  }
  func.func @transform_4(%arg0: i32, %arg1: i32) -> (i32, i32, i32) {
    %c0_i32 = arith.constant 0 : i32
    %c0_i32_0 = arith.constant 0 : i32
    %c0_i32_1 = arith.constant 0 : i32
    return %arg0, %c0_i32, %c0_i32_0 : i32, i32, i32
  }
  func.func @transform_5(%arg0: i32, %arg1: i32) -> (i32, i32, i32) {
    %c0_i32 = arith.constant 0 : i32
    %c0_i32_0 = arith.constant 0 : i32
    %c0_i32_1 = arith.constant 0 : i32
    return %arg0, %c0_i32, %c0_i32_0 : i32, i32, i32
  }
  func.func @transform_6(%arg0: i32, %arg1: i32) -> (i32, i32, i32) {
    %c0_i32 = arith.constant 0 : i32
    %c0_i32_0 = arith.constant 0 : i32
    return %arg0, %c0_i32, %arg1 : i32, i32, i32
  }
}

module attributes {stable_mosaic.version = 11 : i64} {
  func.func @func_rep_kernel(%arg0: i32, %arg1: i32, %arg2: memref<1x1x3x512xf32, #tpu.memory_space<vmem>>, %arg3: memref<1x1x128x3xf32, #tpu.memory_space<vmem>>, %arg4: memref<1x3x128x1xf32, #tpu.memory_space<vmem>>, %arg5: memref<1x2x128x128xbf16, #tpu.memory_space<vmem>>, %arg6: memref<1x128x1xf32, #tpu.memory_space<vmem>>, %arg7: memref<1x1x1xf32, #tpu.memory_space<vmem>>, %arg8: memref<1x1x512xf32, #tpu.memory_space<vmem>>) attributes {dimension_semantics = [#tpu.dimension_semantics<parallel>, #tpu.dimension_semantics<arbitrary>], iteration_bounds = array<i64: 2, 1>, scalar_prefetch = 0 : i64, scratch_operands = 0 : i64, tpu.core_type = #tpu.core_type<tc>, window_params = [{transform_indices = @transform_0, window_bounds = array<i64: 1, 1, 3, 512>}, {transform_indices = @transform_1, window_bounds = array<i64: 1, 1, 128, 3>}, {transform_indices = @transform_2, window_bounds = array<i64: 1, 3, 128, 1>}, {transform_indices = @transform_3, window_bounds = array<i64: 1, 2, 128, 128>}, {transform_indices = @transform_4, window_bounds = array<i64: 1, 128, 1>}, {transform_indices = @transform_5, window_bounds = array<i64: 1, 1, 1>}, {transform_indices = @transform_6, window_bounds = array<i64: 1, 1, 512>}]} {
    %c0 = arith.constant 0 : index
    %c0_0 = arith.constant 0 : index
    %c0_1 = arith.constant 0 : index
    %c0_2 = arith.constant 0 : index
    %0 = vector.load %arg2[%c0, %c0_0, %c0_1, %c0_2] : memref<1x1x3x512xf32, #tpu.memory_space<vmem>>, vector<1x1x3x512xf32>
    %1 = vector.shape_cast %0 : vector<1x1x3x512xf32> to vector<3x512xf32>
    %c0_3 = arith.constant 0 : index
    %c0_4 = arith.constant 0 : index
    %c0_5 = arith.constant 0 : index
    %c0_6 = arith.constant 0 : index
    %2 = vector.load %arg3[%c0_3, %c0_4, %c0_5, %c0_6] : memref<1x1x128x3xf32, #tpu.memory_space<vmem>>, vector<1x1x128x3xf32>
    %3 = vector.shape_cast %2 : vector<1x1x128x3xf32> to vector<128x3xf32>
    %4 = vector.extract_strided_slice %3 {offsets = [0, 0], sizes = [128, 1], strides = [1, 1]} : vector<128x3xf32> to vector<128x1xf32>
    %5 = vector.extract_strided_slice %1 {offsets = [0, 0], sizes = [1, 512], strides = [1, 1]} : vector<3x512xf32> to vector<1x512xf32>
    %6 = vector.broadcast %4 : vector<128x1xf32> to vector<128x512xf32>
    %7 = vector.broadcast %5 : vector<1x512xf32> to vector<128x512xf32>
    %8 = arith.mulf %6, %7 : vector<128x512xf32>
    %9 = vector.extract_strided_slice %3 {offsets = [0, 1], sizes = [128, 1], strides = [1, 1]} : vector<128x3xf32> to vector<128x1xf32>
    %10 = vector.extract_strided_slice %1 {offsets = [1, 0], sizes = [1, 512], strides = [1, 1]} : vector<3x512xf32> to vector<1x512xf32>
    %11 = vector.broadcast %9 : vector<128x1xf32> to vector<128x512xf32>
    %12 = vector.broadcast %10 : vector<1x512xf32> to vector<128x512xf32>
    %13 = arith.mulf %11, %12 : vector<128x512xf32>
    %14 = arith.addf %8, %13 : vector<128x512xf32>
    %15 = vector.extract_strided_slice %3 {offsets = [0, 2], sizes = [128, 1], strides = [1, 1]} : vector<128x3xf32> to vector<128x1xf32>
    %16 = vector.extract_strided_slice %1 {offsets = [2, 0], sizes = [1, 512], strides = [1, 1]} : vector<3x512xf32> to vector<1x512xf32>
    %17 = vector.broadcast %15 : vector<128x1xf32> to vector<128x512xf32>
    %18 = vector.broadcast %16 : vector<1x512xf32> to vector<128x512xf32>
    %19 = arith.mulf %17, %18 : vector<128x512xf32>
    %20 = arith.addf %14, %19 : vector<128x512xf32>
    %c0_7 = arith.constant 0 : index
    %c0_8 = arith.constant 0 : index
    %c0_9 = arith.constant 0 : index
    %c0_10 = arith.constant 0 : index
    %21 = vector.load %arg4[%c0_7, %c0_8, %c0_9, %c0_10] : memref<1x3x128x1xf32, #tpu.memory_space<vmem>>, vector<1x1x128x1xf32>
    %22 = vector.shape_cast %21 : vector<1x1x128x1xf32> to vector<128x1xf32>
    %23 = vector.broadcast %22 : vector<128x1xf32> to vector<128x512xf32>
    %24 = arith.addf %20, %23 : vector<128x512xf32>
    %cst = arith.constant 2.000000e-01 : f32
    %25 = vector.broadcast %cst : f32 to vector<128x512xf32>
    %26 = arith.mulf %25, %24 : vector<128x512xf32>
    %27 = arith.maximumf %24, %26 : vector<128x512xf32>
    %c0_11 = arith.constant 0 : index
    %c0_12 = arith.constant 0 : index
    %c0_13 = arith.constant 0 : index
    %c0_14 = arith.constant 0 : index
    %28 = vector.load %arg5[%c0_11, %c0_12, %c0_13, %c0_14] : memref<1x2x128x128xbf16, #tpu.memory_space<vmem>>, vector<1x1x128x128xbf16>
    %29 = vector.shape_cast %28 : vector<1x1x128x128xbf16> to vector<128x128xbf16>
    %30 = arith.truncf %27 : vector<128x512xf32> to vector<128x512xbf16>
    %cst_15 = arith.constant dense<0.000000e+00> : vector<128x512xf32>
    %31 = tpu.matmul %29, %30, %cst_15 {dimension_numbers = #tpu.dot_dimension_numbers<[1], [0], [0], [1], [0, 0, 1, 1], [], []>} : vector<128x128xbf16>, vector<128x512xbf16>, vector<128x512xf32> -> vector<128x512xf32>
    %c0_16 = arith.constant 0 : index
    %c1 = arith.constant 1 : index
    %c0_17 = arith.constant 0 : index
    %c0_18 = arith.constant 0 : index
    %32 = vector.load %arg4[%c0_16, %c1, %c0_17, %c0_18] : memref<1x3x128x1xf32, #tpu.memory_space<vmem>>, vector<1x1x128x1xf32>
    %33 = vector.shape_cast %32 : vector<1x1x128x1xf32> to vector<128x1xf32>
    %34 = vector.broadcast %33 : vector<128x1xf32> to vector<128x512xf32>
    %35 = arith.addf %31, %34 : vector<128x512xf32>
    %cst_19 = arith.constant 2.000000e-01 : f32
    %36 = vector.broadcast %cst_19 : f32 to vector<128x512xf32>
    %37 = arith.mulf %36, %35 : vector<128x512xf32>
    %38 = arith.maximumf %35, %37 : vector<128x512xf32>
    %c0_20 = arith.constant 0 : index
    %c1_21 = arith.constant 1 : index
    %c0_22 = arith.constant 0 : index
    %c0_23 = arith.constant 0 : index
    %39 = vector.load %arg5[%c0_20, %c1_21, %c0_22, %c0_23] : memref<1x2x128x128xbf16, #tpu.memory_space<vmem>>, vector<1x1x128x128xbf16>
    %40 = vector.shape_cast %39 : vector<1x1x128x128xbf16> to vector<128x128xbf16>
    %41 = arith.truncf %38 : vector<128x512xf32> to vector<128x512xbf16>
    %cst_24 = arith.constant dense<0.000000e+00> : vector<128x512xf32>
    %42 = tpu.matmul %40, %41, %cst_24 {dimension_numbers = #tpu.dot_dimension_numbers<[1], [0], [0], [1], [0, 0, 1, 1], [], []>} : vector<128x128xbf16>, vector<128x512xbf16>, vector<128x512xf32> -> vector<128x512xf32>
    %c0_25 = arith.constant 0 : index
    %c2 = arith.constant 2 : index
    %c0_26 = arith.constant 0 : index
    %c0_27 = arith.constant 0 : index
    %43 = vector.load %arg4[%c0_25, %c2, %c0_26, %c0_27] : memref<1x3x128x1xf32, #tpu.memory_space<vmem>>, vector<1x1x128x1xf32>
    %44 = vector.shape_cast %43 : vector<1x1x128x1xf32> to vector<128x1xf32>
    %45 = vector.broadcast %44 : vector<128x1xf32> to vector<128x512xf32>
    %46 = arith.addf %42, %45 : vector<128x512xf32>
    %cst_28 = arith.constant 2.000000e-01 : f32
    %47 = vector.broadcast %cst_28 : f32 to vector<128x512xf32>
    %48 = arith.mulf %47, %46 : vector<128x512xf32>
    %49 = arith.maximumf %46, %48 : vector<128x512xf32>
    %c0_29 = arith.constant 0 : index
    %c0_30 = arith.constant 0 : index
    %c0_31 = arith.constant 0 : index
    %50 = vector.load %arg6[%c0_29, %c0_30, %c0_31] : memref<1x128x1xf32, #tpu.memory_space<vmem>>, vector<1x128x1xf32>
    %51 = vector.shape_cast %50 : vector<1x128x1xf32> to vector<128x1xf32>
    %52 = vector.broadcast %51 : vector<128x1xf32> to vector<128x512xf32>
    %53 = arith.mulf %49, %52 : vector<128x512xf32>
    %cst_32 = arith.constant dense<0.000000e+00> : vector<512xf32>
    %54 = vector.multi_reduction <add>, %53, %cst_32 [0] : vector<128x512xf32> to vector<512xf32>
    %55 = vector.shape_cast %54 : vector<512xf32> to vector<1x512xf32>
    %c0_33 = arith.constant 0 : index
    %c0_34 = arith.constant 0 : index
    %c0_35 = arith.constant 0 : index
    %56 = vector.load %arg7[%c0_33, %c0_34, %c0_35] : memref<1x1x1xf32, #tpu.memory_space<vmem>>, vector<1x1x1xf32>
    %57 = vector.shape_cast %56 : vector<1x1x1xf32> to vector<1x1xf32>
    %58 = vector.broadcast %57 : vector<1x1xf32> to vector<1x512xf32>
    %59 = arith.addf %55, %58 : vector<1x512xf32>
    %60 = math.tanh %59 : vector<1x512xf32>
    %c0_36 = arith.constant 0 : index
    %c0_37 = arith.constant 0 : index
    %c0_38 = arith.constant 0 : index
    %61 = vector.load %arg8[%c0_36, %c0_37, %c0_38] : memref<1x1x512xf32, #tpu.memory_space<vmem>>, vector<1x1x512xf32>
    %62 = vector.shape_cast %61 : vector<1x1x512xf32> to vector<1x512xf32>
    %63 = vector.shape_cast %60 : vector<1x512xf32> to vector<1x1x512xf32>
    tpu.vector_store %arg8[%c0_36, %c0_37, %c0_38], %63 {strides = array<i32>} : memref<1x1x512xf32, #tpu.memory_space<vmem>>, vector<1x1x512xf32>,
    return
  }
  func.func @transform_0(%arg0: i32, %arg1: i32) -> (i32, i32, i32, i32) {
    %c0_i32 = arith.constant 0 : i32
    %c0_i32_0 = arith.constant 0 : i32
    %c0_i32_1 = arith.constant 0 : i32
    return %arg0, %c0_i32, %c0_i32_0, %arg1 : i32, i32, i32, i32
  }
  func.func @transform_1(%arg0: i32, %arg1: i32) -> (i32, i32, i32, i32) {
    %c0_i32 = arith.constant 0 : i32
    %c0_i32_0 = arith.constant 0 : i32
    %c0_i32_1 = arith.constant 0 : i32
    %c0_i32_2 = arith.constant 0 : i32
    return %arg0, %c0_i32, %c0_i32_0, %c0_i32_1 : i32, i32, i32, i32
  }
  func.func @transform_2(%arg0: i32, %arg1: i32) -> (i32, i32, i32, i32) {
    %c0_i32 = arith.constant 0 : i32
    %c0_i32_0 = arith.constant 0 : i32
    %c0_i32_1 = arith.constant 0 : i32
    %c0_i32_2 = arith.constant 0 : i32
    return %arg0, %c0_i32, %c0_i32_0, %c0_i32_1 : i32, i32, i32, i32
  }
  func.func @transform_3(%arg0: i32, %arg1: i32) -> (i32, i32, i32, i32) {
    %c0_i32 = arith.constant 0 : i32
    %c0_i32_0 = arith.constant 0 : i32
    %c0_i32_1 = arith.constant 0 : i32
    %c0_i32_2 = arith.constant 0 : i32
    return %arg0, %c0_i32, %c0_i32_0, %c0_i32_1 : i32, i32, i32, i32
  }
  func.func @transform_4(%arg0: i32, %arg1: i32) -> (i32, i32, i32) {
    %c0_i32 = arith.constant 0 : i32
    %c0_i32_0 = arith.constant 0 : i32
    %c0_i32_1 = arith.constant 0 : i32
    return %arg0, %c0_i32, %c0_i32_0 : i32, i32, i32
  }
  func.func @transform_5(%arg0: i32, %arg1: i32) -> (i32, i32, i32) {
    %c0_i32 = arith.constant 0 : i32
    %c0_i32_0 = arith.constant 0 : i32
    %c0_i32_1 = arith.constant 0 : i32
    return %arg0, %c0_i32, %c0_i32_0 : i32, i32, i32
  }
  func.func @transform_6(%arg0: i32, %arg1: i32) -> (i32, i32, i32) {
    %c0_i32 = arith.constant 0 : i32
    %c0_i32_0 = arith.constant 0 : i32
    return %arg0, %c0_i32, %arg1 : i32, i32, i32
  }
}

</mosaic_0001>

<bundles_post_ra>
// kernel: tpu_custom_call.1
= control target key start
LH: loop header
LB: loop body
LE: loop exit
PB: predicated region body
PF: predicated region fallthrough
CT: control target
= control target key end

     0   :  { %11 = vsyncpa [#allocation3], 0  ;;  %s4579_s0 = inlined_call_operand.vmem [shape: f32[2,1,3,512], index: 0, kind: input, shape index: {}]   ;;  %s4580_s1 = inlined_call_operand.vmem [shape: f32[2,1,128,3], index: 1, kind: input, shape index: {}]   ;;  %s4581_s2 = inlined_call_operand.vmem [shape: f32[2,3,128,1], index: 2, kind: input, shape index: {}]   ;;  %s4582_s3 = inlined_call_operand.vmem [shape: bf16[2,2,128,128], index: 3, kind: input, shape index: {}]   ;;  %s4583_s4 = inlined_call_operand.vmem [shape: f32[2,128,1], index: 4, kind: input, shape index: {}]   ;;  %s4584_s5 = inlined_call_operand.vmem [shape: f32[2,1,1], index: 5, kind: input, shape index: {}]   ;;  %s4585_s6 = inlined_call_operand.hbm [shape: f32[2,1,512], index: 6, kind: output, shape index: {}]  }
   0x1   :  { %13 = vsyncpa [#allocation3 + $0x1], 0  ;;  %s3091_s21 = smov 0   ;;  %s3093_s22 = smov 0  }
   0x2   :  { %s3095_s23 = smov 0   ;;  %s3097_s24 = smov 0  }
   0x3   :  { %s3099_s25 = smov 0   ;;  %s3101_s26 = smov 0  }
   0x4 LB: > { %s2710_s27 = sadd.s32 4294967295, %s3051_s26   ;;  %s2711_s28 = sadd.s32 4294967294, %s3051_s26   ;;  %s3051_s26 = sphi %s3101_s26, %s19_s26   ;;  %s3047_s25 = sphi %s3099_s25, %s4760_s25   ;;  %s3043_s24 = sphi %s3097_s24, %s4759_s24   ;;  %s3039_s23 = sphi %s3095_s23, %s4758_s23   ;;  %s3035_s22 = sphi %s3093_s22, %s4757_s22   ;;  %s3031_s21 = sphi %s3091_s21, %s4756_s21  }
   0x5   : > { %s31_s29 = sadd.s32 1, %s3047_s25  ;;  %s198_s30 = sadd.s32 1, %s3039_s23 }
   0x6   : > { %p33_p0 = scmp.ge.s32.totalorder %s31_s29, 2  ;;  %p208_p1 = scmp.ne.s32.totalorder %s3039_s23, %s3035_s22 }
   0x7   : > { %p209_p2 = scmp.eq.s32.totalorder %s2710_s27, 1  ;;  %p214_p3 = scmp.ne.s32.totalorder %s3035_s22, %s3031_s21 }
   0x8   : > { %s4762_s29 = smov (%p33_p0, %s31_s29), 0  ;;  %p215_p5 = scmp.eq.s32.totalorder %s2711_s28, 1 }
   0x9   : > { %p3131_p4 = por %p209_p2, %p208_p1  ;;  %s193_s8 = ssub.s32 %s3047_s25, %s4762_s29 }
   0xa   : > { %p2714_p6 = scmp.ge.s32.totalorder %s3051_s26, 1  ;;  %p196_p7 = scmp.eq.s32.totalorder %s193_s8, 0 }
   0xb   : > { %p3138_p8 = por %p215_p5, %p214_p3  ;;  %p284_p9 = scmp.lt.s32.totalorder %s3051_s26, 3 }
   0xc   : > { %s3144_s10 = scalar_select %p196_p7, %s3039_s23, %s198_s30  }
   0xd   : > { %p285_p10 = pnand %p2714_p6, %p284_p9 }
   0xf   : > { %288 = sbr.rel (%p285_p10) target bundleno = 952 (0x3b8), region = 44 }
  0x14   : > { %p342_p11 = scmp.lt.s32.totalorder %s3043_s24, 1  ;;  %v4588_v0 = vmov 2   ;;  %v4586_v1 = vmov 0   ;;  %v3055_v7 = vmov 1   ;;  %vm2548_vm0 = vcmask 1040384   ;;  %s2838_s27 = sshll.u32 %s3043_s24, 2 }
  0x15   : > { %2929 = vset.pattern.permute.xlu0 %v4588_v0  ;;  %2921 = vset.pattern.permute.xlu2 %v4586_v1  ;;  %s2573_s8 = scalar_lea.hbm %s4585_s6, %s2838_s27  ;;  %vm2550_vm1 = vcmask 1042434   ;;  %vm2552_vm2 = vcmask 1041408  }
  0x16   : > { %2920 = vset.pattern.permute.xlu1 %v4586_v1  ;;  %s3151_s11 = scalar_select %p342_p11, %s3043_s24, 1 }
  0x18   : > { %s3154_s12 = sshll.u32 %s3151_s11, 7  ;;  %s2861_s16 = smul.u32 384, %s3151_s11 }
  0x19   : > { %s3160_s15 = scalar_lea.vmem %s4580_s1, %s3154_s12  ;;  %s2841_s20 = sshll.u32 %s3151_s11, 4 }
  0x1a   : > { %v392_v2 = vld [vmem:[%s3160_s15 + $0x78] sm:$0xff]  ;;  %v390_v3 = vld [vmem:[%s3160_s15 + $0x68] sm:$0xff]  ;;  %v3165_v4 = vld [vmem:[%s3160_s15 + $0x10] sm:$0xff]  ;;  %s3191_s19 = scalar_lea.vmem %s4581_s2, %s2861_s16  ;;  %s349_s30 = scalar_lea.vmem %s4579_s0, %s2841_s20 }
  0x1b   : > { %470 = vperm.xlu2 %2921, %v392_v2   ;;  %808 = vperm.xlu0 %2929, %v390_v3   ;;  %v3169_v5 = vld [vmem:[%s3160_s15 + $0x40] sm:$0xff]  ;;  %v391_v6 = vld [vmem:[%s3160_s15 + $0x70] sm:$0xff]  ;;  %v974_v12 = vld [vmem:[%s3191_s19 + $0x78] sm:$0xff]  ;;  %s3504_s14 = scalar_lea.vmem %s4583_s4, %s3154_s12  ;;  %s3909_s17 = scalar_lea.vmem %s4582_s3, %s3154_s12 }
  0x1c   : > { %405 = vperm.xlu1 %2920, %v3165_v4   ;;  %v3175_v8 = vld [vmem:[%s3160_s15 + $0x20] sm:$0xff]  ;;  %v387_v10 = vld [vmem:[%s3160_s15 + $0x50] sm:$0xff]  ;;  %v388_v13 = vld [vmem:[%s3160_s15 + $0x58] sm:$0xff] }
  0x1d   : > { %v389_v9 = vld [vmem:[%s3160_s15 + $0x60] sm:$0xff]  ;;  %v973_v11 = vld [vmem:[%s3191_s19 + $0x70] sm:$0xff]  ;;  %v3207_v15 = vld [vmem:[%s3160_s15 + $0x8] sm:$0xff] }
  0x1e   : > { %v3200_v14 = vld [vmem:[%s3160_s15] sm:$0xff]  ;;  %v972_v17 = vld [vmem:[%s3191_s19 + $0x68] sm:$0xff]  ;;  %v384_v19 = vld [vmem:[%s3160_s15 + $0x38] sm:$0xff] }
  0x1f   : > { %v971_v16 = vld [vmem:[%s3191_s19 + $0x60] sm:$0xff]  ;;  %v386_v18 = vld [vmem:[%s3160_s15 + $0x48] sm:$0xff]  ;;  %v969_v22 = vld [vmem:[%s3191_s19 + $0x50] sm:$0xff] }
  0x20   : > { %v967_v20 = vld [vmem:[%s3191_s19 + $0x40] sm:$0xff]  ;;  %v3226_v23 = vld [vmem:[%s3160_s15 + $0x28] sm:$0xff]  ;;  %v383_v25 = vld [vmem:[%s3160_s15 + $0x30] sm:$0xff] }
  0x21   : > { %v964_v26 = vld [vmem:[%s3191_s19 + $0x28] sm:$0xff]  ;;  %v970_v27 = vld [vmem:[%s3191_s19 + $0x58] sm:$0xff]  ;;  %v961_v29 = vld [vmem:[%s3191_s19 + $0x10] sm:$0xff] }
  0x22   : > { %v960_v33 = vld [vmem:[%s3191_s19 + $0x8] sm:$0xff]  ;;  %v2737_v37 = vld [vmem:[%s3191_s19 + $0xe0] sm:$0xff]  ;;  %v2736_v44 = vld [vmem:[%s3191_s19 + $0xd8] sm:$0xff] }
  0x23   : > { %2922 = vset.pattern.permute.xlu2 %v3055_v7  ;;  %788 = vperm.xlu0 %2929, %v3169_v5   ;;  %v968_v39 = vld [vmem:[%s3191_s19 + $0x48] sm:$0xff]  ;;  %v375_v41 = vld [vmem:[%s349_s30] sm:$0x77] }
  0x24   : > { %465 = vperm.xlu1 %2920, %v391_v6   ;;  %608 = vperm.xlu2 %2922, %v391_v6   ;;  %v376_v42 = vld [vmem:[%s349_s30 + $0x8] sm:$0x77]  ;;  %v475_v45 = vperm.slane %v375_v41, 0  ;;  %v476_v46 = vperm.slane %v375_v41, 4  ;;  %v615_v48 = vperm.slane %v375_v41, 1  ;;  %v616_v50 = vperm.slane %v375_v41, 5 }
  0x25   : > { %v477_v47 = vperm.slane %v376_v42, 0  ;;  %v478_v49 = vperm.slane %v376_v42, 4  ;;  %v617_v51 = vperm.slane %v376_v42, 1  ;;  %v618_v52 = vperm.slane %v376_v42, 5 }
  0x26   : > { %v3273_v54 = vperm.slane %v475_v45, 0  ;;  %v3275_v55 = vperm.slane %v476_v46, 0  ;;  %v3279_v57 = vperm.slane %v615_v48, 1  ;;  %v3284_v59 = vperm.slane %v616_v50, 1 }
  0x27   : > { %v3277_v56 = vperm.slane %v477_v47, 0  ;;  %v3282_v58 = vperm.slane %v478_v49, 0  ;;  %v3286_v60 = vperm.slane %v617_v51, 1  ;;  %v3288_v61 = vperm.slane %v618_v52, 1 }
  0x28   : > { %v819_v63 = vperm.slane %v375_v41, 2 }
  0x2b   : > { %772 = vperm.xlu0 %2929, %v3175_v8  }
  0x2c   : > { %2923 = vset.pattern.permute.xlu1 %v4588_v0  ;;  %2924 = vset.pattern.permute.xlu2 %v4588_v0 }
  0x2d   : > { %812 = vperm.xlu1 %2923, %v391_v6   ;;  %816 = vperm.xlu2 %2924, %v392_v2   ;;  %v822_v6 = vperm.slane %v376_v42, 6 }
  0x33   : > { %2950 = vset.pattern.permute.xlu0 %v3055_v7 }
  0x34   : > { %612 = vperm.xlu0 %2950, %v392_v2   ;;  %v820_v2 = vperm.slane %v375_v41, 6 }
  0x35   : > { %2925 = vset.pattern.permute.xlu1 %v4586_v1  ;;  %2926 = vset.pattern.permute.xlu2 %v4586_v1 }
  0x36   : > { %455 = vperm.xlu1 %2925, %v389_v9   ;;  %460 = vperm.xlu2 %2926, %v390_v3  }
  0x3c   : > { %600 = vperm.xlu0 %2950, %v389_v9  }
  0x3e   : > { %2927 = vset.pattern.permute.xlu1 %v3055_v7  ;;  %2928 = vset.pattern.permute.xlu2 %v4588_v0 }
  0x3f   : > { %604 = vperm.xlu1 %2927, %v390_v3   ;;  %804 = vperm.xlu2 %2928, %v389_v9   ;;  %v821_v3 = vperm.slane %v376_v42, 2 }
  0x44   : > { %592 = vperm.xlu0 %2950, %v387_v10  }
  0x47   : > { %2930 = vset.pattern.permute.xlu1 %v4586_v1  ;;  %2931 = vset.pattern.permute.xlu2 %v4586_v1 }
  0x48   : > { %1047 = vperm.xlu1 %2930, %v973_v11   ;;  %1052 = vperm.xlu2 %2931, %v974_v12  }
  0x4c   : > { %560 = vperm.xlu0 %2950, %v3165_v4  }
  0x50   : > { %445 = vperm.xlu1 %2930, %v387_v10   ;;  %450 = vperm.xlu2 %2931, %v388_v13  }
  0x54   : > { %2954 = vset.pattern.permute.xlu0 %v4586_v1 }
  0x55   : > { %395 = vperm.xlu0 %2954, %v3200_v14  }
  0x58   : > { %2932 = vset.pattern.permute.xlu1 %v3055_v7  ;;  %2933 = vset.pattern.permute.xlu2 %v4588_v0 }
  0x59   : > { %596 = vperm.xlu1 %2932, %v388_v13   ;;  %796 = vperm.xlu2 %2933, %v387_v10  }
  0x5d   : > { %400 = vperm.xlu0 %2954, %v3207_v15  }
  0x61   : > { %2934 = vset.pattern.permute.xlu1 %v4588_v0  ;;  %2935 = vset.pattern.permute.xlu2 %v4586_v1 }
  0x62   : > { %800 = vperm.xlu1 %2934, %v388_v13   ;;  %1037 = vperm.xlu2 %2935, %v971_v16   ;;  %v2731_v13 = vld [vmem:[%s3191_s19 + $0xb0] sm:$0xff] }
  0x65   : > { %1042 = vperm.xlu0 %2954, %v972_v17  }
  0x6a   : > { %2936 = vset.pattern.permute.xlu1 %v4586_v1  ;;  %440 = vperm.xlu2 %2935, %v386_v18  }
  0x6b   : > { %435 = vperm.xlu1 %2936, %v3169_v5  }
  0x6d   : > { %430 = vperm.xlu0 %2954, %v384_v19  }
  0x72   : > { %2938 = vset.pattern.permute.xlu2 %v3055_v7 }
  0x73   : > { %2937 = vset.pattern.permute.xlu1 %v3055_v7  ;;  %588 = vperm.xlu2 %2938, %v386_v18  }
  0x74   : > { %584 = vperm.xlu1 %2937, %v3169_v5  }
  0x75   : > { %1017 = vperm.xlu0 %2954, %v967_v20   ;;  %v3222_v21 = vpop.permute.xlu2 %470  ;;  %v3310_v20 = vperm.slane %v819_v63, 2 }
  0x76   : > { %v547_v16 = vmul.f32 %v3273_v54, %v3222_v21  ;;  %v548_v17 = vmul.f32 %v3275_v55, %v3222_v21 }
  0x7b   : > { %2940 = vset.pattern.permute.xlu2 %v4586_v1 }
  0x7c   : > { %2939 = vset.pattern.permute.xlu1 %v4588_v0  ;;  %1027 = vperm.xlu2 %2940, %v969_v22   ;;  %v3312_v22 = vperm.slane %v820_v2, 2 }
  0x7d   : > { %792 = vperm.xlu1 %2939, %v386_v18   ;;  %420 = vperm.xlu0 %2954, %v3226_v23   ;;  %v549_v18 = vmul.f32 %v3277_v56, %v3222_v21 }
  0x7e   : > { %v3231_v24 = vpop.permute.xlu2 %608 }
  0x7f   : > { %v683_v45 = vmul.f32 %v3279_v57, %v3231_v24  ;;  %v684_v46 = vmul.f32 %v3284_v59, %v3231_v24  ;;  %v685_v47 = vmul.f32 %v3286_v60, %v3231_v24  ;;  %v686_v63 = vmul.f32 %v3288_v61, %v3231_v24 }
  0x84   : > { %425 = vperm.xlu2 %2940, %v383_v25  }
  0x85   : > { %2941 = vset.pattern.permute.xlu1 %v4586_v1  ;;  %1002 = vperm.xlu0 %2954, %v964_v26   ;;  %v3316_v26 = vperm.slane %v822_v6, 2 }
  0x86   : > { %1032 = vperm.xlu1 %2941, %v970_v27  }
  0x87   : > { %v3237_v28 = vpop.permute.xlu2 %816 }
  0x88   : > { %v892_v41 = vmul.f32 %v3312_v22, %v3237_v28 }
  0x8c   : > { %2943 = vset.pattern.permute.xlu2 %v3055_v7 }
  0x8d   : > { %580 = vperm.xlu2 %2943, %v384_v19   ;;  %987 = vperm.xlu0 %2954, %v961_v29   ;;  %v3241_v30 = vpop.permute.xlu0 %808 }
  0x8e   : > { %2942 = vset.pattern.permute.xlu1 %v3055_v7  ;;  %v3244_v31 = vpop.permute.xlu1 %405 }
  0x8f   : > { %576 = vperm.xlu1 %2942, %v383_v25  }
  0x90   : > { %v3246_v32 = vpop.permute.xlu2 %460 }
  0x95   : > { %2945 = vset.pattern.permute.xlu2 %v4588_v0  ;;  %982 = vperm.xlu0 %2954, %v960_v33   ;;  %v3250_v34 = vpop.permute.xlu0 %788 }
  0x96   : > { %v3252_v35 = vpop.permute.xlu1 %465  ;;  %784 = vperm.xlu2 %2945, %v384_v19   ;;  %v550_v19 = vmul.f32 %v3282_v58, %v3222_v21  ;;  %v891_v21 = vmul.f32 %v3310_v20, %v3237_v28 }
  0x97   : > { %2944 = vset.pattern.permute.xlu1 %v4588_v0  ;;  %v543_v50 = vmul.f32 %v3273_v54, %v3252_v35  ;;  %v544_v2 = vmul.f32 %v3275_v55, %v3252_v35 }
  0x98   : > { %780 = vperm.xlu1 %2944, %v383_v25  }
  0x99   : > { %v3255_v36 = vpop.permute.xlu2 %804 }
  0x9d   : > { %1374 = vperm.xlu0 %2954, %v2737_v37   ;;  %v3262_v38 = vpop.permute.xlu0 %772 }
  0x9e   : > { %2947 = vset.pattern.permute.xlu2 %v4586_v1 }
  0x9f   : > { %v3266_v40 = vpop.permute.xlu1 %812  ;;  %415 = vperm.xlu2 %2947, %v3175_v8  }
  0xa0   : > { %2946 = vset.pattern.permute.xlu1 %v4586_v1 }
  0xa1   : > { %1022 = vperm.xlu1 %2946, %v968_v39   ;;  %v965_v39 = vld [vmem:[%s3191_s19 + $0x30] sm:$0xff] }
  0xa2   : > { %v3270_v43 = vpop.permute.xlu2 %1052 }
  0xa5   : > { %1369 = vperm.xlu0 %2954, %v2736_v44   ;;  %v894_v44 = vmul.f32 %v3316_v26, %v3237_v28 }
  0xa6   : > { %v613_v53 = vpop.permute.xlu0 %612 }
  0xa7   : > { %2949 = vset.pattern.permute.xlu2 %v3055_v7  ;;  %v687_v5 = vmul.f32 %v3279_v57, %v613_v53  ;;  %v688_v9 = vmul.f32 %v3284_v59, %v613_v53  ;;  %v689_v10 = vmul.f32 %v3286_v60, %v613_v53  ;;  %v690_v11 = vmul.f32 %v3288_v61, %v613_v53 }
  0xa8   : > { %v3290_v62 = vpop.permute.xlu1 %455  ;;  %572 = vperm.xlu2 %2949, %v3226_v23  }
  0xa9   : > { %2948 = vset.pattern.permute.xlu1 %v3055_v7  ;;  %v751_v25 = vadd.f32 %v687_v5, %v547_v16  ;;  %v752_v27 = vadd.f32 %v688_v9, %v548_v17  ;;  %v753_v29 = vadd.f32 %v689_v10, %v549_v18  ;;  %v754_v33 = vadd.f32 %v690_v11, %v550_v19  ;;  %v3365_v16 = vld [vmem:[%s3160_s15 + $0x18] sm:$0xff]  ;;  %s2577_s15 = sshll.u32 %s2573_s8, 4  ;;  %s2578_s15 = int_to_ptr.hbm [resolvable:$true] %s2577_s15 }
  0xaa   : > { %568 = vperm.xlu1 %2948, %v3175_v8   ;;  %v3299_v12 = vpop.permute.xlu2 %450  ;;  %v3314_v8 = vperm.slane %v821_v3, 2  ;;  %v545_v3 = vmul.f32 %v3277_v56, %v3252_v35  ;;  %v546_v5 = vmul.f32 %v3282_v58, %v3252_v35  ;;  %v887_v9 = vmul.f32 %v3310_v20, %v3266_v40  ;;  %s2987_s16 = sshra.s32 %s2578_s15, 4  ;;  %s2988_s16 = int_to_ptr.hbm [resolvable:$true] %s2987_s16 }
  0xab   : > { %v955_v49 = vadd.f32 %v891_v21, %v751_v25  ;;  %v956_v51 = vadd.f32 %v892_v41, %v752_v27  ;;  %v958_v53 = vadd.f32 %v894_v44, %v754_v33  ;;  %v888_v10 = vmul.f32 %v3312_v22, %v3266_v40  ;;  %p2994_p1 = scmp.lt.s32.totalorder %s2988_s16, %s4585_s6 }
  0xac   : > { %v893_v42 = vmul.f32 %v3314_v8, %v3237_v28  ;;  %v2730_v28 = vld [vmem:[%s3191_s19 + $0xa8] sm:$0xff]  ;;  %v889_v24 = vmul.f32 %v3314_v8, %v3266_v40  ;;  %v890_v11 = vmul.f32 %v3316_v26, %v3266_v40  ;;  %v748_v25 = vadd.f32 %v684_v46, %v544_v2  ;;  %v966_v40 = vld [vmem:[%s3191_s19 + $0x38] sm:$0xff] }
  0xad   : > { %1344 = vperm.xlu0 %2954, %v2731_v13   ;;  %v1115_v35 = vadd.f32 %v3270_v43, %v955_v49  ;;  %v1116_v17 = vadd.f32 %v3270_v43, %v956_v51  ;;  %v1118_v19 = vadd.f32 %v3270_v43, %v958_v53  ;;  %v749_v27 = vadd.f32 %v685_v47, %v545_v3 }
  0xae   : > { %v3318_v37 = vpop.permute.xlu0 %600  ;;  %v957_v52 = vadd.f32 %v893_v42, %v753_v29  ;;  %v750_v29 = vadd.f32 %v686_v63, %v546_v5  ;;  %v952_v41 = vadd.f32 %v888_v10, %v748_v25  ;;  %v496_v53 = vmul.f32 %v3275_v55, %v3244_v31 }
  0xaf   : > { %v1179_v21 = vmul.f32 0.2, %v1115_v35  ;;  %v953_v42 = vadd.f32 %v889_v24, %v749_v27  ;;  %v1180_v49 = vmul.f32 0.2, %v1116_v17  ;;  %v497_v63 = vmul.f32 %v3277_v56, %v3244_v31 }
  0xb0   : > { %2952 = vset.pattern.permute.xlu2 %v4586_v1  ;;  %v1117_v18 = vadd.f32 %v3270_v43, %v957_v52  ;;  %v954_v44 = vadd.f32 %v890_v11, %v750_v29  ;;  %v495_v52 = vmul.f32 %v3273_v54, %v3244_v31  ;;  %v498_v2 = vmul.f32 %v3282_v58, %v3244_v31 }
  0xb1   : > { %v3336_v48 = vpop.permute.xlu1 %604  ;;  %1007 = vperm.xlu2 %2952, %v965_v39   ;;  %v2725_v39 = vld [vmem:[%s3191_s19 + $0x80] sm:$0xff] }
  0xb2   : > { %2951 = vset.pattern.permute.xlu1 %v4588_v0 }
  0xb3   : > { %776 = vperm.xlu1 %2951, %v3226_v23   ;;  %v3351_v6 = vpop.permute.xlu2 %796  ;;  %v747_v23 = vadd.f32 %v683_v45, %v543_v50  ;;  %v1181_v50 = vmul.f32 0.2, %v1117_v18 }
  0xb5   : > { %1339 = vperm.xlu0 %2954, %v2730_v28   ;;  %v951_v33 = vadd.f32 %v887_v9, %v747_v23  ;;  %v1182_v28 = vmul.f32 0.2, %v1118_v19  ;;  %v1243_v9 = vmax.f32 %v1115_v35, %v1179_v21  ;;  %v1244_v23 = vmax.f32 %v1116_v17, %v1180_v49 }
  0xb6   : > { %v3362_v13 = vpop.permute.xlu0 %592  ;;  %v1245_v25 = vmax.f32 %v1117_v18, %v1181_v50 }
  0xb7   : > { %v1246_v29 = vmax.f32 %v1118_v19, %v1182_v28 }
  0xb9   : > { %410 = vperm.xlu2 %2952, %v3365_v16  }
  0xba   : > { %v1048_v45 = vpop.permute.xlu1 %1047 }
  0xbb   : > { %2953 = vset.pattern.permute.xlu1 %v4586_v1  ;;  %v1111_v51 = vadd.f32 %v1048_v45, %v951_v33  ;;  %v1112_v43 = vadd.f32 %v1048_v45, %v952_v41  ;;  %v1113_v46 = vadd.f32 %v1048_v45, %v953_v42  ;;  %v1114_v47 = vadd.f32 %v1048_v45, %v954_v44 }
  0xbc   : > { %1012 = vperm.xlu1 %2953, %v966_v40   ;;  %v3382_v3 = vpop.permute.xlu2 %1037 }
  0xbd   : > { %1314 = vperm.xlu0 %2954, %v2725_v39   ;;  %v1175_v5 = vmul.f32 0.2, %v1111_v51  ;;  %v1176_v10 = vmul.f32 0.2, %v1112_v43  ;;  %v1177_v24 = vmul.f32 0.2, %v1113_v46 }
  0xbe   : > { %v561_v11 = vpop.permute.xlu0 %560  ;;  %v1178_v27 = vmul.f32 0.2, %v1114_v47 }
  0xbf   : > { %v635_v33 = vmul.f32 %v3279_v57, %v561_v11  ;;  %v636_v41 = vmul.f32 %v3284_v59, %v561_v11  ;;  %v637_v42 = vmul.f32 %v3286_v60, %v561_v11  ;;  %v638_v31 = vmul.f32 %v3288_v61, %v561_v11 }
  0xc0   : > { %v1239_v40 = vmax.f32 %v1111_v51, %v1175_v5  ;;  %v1240_v44 = vmax.f32 %v1112_v43, %v1176_v10  ;;  %v1241_v39 = vmax.f32 %v1113_v46, %v1177_v24  ;;  %v1242_v35 = vmax.f32 %v1114_v47, %v1178_v27  ;;  %v2790_v43 = vld [vmem:[%s3191_s19 + $0x108] sm:$0xff]  ;;  %v2793_v27 = vld [vmem:[%s3191_s19 + $0x120] sm:$0xff] }
  0xc1   : > { %v3388_v21 = vadd.f32 %v635_v33, %v495_v52  ;;  %v3390_v45 = vadd.f32 %v636_v41, %v496_v53  ;;  %v3392_v17 = vadd.f32 %v637_v42, %v497_v63  ;;  %v3394_v18 = vadd.f32 %v638_v31, %v498_v2  ;;  %2956 = vset.pattern.permute.xlu2 %v4588_v0 }
  0xc2   : > { %v3397_v19 = vpop.permute.xlu1 %445  ;;  %764 = vperm.xlu2 %2956, %v3165_v4   ;;  %v1291_v49 = vpack.c.bf16 %v1243_v9, %v1239_v40  ;;  %v1292_v50 = vpack.c.bf16 %v1244_v23, %v1240_v44  ;;  %v1293_v28 = vpack.c.bf16 %v1245_v25, %v1241_v39  ;;  %v1294_v51 = vpack.c.bf16 %v1246_v29, %v1242_v35  ;;  %v963_v4 = vld [vmem:[%s3191_s19 + $0x20] sm:$0xff] }
  0xc3   : > { %4628 = vst [vmem:[#allocation5_spill] sm:$0xff] %v3388_v21  ;;  %v675_v52 = vmul.f32 %v3279_v57, %v3318_v37  ;;  %v883_v53 = vmul.f32 %v3310_v20, %v3241_v30  ;;  %v535_v63 = vmul.f32 %v3273_v54, %v3290_v62  ;;  %v676_v2 = vmul.f32 %v3284_v59, %v3318_v37 }
  0xc4   : > { %4629 = vst [vmem:[#allocation6_spill] sm:$0xff] %v3390_v45  ;;  %1440 = vmatpush.bf16.msra.mxu0 %v1291_v49  ;;  %1489 = vmatpush.bf16.msra.mxu1 %v1292_v50  ;;  %v3401_v46 = vpop.permute.xlu2 %440  ;;  %v677_v5 = vmul.f32 %v3286_v60, %v3318_v37  ;;  %v678_v9 = vmul.f32 %v3288_v61, %v3318_v37 }
  0xc5   : > { %4630 = vst [vmem:[#allocation7_spill] sm:$0xff] %v3392_v17  ;;  %1538 = vmatpush.bf16.msra.mxu2 %v1293_v28  ;;  %1587 = vmatpush.bf16.msra.mxu3 %v1294_v51  ;;  %v879_v24 = vmul.f32 %v3310_v20, %v3255_v36  ;;  %v880_v11 = vmul.f32 %v3312_v22, %v3255_v36 }
  0xc6   : > { %4631 = vst [vmem:[#allocation8_spill] sm:$0xff] %v3394_v18  ;;  %2955 = vset.pattern.permute.xlu1 %v3055_v7  ;;  %1837 = vperm.xlu0 %2954, %v2790_v43   ;;  %v881_v23 = vmul.f32 %v3314_v8, %v3255_v36  ;;  %v882_v25 = vmul.f32 %v3316_v26, %v3255_v36 }
  0xc7   : > { %564 = vperm.xlu1 %2955, %v3365_v16   ;;  %v3405_v47 = vpop.permute.xlu0 %395  ;;  %v536_v29 = vmul.f32 %v3275_v55, %v3290_v62  ;;  %v537_v37 = vmul.f32 %v3277_v56, %v3290_v62  ;;  %v538_v33 = vmul.f32 %v3282_v58, %v3290_v62  ;;  %v739_v41 = vadd.f32 %v675_v52, %v535_v63 }
  0xc8   : > { %4632 = vst [vmem:[#allocation9_spill] sm:$0xff] %v3405_v47  ;;  %v679_v31 = vmul.f32 %v3279_v57, %v3336_v48  ;;  %v680_v40 = vmul.f32 %v3284_v59, %v3336_v48  ;;  %v681_v36 = vmul.f32 %v3286_v60, %v3336_v48  ;;  %v682_v44 = vmul.f32 %v3288_v61, %v3336_v48 }
  0xc9   : > { %v740_v39 = vadd.f32 %v676_v2, %v536_v29  ;;  %v741_v35 = vadd.f32 %v677_v5, %v537_v37  ;;  %v742_v49 = vadd.f32 %v678_v9, %v538_v33  ;;  %v539_v50 = vmul.f32 %v3273_v54, %v3246_v32 }
  0xca   : > { %2958 = vset.pattern.permute.xlu2 %v4586_v1  ;;  %v540_v28 = vmul.f32 %v3275_v55, %v3246_v32  ;;  %v541_v51 = vmul.f32 %v3277_v56, %v3246_v32  ;;  %v542_v48 = vmul.f32 %v3282_v58, %v3246_v32  ;;  %v884_v43 = vmul.f32 %v3312_v22, %v3241_v30  ;;  %v2796_v1 = vld [vmem:[%s3191_s19 + $0x138] sm:$0xff] }
  0xcb   : > { %v3421_v10 = vpop.permute.xlu1 %596  ;;  %997 = vperm.xlu2 %2958, %v963_v4   ;;  %v885_v4 = vmul.f32 %v3314_v8, %v3241_v30  ;;  %v886_v52 = vmul.f32 %v3316_v26, %v3241_v30  ;;  %v943_v63 = vadd.f32 %v879_v24, %v739_v41  ;;  %v743_v2 = vadd.f32 %v679_v31, %v539_v50 }
  0xcc   : > { %v744_v5 = vadd.f32 %v680_v40, %v540_v28  ;;  %v745_v9 = vadd.f32 %v681_v36, %v541_v51  ;;  %v945_v29 = vadd.f32 %v881_v23, %v741_v35  ;;  %v946_v37 = vadd.f32 %v882_v25, %v742_v49 }
  0xcd   : > { %v3438_v42 = vpop.permute.xlu2 %588  ;;  %v1103_v32 = vadd.f32 %v3382_v3, %v943_v63  ;;  %v947_v31 = vadd.f32 %v883_v53, %v743_v2 }
  0xce   : > { %1852 = vperm.xlu0 %2954, %v2793_v27   ;;  %v746_v27 = vadd.f32 %v682_v44, %v542_v48  ;;  %v1105_v30 = vadd.f32 %v3382_v3, %v945_v29  ;;  %v1106_v24 = vadd.f32 %v3382_v3, %v946_v37  ;;  %v948_v40 = vadd.f32 %v884_v43, %v744_v5 }
  0xcf   : > { %2957 = vset.pattern.permute.xlu1 %v4588_v0  ;;  %v3449_v62 = vpop.permute.xlu0 %400  ;;  %v949_v36 = vadd.f32 %v885_v4, %v745_v9  ;;  %v1167_v23 = vmul.f32 0.2, %v1103_v32  ;;  %v4634_v4 = vmov 2  }
  0xd0   : > { %4633 = vst [vmem:[#allocation10_spill] sm:$0xff] %v3449_v62  ;;  %768 = vperm.xlu1 %2957, %v3365_v16   ;;  %v944_v16 = vadd.f32 %v880_v11, %v740_v39  ;;  %v950_v44 = vadd.f32 %v886_v52, %v746_v27  ;;  %v1170_v28 = vmul.f32 0.2, %v1106_v24 }
  0xd1   : > { %v1231_v52 = vmax.f32 %v1103_v32, %v1167_v23  ;;  %v667_v23 = vmul.f32 %v3279_v57, %v3362_v13 }
  0xd2   : > { %v1104_v0 = vadd.f32 %v3382_v3, %v944_v16  ;;  %v1169_v3 = vmul.f32 0.2, %v1105_v30  ;;  %v1234_v16 = vmax.f32 %v1106_v24, %v1170_v28  ;;  %v530_v28 = vmul.f32 %v3282_v58, %v3397_v19 }
  0xd3   : > { %2960 = vset.pattern.permute.xlu2 %v3055_v7 }
  0xd4   : > { %v3468_v33 = vpop.permute.xlu1 %800  ;;  %556 = vperm.xlu2 %2960, %v3207_v15   ;;  %v1168_v50 = vmul.f32 0.2, %v1104_v0  ;;  %v1233_v27 = vmax.f32 %v1105_v30, %v1169_v3  ;;  %v4635_v30 = vmov 0   ;;  %v670_v3 = vmul.f32 %v3288_v61, %v3362_v13 }
  0xd6   : > { %v3475_v41 = vpop.permute.xlu2 %1027  ;;  %1867 = vperm.xlu0 %2954, %v2796_v1   ;;  %v2799_v1 = vld [vmem:[%s3191_s19 + $0x150] sm:$0xff]  ;;  %v1232_v9 = vmax.f32 %v1104_v0, %v1168_v50  ;;  %v959_v0 = vld [vmem:[%s3191_s19] sm:$0xff]  ;;  %v2740_v50 = vld [vmem:[%s3191_s19 + $0xf8] sm:$0xff] }
  0xd7   : > { %v1043_v11 = vpop.permute.xlu0 %1042 }
  0xd8   : > { %2959 = vset.pattern.permute.xlu1 %v3055_v7  ;;  %v1107_v25 = vadd.f32 %v1043_v11, %v947_v31  ;;  %v1108_v39 = vadd.f32 %v1043_v11, %v948_v40  ;;  %v1109_v35 = vadd.f32 %v1043_v11, %v949_v36  ;;  %v1110_v49 = vadd.f32 %v1043_v11, %v950_v44  ;;  %v962_v11 = vld [vmem:[%s3191_s19 + $0x18] sm:$0xff] }
  0xd9   : > { %552 = vperm.xlu1 %2959, %v3200_v14  }
  0xda   : > { %v1171_v51 = vmul.f32 0.2, %v1107_v25  ;;  %v1172_v53 = vmul.f32 0.2, %v1108_v39  ;;  %v1173_v48 = vmul.f32 0.2, %v1109_v35 }
  0xdb   : > { %v1174_v43 = vmul.f32 0.2, %v1110_v49 }
  0xdc   : > { %2962 = vset.pattern.permute.xlu2 %v4634_v4  ;;  %v1235_v63 = vmax.f32 %v1107_v25, %v1171_v51  ;;  %v1236_v2 = vmax.f32 %v1108_v39, %v1172_v53  ;;  %v1237_v7 = vmax.f32 %v1109_v35, %v1173_v48  ;;  %v669_v25 = vmul.f32 %v3286_v60, %v3362_v13  ;;  %v2282_v51 = vld [vmem:[%s3504_s14] sm:$0xff] }
  0xdd   : > { %v3481_v5 = vpop.permute.xlu1 %435  ;;  %760 = vperm.xlu2 %2962, %v3207_v15   ;;  %v1238_v29 = vmax.f32 %v1110_v49, %v1174_v43  ;;  %v2802_v15 = vld [vmem:[%s3191_s19 + $0x168] sm:$0xff]  ;;  %v527_v39 = vmul.f32 %v3273_v54, %v3397_v19  ;;  %v528_v35 = vmul.f32 %v3275_v55, %v3397_v19  ;;  %v529_v49 = vmul.f32 %v3277_v56, %v3397_v19 }
  0xde   : > { %v3484_v37 = vpop.permute.xlu2 %425  ;;  %1882 = vperm.xlu0 %2954, %v2799_v1   ;;  %v1287_v31 = vpack.c.bf16 %v1235_v63, %v1231_v52  ;;  %v1288_v40 = vpack.c.bf16 %v1236_v2, %v1232_v9  ;;  %v1289_v32 = vpack.c.bf16 %v1237_v7, %v1233_v27  ;;  %v871_v53 = vmul.f32 %v3310_v20, %v3351_v6  ;;  %v2739_v27 = vld [vmem:[%s3191_s19 + $0xf0] sm:$0xff] }
  0xdf   : > { %v1290_v36 = vpack.c.bf16 %v1238_v29, %v1234_v16  ;;  %v872_v48 = vmul.f32 %v3312_v22, %v3351_v6  ;;  %v873_v43 = vmul.f32 %v3314_v8, %v3351_v6  ;;  %v733_v52 = vadd.f32 %v669_v25, %v529_v49  ;;  %v2285_v25 = vld [vmem:[%s3504_s14 + $0x18] sm:$0xff] }
  0xe0   : > { %1441 = vmatpush.bf16.msra.mxu0 %v1287_v31  ;;  %1490 = vmatpush.bf16.msra.mxu1 %v1288_v40  ;;  %v532_v63 = vmul.f32 %v3275_v55, %v3299_v12  ;;  %v533_v2 = vmul.f32 %v3277_v56, %v3299_v12  ;;  %v874_v7 = vmul.f32 %v3316_v26, %v3351_v6 }
  0xe1   : > { %2961 = vset.pattern.permute.xlu1 %v4634_v4  ;;  %1539 = vmatpush.bf16.msra.mxu2 %v1289_v32  ;;  %v731_v4 = vadd.f32 %v667_v23, %v527_v39  ;;  %v734_v9 = vadd.f32 %v670_v3, %v530_v28  ;;  %v671_v29 = vmul.f32 %v3279_v57, %v3421_v10 }
  0xe2   : > { %756 = vperm.xlu1 %2961, %v3200_v14   ;;  %1588 = vmatpush.bf16.msra.mxu3 %v1290_v36  ;;  %v668_v14 = vmul.f32 %v3284_v59, %v3362_v13  ;;  %v531_v13 = vmul.f32 %v3273_v54, %v3299_v12  ;;  %v672_v31 = vmul.f32 %v3284_v59, %v3421_v10 }
  0xe3   : > { %v673_v40 = vmul.f32 %v3286_v60, %v3421_v10  ;;  %v674_v32 = vmul.f32 %v3288_v61, %v3421_v10  ;;  %v534_v6 = vmul.f32 %v3282_v58, %v3299_v12  ;;  %v935_v36 = vadd.f32 %v871_v53, %v731_v4  ;;  %v2735_v10 = vld [vmem:[%s3191_s19 + $0xd0] sm:$0xff] }
  0xe4   : > { %v732_v1 = vadd.f32 %v668_v14, %v528_v35  ;;  %v877_v23 = vmul.f32 %v3314_v8, %v3468_v33  ;;  %v878_v14 = vmul.f32 %v3316_v26, %v3468_v33  ;;  %v938_v49 = vadd.f32 %v874_v7, %v734_v9 }
  0xe5   : > { %2964 = vset.pattern.permute.xlu2 %v4635_v30  ;;  %v1095_v12 = vadd.f32 %v3475_v41, %v935_v36  ;;  %v736_v3 = vadd.f32 %v672_v31, %v532_v63  ;;  %v737_v28 = vadd.f32 %v673_v40, %v533_v2  ;;  %v514_v17 = vmul.f32 %v3282_v58, %v3484_v37 }
  0xe6   : > { %v3491_v24 = vpop.permute.xlu1 %584  ;;  %977 = vperm.xlu2 %2964, %v959_v0   ;;  %1897 = vperm.xlu0 %2954, %v2802_v15   ;;  %v936_v0 = vadd.f32 %v872_v48, %v732_v1  ;;  %v937_v15 = vadd.f32 %v873_v43, %v733_v52  ;;  %v1098_v53 = vadd.f32 %v3475_v41, %v938_v49 }
  0xe7   : > { %v3493_v44 = vpop.permute.xlu2 %580  ;;  %v941_v4 = vadd.f32 %v877_v23, %v737_v28 }
  0xe8   : > { %v1096_v39 = vadd.f32 %v3475_v41, %v936_v0  ;;  %v1097_v35 = vadd.f32 %v3475_v41, %v937_v15  ;;  %v1162_v41 = vmul.f32 0.2, %v1098_v53 }
  0xea   : > { %2963 = vset.pattern.permute.xlu1 %v4635_v30  ;;  %v875_v30 = vmul.f32 %v3310_v20, %v3468_v33  ;;  %v1160_v36 = vmul.f32 0.2, %v1096_v39  ;;  %v1161_v0 = vmul.f32 0.2, %v1097_v35  ;;  %v1226_v49 = vmax.f32 %v1098_v53, %v1162_v41  ;;  %v2729_v53 = vld [vmem:[%s3191_s19 + $0xa0] sm:$0xff] }
  0xeb   : > { %992 = vperm.xlu1 %2963, %v962_v11   ;;  %v876_v11 = vmul.f32 %v3312_v22, %v3468_v33  ;;  %v2738_v33 = vld [vmem:[%s3191_s19 + $0xe8] sm:$0xff] }
  0xed   : > { %v940_v43 = vadd.f32 %v876_v11, %v736_v3 }
  0xee   : > { %1389 = vperm.xlu2 %2964, %v2740_v50   ;;  %2300 = vperm.xlu0 %2954, %v2282_v51   ;;  %v735_v50 = vadd.f32 %v671_v29, %v531_v13  ;;  %v738_v51 = vadd.f32 %v674_v32, %v534_v6  ;;  %v2734_v29 = vld [vmem:[%s3191_s19 + $0xc8] sm:$0xff]  ;;  %v2288_v6 = vld [vmem:[%s3504_s14 + $0x30] sm:$0xff] }
  0xef   : > { %v3529_v19 = vpop.permute.xlu1 %792 }
  0xf0   : > { %v3538_v16 = vpop.permute.xlu2 %784  ;;  %v939_v48 = vadd.f32 %v875_v30, %v735_v50  ;;  %v942_v1 = vadd.f32 %v878_v14, %v738_v51  ;;  %v1224_v30 = vmax.f32 %v1096_v39, %v1160_v36  ;;  %v520_v36 = vmul.f32 %v3275_v55, %v3481_v5 }
  0xf3   : > { %1384 = vperm.xlu1 %2963, %v2739_v27   ;;  %v1159_v27 = vmul.f32 0.2, %v1095_v12 }
  0xf5   : > { %v1223_v15 = vmax.f32 %v1095_v12, %v1159_v27  ;;  %v659_v12 = vmul.f32 %v3279_v57, %v3491_v24  ;;  %v2291_v27 = vld [vmem:[%s3504_s14 + $0x48] sm:$0xff] }
  0xf6   : > { %1364 = vperm.xlu2 %2964, %v2735_v10   ;;  %2315 = vperm.xlu0 %2954, %v2285_v25   ;;  %v1225_v10 = vmax.f32 %v1097_v35, %v1161_v0  ;;  %v431_v35 = vpop.permute.xlu0 %430  ;;  %v521_v0 = vmul.f32 %v3277_v56, %v3481_v5 }
  0xf8   : > { %v1033_v52 = vpop.permute.xlu1 %1032 }
  0xf9   : > { %v3565_v7 = vpop.permute.xlu2 %415  ;;  %v1099_v13 = vadd.f32 %v1033_v52, %v939_v48  ;;  %v1100_v63 = vadd.f32 %v1033_v52, %v940_v43  ;;  %v1101_v2 = vadd.f32 %v1033_v52, %v941_v4  ;;  %v1102_v9 = vadd.f32 %v1033_v52, %v942_v1 }
  0xfa   : > { %v519_v4 = vmul.f32 %v3273_v54, %v3481_v5  ;;  %v660_v1 = vmul.f32 %v3284_v59, %v3491_v24  ;;  %v661_v52 = vmul.f32 %v3286_v60, %v3491_v24 }
  0xfb   : > { %1379 = vperm.xlu1 %2963, %v2738_v33   ;;  %v1163_v31 = vmul.f32 0.2, %v1099_v13  ;;  %v1164_v40 = vmul.f32 0.2, %v1100_v63  ;;  %v1165_v32 = vmul.f32 0.2, %v1101_v2 }
  0xfc   : > { %v1166_v11 = vmul.f32 0.2, %v1102_v9  ;;  %v2733_v33 = vld [vmem:[%s3191_s19 + $0xc0] sm:$0xff]  ;;  %v725_v41 = vadd.f32 %v661_v52, %v521_v0  ;;  %v870_v0 = vmul.f32 %v3316_v26, %v3529_v19 }
  0xfd   : > { %v1227_v23 = vmax.f32 %v1099_v13, %v1163_v31  ;;  %v1228_v14 = vmax.f32 %v1100_v63, %v1164_v40  ;;  %v1229_v25 = vmax.f32 %v1101_v2, %v1165_v32  ;;  %v662_v13 = vmul.f32 %v3288_v61, %v3491_v24  ;;  %v2732_v31 = vld [vmem:[%s3191_s19 + $0xb8] sm:$0xff] }
  0xfe   : > { %1359 = vperm.xlu2 %2964, %v2734_v29   ;;  %v1230_v50 = vmax.f32 %v1102_v9, %v1166_v11  ;;  %2330 = vperm.xlu0 %2954, %v2288_v6   ;;  %v723_v63 = vadd.f32 %v659_v12, %v519_v4  ;;  %v863_v2 = vmul.f32 %v3310_v20, %v3250_v34 }
  0xff   : > { %v1283_v3 = vpack.c.bf16 %v1227_v23, %v1223_v15  ;;  %v1284_v28 = vpack.c.bf16 %v1228_v14, %v1224_v30  ;;  %v1285_v51 = vpack.c.bf16 %v1229_v25, %v1225_v10  ;;  %v522_v9 = vmul.f32 %v3282_v58, %v3481_v5 }
 0x100   : > { %v1286_v48 = vpack.c.bf16 %v1230_v50, %v1226_v49  ;;  %v724_v29 = vadd.f32 %v660_v1, %v520_v36  ;;  %v864_v40 = vmul.f32 %v3312_v22, %v3250_v34  ;;  %v865_v24 = vmul.f32 %v3314_v8, %v3250_v34  ;;  %v2294_v50 = vld [vmem:[%s3504_s14 + $0x60] sm:$0xff] }
 0x101   : > { %v3570_v43 = vpop.permute.xlu1 %576  ;;  %1442 = vmatpush.bf16.msra.mxu0 %v1283_v3  ;;  %1491 = vmatpush.bf16.msra.mxu1 %v1284_v28  ;;  %v866_v32 = vmul.f32 %v3316_v26, %v3250_v34  ;;  %v726_v6 = vadd.f32 %v662_v13, %v522_v9  ;;  %v927_v30 = vadd.f32 %v863_v2, %v723_v63  ;;  %v2728_v34 = vld [vmem:[%s3191_s19 + $0x98] sm:$0xff]  ;;  %v2727_v63 = vld [vmem:[%s3191_s19 + $0x90] sm:$0xff] }
 0x102   : > { %1540 = vmatpush.bf16.msra.mxu2 %v1285_v51  ;;  %v3574_v39 = vpop.permute.xlu2 %572  ;;  %1589 = vmatpush.bf16.msra.mxu3 %v1286_v48  ;;  %v3605_v5 = vmul.f32 %v3310_v20, %v3262_v38  ;;  %v3609_v11 = vmul.f32 %v3312_v22, %v3262_v38  ;;  %v523_v23 = vmul.f32 %v3273_v54, %v3401_v46 }
 0x103   : > { %1354 = vperm.xlu1 %2963, %v2733_v33   ;;  %v524_v14 = vmul.f32 %v3275_v55, %v3401_v46  ;;  %v663_v10 = vmul.f32 %v3279_v57, %v3438_v42  ;;  %v664_v25 = vmul.f32 %v3284_v59, %v3438_v42  ;;  %v928_v3 = vadd.f32 %v864_v40, %v724_v29 }
 0x104   : > { %v929_v28 = vadd.f32 %v865_v24, %v725_v41  ;;  %v525_v51 = vmul.f32 %v3277_v56, %v3401_v46  ;;  %v526_v33 = vmul.f32 %v3282_v58, %v3401_v46  ;;  %v665_v48 = vmul.f32 %v3286_v60, %v3438_v42 }
 0x105   : > { %v666_v12 = vmul.f32 %v3288_v61, %v3438_v42  ;;  %v3633_v4 = vmul.f32 %v3314_v8, %v3262_v38  ;;  %v3637_v1 = vmul.f32 %v3316_v26, %v3262_v38  ;;  %v930_v46 = vadd.f32 %v866_v32, %v726_v6 }
 0x106   : > { %1334 = vperm.xlu2 %2964, %v2729_v53   ;;  %2345 = vperm.xlu0 %2954, %v2291_v27   ;;  %v1018_v53 = vpop.permute.xlu0 %1017  ;;  %v867_v27 = vmul.f32 %v3310_v20, %v3529_v19  ;;  %v868_v36 = vmul.f32 %v3312_v22, %v3529_v19  ;;  %v869_v42 = vmul.f32 %v3314_v8, %v3529_v19 }
 0x107   : > { %v3639_v52 = vadd.f32 %v1018_v53, %v927_v30  ;;  %v727_v38 = vadd.f32 %v663_v10, %v523_v23  ;;  %v728_v13 = vadd.f32 %v664_v25, %v524_v14  ;;  %v1088_v2 = vadd.f32 %v1018_v53, %v928_v3  ;;  %v2789_v23 = vld [vmem:[%s3191_s19 + $0x100] sm:$0xff] }
 0x108   : > { %v1089_v9 = vadd.f32 %v1018_v53, %v929_v28  ;;  %v729_v29 = vadd.f32 %v665_v48, %v525_v51  ;;  %v730_v41 = vadd.f32 %v666_v12, %v526_v33  ;;  %v516_v40 = vmul.f32 %v3275_v55, %v431_v35  ;;  %v2297_v28 = vld [vmem:[%s3504_s14 + $0x78] sm:$0xff] }
 0x109   : > { %v517_v24 = vmul.f32 %v3277_v56, %v431_v35  ;;  %v518_v32 = vmul.f32 %v3282_v58, %v431_v35  ;;  %v1151_v19 = vmul.f32 0.2, %v3639_v52  ;;  %v1090_v6 = vadd.f32 %v1018_v53, %v930_v46 }
 0x10a   : > { %v3601_v15 = vpop.permute.xlu1 %780  ;;  %v931_v14 = vadd.f32 %v867_v27, %v727_v38  ;;  %v933_v10 = vadd.f32 %v869_v42, %v729_v29  ;;  %v934_v25 = vadd.f32 %v870_v0, %v730_v41  ;;  %v512_v3 = vmul.f32 %v3275_v55, %v3484_v37 }
 0x10b   : > { %1349 = vperm.xlu1 %2963, %v2732_v31   ;;  %v3620_v49 = vpop.permute.xlu2 %1007  ;;  %v515_v31 = vmul.f32 %v3273_v54, %v431_v35  ;;  %v1152_v51 = vmul.f32 0.2, %v1088_v2  ;;  %v1153_v33 = vmul.f32 0.2, %v1089_v9  ;;  %v3663_v46 = vmul.f32 %v3277_v56, %v3484_v37 }
 0x10c   : > { %v655_v27 = vmul.f32 %v3279_v57, %v3493_v44  ;;  %v1154_v0 = vmul.f32 0.2, %v1090_v6  ;;  %v657_v38 = vmul.f32 %v3286_v60, %v3493_v44  ;;  %v658_v41 = vmul.f32 %v3288_v61, %v3493_v44 }
 0x10d   : > { %v651_v21 = vmul.f32 %v3279_v57, %v3570_v43 }
 0x10e   : > { %1329 = vperm.xlu2 %2964, %v2728_v34   ;;  %2360 = vperm.xlu0 %2954, %v2294_v50   ;;  %v932_v34 = vadd.f32 %v868_v36, %v728_v13  ;;  %v511_v50 = vmul.f32 %v3273_v54, %v3484_v37  ;;  %v656_v36 = vmul.f32 %v3284_v59, %v3493_v44 }
 0x10f   : > { %v719_v45 = vadd.f32 %v655_v27, %v515_v31 }
 0x110   : > { %v715_v27 = vadd.f32 %v651_v21, %v511_v50  ;;  %v647_v21 = vmul.f32 %v3279_v57, %v3574_v39 }
 0x113   : > { %1324 = vperm.xlu1 %2963, %v2727_v63   ;;  %v1023_v30 = vpop.permute.xlu1 %1022  ;;  %v3669_v42 = vpop.permute.xlu2 %410 }
 0x114   : > { %v1091_v35 = vadd.f32 %v1023_v30, %v931_v14  ;;  %v1092_v48 = vadd.f32 %v1023_v30, %v932_v34  ;;  %v1093_v12 = vadd.f32 %v1023_v30, %v933_v10  ;;  %v1094_v53 = vadd.f32 %v1023_v30, %v934_v25  ;;  %4636 = vst [vmem:[#allocation11_spill] sm:$0xff] %v3669_v42  ;;  %v2726_v30 = vld [vmem:[%s3191_s19 + $0x88] sm:$0xff] }
 0x115   : > { %v1215_v14 = vmax.f32 %v3639_v52, %v1151_v19  ;;  %v1216_v34 = vmax.f32 %v1088_v2, %v1152_v51  ;;  %v1217_v42 = vmax.f32 %v1089_v9, %v1153_v33  ;;  %v3681_v2 = vadd.f32 %v656_v36, %v516_v40  ;;  %v421_v9 = vpop.permute.xlu0 %420  ;;  %v2792_v40 = vld [vmem:[%s3191_s19 + $0x118] sm:$0xff] }
 0x116   : > { %1832 = vperm.xlu2 %2964, %v2789_v23   ;;  %2375 = vperm.xlu0 %2954, %v2297_v28   ;;  %v1155_v13 = vmul.f32 0.2, %v1091_v35  ;;  %v1156_v63 = vmul.f32 0.2, %v1092_v48  ;;  %v1157_v29 = vmul.f32 0.2, %v1093_v12  ;;  %v1218_v28 = vmax.f32 %v1090_v6, %v1154_v0 }
 0x117   : > { %v1158_v10 = vmul.f32 0.2, %v1094_v53  ;;  %v3683_v19 = vadd.f32 %v657_v38, %v517_v24  ;;  %v652_v51 = vmul.f32 %v3284_v59, %v3570_v43  ;;  %v3687_v6 = vadd.f32 %v658_v41, %v518_v32 }
 0x118   : > { %v1219_v25 = vmax.f32 %v1091_v35, %v1155_v13  ;;  %v1220_v18 = vmax.f32 %v1092_v48, %v1156_v63  ;;  %v1221_v23 = vmax.f32 %v1093_v12, %v1157_v29  ;;  %v507_v33 = vmul.f32 %v3273_v54, %v421_v9  ;;  %v2791_v13 = vld [vmem:[%s3191_s19 + $0x110] sm:$0xff] }
 0x119   : > { %v1222_v62 = vmax.f32 %v1094_v53, %v1158_v10  ;;  %v508_v35 = vmul.f32 %v3275_v55, %v421_v9  ;;  %v859_v24 = vmul.f32 %v3310_v20, %v3538_v16  ;;  %v653_v48 = vmul.f32 %v3286_v60, %v3570_v43 }
 0x11a   : > { %v1279_v44 = vpack.c.bf16 %v1219_v25, %v1215_v14  ;;  %v1280_v47 = vpack.c.bf16 %v1220_v18, %v1216_v34  ;;  %v1281_v52 = vpack.c.bf16 %v1221_v23, %v1217_v42  ;;  %v855_v18 = vmul.f32 %v3310_v20, %v3601_v15 }
 0x11b   : > { %1319 = vperm.xlu1 %2963, %v2726_v30   ;;  %v1282_v31 = vpack.c.bf16 %v1222_v62, %v1218_v28  ;;  %v856_v62 = vmul.f32 %v3312_v22, %v3601_v15  ;;  %v509_v32 = vmul.f32 %v3277_v56, %v421_v9  ;;  %v510_v12 = vmul.f32 %v3282_v58, %v421_v9 }
 0x11c   : > { %v569_v37 = vpop.permute.xlu1 %568  ;;  %1443 = vmatpush.bf16.msra.mxu0 %v1279_v44  ;;  %1492 = vmatpush.bf16.msra.mxu1 %v1280_v47  ;;  %v654_v53 = vmul.f32 %v3288_v61, %v3570_v43  ;;  %v860_v36 = vmul.f32 %v3312_v22, %v3538_v16  ;;  %v861_v42 = vmul.f32 %v3314_v8, %v3538_v16  ;;  %v3710_v38 = vpop.permute.xlu2 %764 }
 0x11d   : > { %1541 = vmatpush.bf16.msra.mxu2 %v1281_v52  ;;  %1590 = vmatpush.bf16.msra.mxu3 %v1282_v31  ;;  %v716_v0 = vadd.f32 %v652_v51, %v512_v3  ;;  %v857_v47 = vmul.f32 %v3314_v8, %v3601_v15  ;;  %v862_v63 = vmul.f32 %v3316_v26, %v3538_v16  ;;  %v2795_v52 = vld [vmem:[%s3191_s19 + $0x130] sm:$0xff] }
 0x11e   : > { %1847 = vperm.xlu2 %2964, %v2792_v40   ;;  %v858_v43 = vmul.f32 %v3316_v26, %v3601_v15  ;;  %v919_v50 = vadd.f32 %v855_v18, %v715_v27  ;;  %v503_v3 = vmul.f32 %v3273_v54, %v3565_v7  ;;  %v717_v29 = vadd.f32 %v653_v48, %v3663_v46 }
 0x11f   : > { %v3722_v41 = vadd.f32 %v859_v24, %v719_v45  ;;  %v920_v30 = vadd.f32 %v856_v62, %v716_v0  ;;  %v504_v14 = vmul.f32 %v3275_v55, %v3565_v7  ;;  %v505_v16 = vmul.f32 %v3277_v56, %v3565_v7  ;;  %v2794_v0 = vld [vmem:[%s3191_s19 + $0x128] sm:$0xff] }
 0x120   : > { %v718_v34 = vadd.f32 %v654_v53, %v514_v17  ;;  %v643_v10 = vmul.f32 %v3279_v57, %v569_v37  ;;  %v648_v15 = vmul.f32 %v3284_v59, %v3574_v39  ;;  %v649_v25 = vmul.f32 %v3286_v60, %v3574_v39 }
 0x121   : > { %v650_v45 = vmul.f32 %v3288_v61, %v3574_v39  ;;  %v921_v46 = vadd.f32 %v857_v47, %v717_v29  ;;  %v711_v23 = vadd.f32 %v647_v21, %v507_v33  ;;  %v644_v28 = vmul.f32 %v3284_v59, %v569_v37 }
 0x122   : > { %v3738_v17 = vadd.f32 %v3620_v49, %v919_v50  ;;  %v922_v9 = vadd.f32 %v858_v43, %v718_v34  ;;  %v645_v51 = vmul.f32 %v3286_v60, %v569_v37  ;;  %v646_v31 = vmul.f32 %v3288_v61, %v569_v37 }
 0x123   : > { %1842 = vperm.xlu1 %2963, %v2791_v13   ;;  %v3744_v40 = vadd.f32 %v3620_v49, %v920_v30  ;;  %v707_v39 = vadd.f32 %v643_v10, %v503_v3  ;;  %v506_v62 = vmul.f32 %v3282_v58, %v3565_v7  ;;  %v712_v53 = vadd.f32 %v648_v15, %v508_v35 }
 0x124   : > { %v713_v27 = vadd.f32 %v649_v25, %v509_v32  ;;  %v3753_v37 = vadd.f32 %v3620_v49, %v921_v46  ;;  %v714_v47 = vadd.f32 %v650_v45, %v510_v12  ;;  %v708_v13 = vadd.f32 %v644_v28, %v504_v14  ;;  %v1003_v12 = vpop.permute.xlu0 %1002  ;;  %v2798_v25 = vld [vmem:[%s3191_s19 + $0x148] sm:$0xff] }
 0x125   : > { %v777_v44 = vpop.permute.xlu1 %776  ;;  %v3756_v21 = vadd.f32 %v3620_v49, %v922_v9  ;;  %v709_v50 = vadd.f32 %v645_v51, %v505_v16  ;;  %v710_v3 = vadd.f32 %v646_v31, %v506_v62  ;;  %v998_v29 = vpop.permute.xlu2 %997  ;;  %v1143_v30 = vmul.f32 0.2, %v3738_v17  ;;  %v2797_v9 = vld [vmem:[%s3191_s19 + $0x140] sm:$0xff] }
 0x126   : > { %v851_v18 = vmul.f32 %v3310_v20, %v777_v44  ;;  %v852_v33 = vmul.f32 %v3312_v22, %v777_v44  ;;  %v853_v24 = vmul.f32 %v3314_v8, %v777_v44  ;;  %v854_v48 = vmul.f32 %v3316_v26, %v777_v44  ;;  %1862 = vperm.xlu2 %2964, %v2795_v52  }
 0x127   : > { %v1144_v7 = vmul.f32 0.2, %v3744_v40  ;;  %v911_v35 = vadd.f32 %v3605_v5, %v707_v39  ;;  %v924_v14 = vadd.f32 %v860_v36, %v3681_v2  ;;  %v925_v49 = vadd.f32 %v861_v42, %v3683_v19 }
 0x128   : > { %v915_v43 = vadd.f32 %v851_v18, %v711_v23  ;;  %v916_v32 = vadd.f32 %v852_v33, %v712_v53  ;;  %v917_v34 = vadd.f32 %v853_v24, %v713_v27  ;;  %v918_v10 = vadd.f32 %v854_v48, %v714_v47 }
 0x129   : > { %v1145_v15 = vmul.f32 0.2, %v3753_v37  ;;  %v926_v16 = vadd.f32 %v862_v63, %v3687_v6  ;;  %v1146_v45 = vmul.f32 0.2, %v3756_v21  ;;  %v1071_v46 = vadd.f32 %v998_v29, %v911_v35 }
 0x12a   : > { %v1075_v23 = vadd.f32 %v1003_v12, %v915_v43  ;;  %v912_v5 = vadd.f32 %v3609_v11, %v708_v13  ;;  %v1207_v44 = vmax.f32 %v3738_v17, %v1143_v30  ;;  %v1208_v52 = vmax.f32 %v3744_v40, %v1144_v7 }
 0x12b   : > { %1857 = vperm.xlu1 %2963, %v2794_v0   ;;  %v913_v2 = vadd.f32 %v3633_v4, %v709_v50  ;;  %v914_v19 = vadd.f32 %v3637_v1, %v710_v3  ;;  %v1076_v42 = vadd.f32 %v1003_v12, %v916_v32  ;;  %v1077_v6 = vadd.f32 %v1003_v12, %v917_v34 }
 0x12c   : > { %v1072_v36 = vadd.f32 %v998_v29, %v912_v5  ;;  %v1078_v63 = vadd.f32 %v1003_v12, %v918_v10  ;;  %v1135_v39 = vmul.f32 0.2, %v1071_v46  ;;  %v1139_v17 = vmul.f32 0.2, %v1075_v23 }
 0x12d   : > { %v1073_v33 = vadd.f32 %v998_v29, %v913_v2  ;;  %v1074_v40 = vadd.f32 %v998_v29, %v914_v19  ;;  %v1209_v1 = vmax.f32 %v3753_v37, %v1145_v15  ;;  %v1210_v53 = vmax.f32 %v3756_v21, %v1146_v45  ;;  %v2800_v21 = vld [vmem:[%s3191_s19 + $0x158] sm:$0xff]  ;;  %v2803_v19 = vld [vmem:[%s3191_s19 + $0x170] sm:$0xff] }
 0x12e   : > { %v1013_v28 = vpop.permute.xlu1 %1012  ;;  %1877 = vperm.xlu2 %2964, %v2798_v25   ;;  %v1140_v27 = vmul.f32 0.2, %v1076_v42  ;;  %v1141_v0 = vmul.f32 0.2, %v1077_v6  ;;  %v1142_v50 = vmul.f32 0.2, %v1078_v63  ;;  %v1203_v37 = vmax.f32 %v1075_v23, %v1139_v17  ;;  %v557_v2 = vpop.permute.xlu2 %556 }
 0x12f   : > { %v1083_v51 = vadd.f32 %v1013_v28, %v3722_v41  ;;  %v1084_v31 = vadd.f32 %v1013_v28, %v924_v14  ;;  %v1085_v11 = vadd.f32 %v1013_v28, %v925_v49  ;;  %v1086_v18 = vadd.f32 %v1013_v28, %v926_v16  ;;  %v2801_v41 = vld [vmem:[%s3191_s19 + $0x160] sm:$0xff] }
 0x130   : > { %v1136_v30 = vmul.f32 0.2, %v1072_v36  ;;  %v1137_v29 = vmul.f32 0.2, %v1073_v33  ;;  %v1138_v7 = vmul.f32 0.2, %v1074_v40  ;;  %v1204_v12 = vmax.f32 %v1076_v42, %v1140_v27 }
 0x131   : > { %v1147_v24 = vmul.f32 0.2, %v1083_v51  ;;  %v1148_v4 = vmul.f32 0.2, %v1084_v31  ;;  %v1149_v48 = vmul.f32 0.2, %v1085_v11  ;;  %v1205_v14 = vmax.f32 %v1077_v6, %v1141_v0 }
 0x132   : > { %v1150_v62 = vmul.f32 0.2, %v1086_v18  ;;  %v1199_v49 = vmax.f32 %v1071_v46, %v1135_v39  ;;  %v1206_v15 = vmax.f32 %v1078_v63, %v1142_v50  ;;  %v1200_v25 = vmax.f32 %v1072_v36, %v1136_v30  ;;  %v2804_v46 = vld [vmem:[%s3191_s19 + $0x178] sm:$0xff]  ;;  %v4638_v39 = vld [vmem:[#allocation5_spill] sm:$0xff]  ;;  %v4642_v30 = vld [vmem:[#allocation8_spill] sm:$0xff]  ;;  %s373_s19 = scalar_lea.vmem %s4584_s5, %s3151_s11  ;;  %s338_s11 = sand.u32 1, %s3035_s22  }
 0x133   : > { %1872 = vperm.xlu1 %2963, %v2797_v9   ;;  %v1211_v47 = vmax.f32 %v1083_v51, %v1147_v24  ;;  %v1212_v13 = vmax.f32 %v1084_v31, %v1148_v4  ;;  %v1213_v43 = vmax.f32 %v1085_v11, %v1149_v48  ;;  %v1201_v45 = vmax.f32 %v1073_v33, %v1137_v29  ;;  %v2284_v51 = vld [vmem:[%s3504_s14 + $0x10] sm:$0xff]  ;;  %v4637_v31 = vld [vmem:[#allocation9_spill] sm:$0xff]  ;;  %v988_v48 = vpop.permute.xlu0 %987  ;;  %v4641_v50 = vld [vmem:[#allocation7_spill] sm:$0xff]  ;;  %s2715_s20 = sshll.u32 %s338_s11, 2  ;;  %s2561_s24 = scalar_lea.sflag [#allocation3], %s338_s11 }
 0x134   : > { %v1214_v3 = vmax.f32 %v1086_v18, %v1150_v62  ;;  %v1271_v5 = vpack.c.bf16 %v1203_v37, %v1199_v49  ;;  %v1202_v28 = vmax.f32 %v1074_v40, %v1138_v7  ;;  %v1272_v23 = vpack.c.bf16 %v1204_v12, %v1200_v25  ;;  %s340_s13 = scalar_lea.vmem [#allocation2], %s2715_s20 }
 0x135   : > { %v1275_v35 = vpack.c.bf16 %v1211_v47, %v1207_v44  ;;  %v1276_v32 = vpack.c.bf16 %v1212_v13, %v1208_v52  ;;  %v1277_v34 = vpack.c.bf16 %v1213_v43, %v1209_v1  ;;  %v1273_v44 = vpack.c.bf16 %v1205_v14, %v1201_v45  ;;  %v4640_v13 = vld [vmem:[#allocation6_spill] sm:$0xff] }
 0x136   : > { %v1278_v10 = vpack.c.bf16 %v1214_v3, %v1210_v53  ;;  %1892 = vperm.xlu2 %2964, %v2801_v41   ;;  %v1274_v52 = vpack.c.bf16 %v1206_v15, %v1202_v28  ;;  %v839_v36 = vmul.f32 %v3310_v20, %v3710_v38  ;;  %v840_v6 = vmul.f32 %v3312_v22, %v3710_v38  ;;  %v2283_v41 = vld [vmem:[%s3504_s14 + $0x8] sm:$0xff] }
 0x137   : > { %1444 = vmatpush.bf16.msra.mxu0 %v1275_v35  ;;  %1493 = vmatpush.bf16.msra.mxu1 %v1276_v32  ;;  %v841_v63 = vmul.f32 %v3314_v8, %v3710_v38  ;;  %v842_v9 = vmul.f32 %v3316_v26, %v3710_v38  ;;  %v3795_v11 = vmul.f32 %v3273_v54, %v4637_v31  ;;  %v4639_v38 = vld [vmem:[#allocation10_spill] sm:$0xff]  ;;  %v761_v1 = vpop.permute.xlu2 %760 }
 0x138   : > { %1542 = vmatpush.bf16.msra.mxu2 %v1277_v34  ;;  %1591 = vmatpush.bf16.msra.mxu3 %v1278_v10  ;;  %v3799_v18 = vmul.f32 %v3275_v55, %v4637_v31  ;;  %v903_v17 = vadd.f32 %v839_v36, %v4638_v39  ;;  %v3804_v33 = vmul.f32 %v3277_v56, %v4637_v31  ;;  %v4643_v10 = vld [vmem:[#allocation11_spill] sm:$0xff] }
 0x139   : > { %v3778_v16 = vpop.permute.xlu1 %564  ;;  %v3808_v40 = vmul.f32 %v3282_v58, %v4637_v31  ;;  %v491_v24 = vmul.f32 %v3273_v54, %v4639_v38  ;;  %v492_v4 = vmul.f32 %v3275_v55, %v4639_v38  ;;  %v493_v62 = vmul.f32 %v3277_v56, %v4639_v38 }
 0x13a   : > { %v631_v53 = vmul.f32 %v3279_v57, %v557_v2  ;;  %v632_v27 = vmul.f32 %v3284_v59, %v557_v2  ;;  %v633_v0 = vmul.f32 %v3286_v60, %v557_v2  ;;  %v634_v47 = vmul.f32 %v3288_v61, %v557_v2 }
 0x13b   : > { %1887 = vperm.xlu1 %2963, %v2800_v21   ;;  %1445 = vmatpush.bf16.msra.mxu0 %v1271_v5  ;;  %v904_v43 = vadd.f32 %v840_v6, %v4640_v13  ;;  %v905_v3 = vadd.f32 %v841_v63, %v4641_v50  ;;  %v906_v29 = vadd.f32 %v842_v9, %v4642_v30 }
 0x13c   : > { %1494 = vmatpush.bf16.msra.mxu1 %v1272_v23  ;;  %1543 = vmatpush.bf16.msra.mxu2 %v1273_v44  ;;  %v835_v7 = vmul.f32 %v3310_v20, %v761_v1  ;;  %v836_v35 = vmul.f32 %v3312_v22, %v761_v1  ;;  %v837_v32 = vmul.f32 %v3314_v8, %v761_v1  ;;  %v2287_v23 = vld [vmem:[%s3504_s14 + $0x28] sm:$0xff] }
 0x13d   : > { %1592 = vmatpush.bf16.msra.mxu3 %v1274_v52  ;;  %v3827_v34 = vadd.f32 %v988_v48, %v903_v17  ;;  %v494_v37 = vmul.f32 %v3282_v58, %v4639_v38  ;;  %v499_v12 = vmul.f32 %v3273_v54, %v4643_v10  ;;  %v500_v14 = vmul.f32 %v3275_v55, %v4643_v10  ;;  %v2286_v17 = vld [vmem:[%s3504_s14 + $0x20] sm:$0xff]  ;;  %v983_v38 = vpop.permute.xlu0 %982 }
 0x13e   : > { %1907 = vperm.xlu2 %2964, %v2804_v46   ;;  %v838_v21 = vmul.f32 %v3316_v26, %v761_v1  ;;  %v501_v15 = vmul.f32 %v3277_v56, %v4643_v10  ;;  %v695_v25 = vadd.f32 %v631_v53, %v491_v24  ;;  %v696_v45 = vadd.f32 %v632_v27, %v492_v4 }
 0x13f   : > { %v697_v5 = vadd.f32 %v633_v0, %v493_v62  ;;  %v698_v28 = vadd.f32 %v634_v47, %v494_v37  ;;  %v3839_v44 = vadd.f32 %v988_v48, %v904_v43  ;;  %v3841_v52 = vadd.f32 %v988_v48, %v905_v3 }
 0x140   : > { %v3843_v54 = vadd.f32 %v988_v48, %v906_v29  ;;  %v3846_v55 = vmul.f32 0.2, %v3827_v34  ;;  %v899_v2 = vadd.f32 %v835_v7, %v695_v25  ;;  %v900_v46 = vadd.f32 %v836_v35, %v696_v45  ;;  %v2290_v29 = vld [vmem:[%s3504_s14 + $0x40] sm:$0xff] }
 0x141   : > { %v639_v56 = vmul.f32 %v3279_v57, %v3778_v16  ;;  %v640_v36 = vmul.f32 %v3284_v59, %v3778_v16  ;;  %v641_v6 = vmul.f32 %v3286_v60, %v3778_v16  ;;  %v902_v63 = vadd.f32 %v838_v21, %v698_v28  ;;  %v978_v21 = vpop.permute.xlu2 %977 }
 0x142   : > { %v3784_v42 = vpop.permute.xlu1 %768  ;;  %v502_v24 = vmul.f32 %v3282_v58, %v4643_v10  ;;  %v3862_v4 = vmul.f32 0.2, %v3839_v44  ;;  %v3865_v48 = vmul.f32 0.2, %v3841_v52  ;;  %v1060_v1 = vadd.f32 %v983_v38, %v900_v46 }
 0x143   : > { %1902 = vperm.xlu1 %2963, %v2803_v19   ;;  %v901_v19 = vadd.f32 %v837_v32, %v697_v5  ;;  %v703_v53 = vadd.f32 %v639_v56, %v499_v12  ;;  %v704_v27 = vadd.f32 %v640_v36, %v500_v14  ;;  %v705_v0 = vadd.f32 %v641_v6, %v501_v15 }
 0x144   : > { %v3872_v58 = vadd.f32 %v983_v38, %v902_v63  ;;  %v844_v10 = vmul.f32 %v3312_v22, %v3784_v42  ;;  %v845_v12 = vmul.f32 %v3314_v8, %v3784_v42  ;;  %v846_v14 = vmul.f32 %v3316_v26, %v3784_v42 }
 0x145   : > { %v1061_v62 = vadd.f32 %v983_v38, %v901_v19 }
 0x146   : > { %2310 = vperm.xlu2 %2964, %v2284_v51   ;;  %v909_v56 = vadd.f32 %v845_v12, %v705_v0 }
 0x147   : > { %v1125_v35 = vmul.f32 0.2, %v1061_v62 }
 0x14b   : > { %2305 = vperm.xlu1 %2963, %v2283_v41   ;;  %v553_v49 = vpop.permute.xlu1 %552 }
 0x14c   : > { %v627_v9 = vmul.f32 %v3279_v57, %v553_v49  ;;  %v628_v51 = vmul.f32 %v3284_v59, %v553_v49  ;;  %v629_v31 = vmul.f32 %v3286_v60, %v553_v49  ;;  %v630_v39 = vmul.f32 %v3288_v61, %v553_v49  ;;  %v2289_v49 = vld [vmem:[%s3504_s14 + $0x38] sm:$0xff] }
 0x14d   : > { %v3868_v57 = vmul.f32 0.2, %v3843_v54  ;;  %v642_v59 = vmul.f32 %v3288_v61, %v3778_v16  ;;  %v1059_v60 = vadd.f32 %v983_v38, %v899_v2 }
 0x14e   : > { %2325 = vperm.xlu2 %2964, %v2287_v23   ;;  %v691_v41 = vadd.f32 %v627_v9, %v3795_v11  ;;  %v692_v47 = vadd.f32 %v628_v51, %v3799_v18  ;;  %v693_v13 = vadd.f32 %v629_v31, %v3804_v33  ;;  %v694_v43 = vadd.f32 %v630_v39, %v3808_v40  ;;  %v2293_v9 = vld [vmem:[%s3504_s14 + $0x58] sm:$0xff] }
 0x14f   : > { %v843_v11 = vmul.f32 %v3310_v20, %v3784_v42  ;;  %v1123_v7 = vmul.f32 0.2, %v1059_v60  ;;  %v1124_v18 = vmul.f32 0.2, %v1060_v1  ;;  %v706_v28 = vadd.f32 %v642_v59, %v502_v24 }
 0x150   : > { %v908_v42 = vadd.f32 %v844_v10, %v704_v27  ;;  %v2852_v10 = vld [vmem:[%s3909_s17 + $0x38] sm:$0xff] }
 0x151   : > { %v1187_v23 = vmax.f32 %v1059_v60, %v1123_v7  ;;  %v1188_v2 = vmax.f32 %v1060_v1, %v1124_v18  ;;  %v907_v46 = vadd.f32 %v843_v11, %v703_v53  ;;  %v910_v36 = vadd.f32 %v846_v14, %v706_v28  ;;  %v2292_v1 = vld [vmem:[%s3504_s14 + $0x50] sm:$0xff] }
 0x152   : > { %v1194_v11 = vmax.f32 %v3843_v54, %v3868_v57  ;;  %v2526_v54 = vld [vmem:[%s373_s19] sm:$0x1]  ;;  %v2848_v57 = vld [vmem:[%s3909_s17 + $0x18] sm:$0xff]  ;;  %s2993_s19 = scalar_lea.hbm %s4585_s6, 8 }
 0x153   : > { %2320 = vperm.xlu1 %2963, %v2286_v17  }
 0x154   : > { %v757_v50 = vpop.permute.xlu1 %756 }
 0x155   : > { %v831_v61 = vmul.f32 %v3310_v20, %v757_v50  ;;  %v832_v16 = vmul.f32 %v3312_v22, %v757_v50  ;;  %v833_v3 = vmul.f32 %v3314_v8, %v757_v50  ;;  %v834_v30 = vmul.f32 %v3316_v26, %v757_v50 }
 0x156   : > { %2340 = vperm.xlu2 %2964, %v2290_v29   ;;  %v1126_v20 = vmul.f32 0.2, %v3872_v58  ;;  %v1189_v22 = vmax.f32 %v1061_v62, %v1125_v35 }
 0x157   : > { %v895_v33 = vadd.f32 %v831_v61, %v691_v41  ;;  %v896_v32 = vadd.f32 %v832_v16, %v692_v47  ;;  %v897_v40 = vadd.f32 %v833_v3, %v693_v13  ;;  %v898_v37 = vadd.f32 %v834_v30, %v694_v43 }
 0x158   : > { %v1190_v17 = vmax.f32 %v3872_v58, %v1126_v20  ;;  %v1191_v43 = vmax.f32 %v3827_v34, %v3846_v55  ;;  %v1192_v58 = vmax.f32 %v3839_v44, %v3862_v4  ;;  %v1193_v30 = vmax.f32 %v3841_v52, %v3865_v48  ;;  %v2295_v44 = vld [vmem:[%s3504_s14 + $0x68] sm:$0xff]  ;;  %v2845_v52 = vld [vmem:[%s3909_s17] sm:$0xff]  ;;  %v2847_v48 = vld [vmem:[%s3909_s17 + $0x10] sm:$0xff] }
 0x159   : > { %v1055_v15 = vadd.f32 %v978_v21, %v895_v33  ;;  %v1056_v25 = vadd.f32 %v978_v21, %v896_v32  ;;  %v1057_v45 = vadd.f32 %v978_v21, %v897_v40  ;;  %v1058_v5 = vadd.f32 %v978_v21, %v898_v37  ;;  %v2296_v33 = vld [vmem:[%s3504_s14 + $0x70] sm:$0xff]  ;;  %v2846_v4 = vld [vmem:[%s3909_s17 + $0x8] sm:$0xff]  ;;  %v2849_v32 = vld [vmem:[%s3909_s17 + $0x20] sm:$0xff]  ;;  %s2575_s14 = sshll.u32 %s340_s13, 4  ;;  %s2576_s14 = int_to_ptr.vmem [resolvable:$true] %s2575_s14 }
 0x15a   : > { %v2850_v40 = vld [vmem:[%s3909_s17 + $0x28] sm:$0xff]  ;;  %v2851_v37 = vld [vmem:[%s3909_s17 + $0x30] sm:$0xff] }
 0x15b   : > { %2335 = vperm.xlu1 %2963, %v2289_v49   ;;  %v1119_v8 = vmul.f32 0.2, %v1055_v15  ;;  %v1120_v19 = vmul.f32 0.2, %v1056_v25  ;;  %v1121_v26 = vmul.f32 0.2, %v1057_v45 }
 0x15c   : > { %v1122_v6 = vmul.f32 0.2, %v1058_v5 }
 0x15d   : > { %v993_v63 = vpop.permute.xlu1 %992  ;;  %v1183_v51 = vmax.f32 %v1055_v15, %v1119_v8  ;;  %v1184_v31 = vmax.f32 %v1056_v25, %v1120_v19  ;;  %v1185_v39 = vmax.f32 %v1057_v45, %v1121_v26 }
 0x15e   : > { %v1067_v38 = vadd.f32 %v993_v63, %v907_v46  ;;  %v1068_v24 = vadd.f32 %v993_v63, %v908_v42  ;;  %v1069_v59 = vadd.f32 %v993_v63, %v909_v56  ;;  %v1070_v60 = vadd.f32 %v993_v63, %v910_v36  ;;  %2355 = vperm.xlu2 %2964, %v2293_v9  }
 0x15f   : > { %v1263_v62 = vpack.c.bf16 %v1187_v23, %v1183_v51  ;;  %v1264_v53 = vpack.c.bf16 %v1188_v2, %v1184_v31  ;;  %v1265_v41 = vpack.c.bf16 %v1189_v22, %v1185_v39  ;;  %v1186_v47 = vmax.f32 %v1058_v5, %v1122_v6 }
 0x160   : > { %v1131_v27 = vmul.f32 0.2, %v1067_v38  ;;  %v1132_v0 = vmul.f32 0.2, %v1068_v24  ;;  %v1133_v13 = vmul.f32 0.2, %v1069_v59 }
 0x161   : > { %v1134_v50 = vmul.f32 0.2, %v1070_v60  ;;  %v1266_v61 = vpack.c.bf16 %v1190_v17, %v1186_v47 }
 0x162   : > { %v1195_v16 = vmax.f32 %v1067_v38, %v1131_v27  ;;  %v1196_v3 = vmax.f32 %v1068_v24, %v1132_v0  ;;  %v1197_v29 = vmax.f32 %v1069_v59, %v1133_v13 }
 0x163   : > { %2350 = vperm.xlu1 %2963, %v2292_v1   ;;  %v1198_v7 = vmax.f32 %v1070_v60, %v1134_v50  ;;  %v3982_v1 = vpop.permute.xlu0 %1374 }
 0x164   : > { %v1267_v18 = vpack.c.bf16 %v1195_v16, %v1191_v43  ;;  %v1268_v34 = vpack.c.bf16 %v1196_v3, %v1192_v58  ;;  %v1269_v55 = vpack.c.bf16 %v1197_v29, %v1193_v30  ;;  %4644 = vst [vmem:[#allocation9_spill] sm:$0xff] %v3982_v1 }
 0x165   : > { %v1270_v35 = vpack.c.bf16 %v1198_v7, %v1194_v11  ;;  %v3964_v9 = vpop.permute.xlu1 %1384 }
 0x166   : > { %1446 = vmatpush.bf16.msra.mxu0 %v1267_v18  ;;  %1495 = vmatpush.bf16.msra.mxu1 %v1268_v34 }
 0x167   : > { %1544 = vmatpush.bf16.msra.mxu2 %v1269_v55  ;;  %1593 = vmatpush.bf16.msra.mxu3 %v1270_v35 }
 0x168   : > { %2370 = vperm.xlu2 %2964, %v2296_v33  }
 0x16a   : > { %1447 = vmatpush.bf16.msra.mxu0 %v1263_v62  ;;  %1496 = vmatpush.bf16.msra.mxu1 %v1264_v53  ;;  %v3986_v53 = vpop.permute.xlu2 %1389 }
 0x16b   : > { %1545 = vmatpush.bf16.msra.mxu2 %v1265_v41  ;;  %1594 = vmatpush.bf16.msra.mxu3 %v1266_v61  ;;  %4646 = vst [vmem:[#allocation10_spill] sm:$0xff] %v3986_v53  ;;  %v3996_v13 = vpop.permute.xlu0 %1369 }
 0x16c   : > { %2365 = vperm.xlu1 %2963, %v2295_v44  }
 0x16d   : > { %1448 = vmatmul.bf16.vlgmr.msra.gmra.mxu0 %v2845_v52  ;;  %1497 = vmatmul.bf16.vlgmr.msra.gmra.mxu1 %v2845_v52  ;;  %v3984_v62 = vpop.permute.xlu1 %1379 }
 0x16e   : > { %1546 = vmatmul.bf16.vlgmr.msra.gmra.mxu2 %v2845_v52  ;;  %1595 = vmatmul.bf16.vlgmr.msra.gmra.mxu3 %v2845_v52  ;;  %4645 = vst [vmem:[#allocation5_spill] sm:$0xff] %v3984_v62 }
 0x172   : > { %v4000_v58 = vpop.permute.xlu2 %1364 }
 0x173   : > { %v4010_v30 = vpop.permute.xlu0 %1344 }
 0x174   : > { %2529 = vperm.xlu1 %2963, %v2526_v54  }
 0x175   : > { %v3998_v43 = vpop.permute.xlu1 %1354 }
 0x17a   : > { %v4022_v55 = vpop.permute.xlu2 %1359 }
 0x17b   : > { %v1340_v54 = vpop.permute.xlu0 %1339 }
 0x17d   : > { %1453 = vmatmul.bf16.gmra.mxu0 %v2846_v4  ;;  %1502 = vmatmul.bf16.gmra.mxu1 %v2846_v4  ;;  %v4012_v29 = vpop.permute.xlu1 %1349 }
 0x17e   : > { %1551 = vmatmul.bf16.gmra.mxu2 %v2846_v4  ;;  %1600 = vmatmul.bf16.gmra.mxu3 %v2846_v4 }
 0x185   : > { %v1325_v4 = vpop.permute.xlu1 %1324 }
 0x18d   : > { %1458 = vmatmul.bf16.gmra.mxu0 %v2847_v48  ;;  %1507 = vmatmul.bf16.gmra.mxu1 %v2847_v48  ;;  %v1320_v53 = vpop.permute.xlu1 %1319 }
 0x18e   : > { %1556 = vmatmul.bf16.gmra.mxu2 %v2847_v48  ;;  %1605 = vmatmul.bf16.gmra.mxu3 %v2847_v48  ;;  %v1335_v48 = vpop.permute.xlu2 %1334 }
 0x19d   : > { %1463 = vmatmul.bf16.gmra.mxu0 %v2848_v57  ;;  %1512 = vmatmul.bf16.gmra.mxu1 %v2848_v57 }
 0x19e   : > { %1561 = vmatmul.bf16.gmra.mxu2 %v2848_v57  ;;  %1610 = vmatmul.bf16.gmra.mxu3 %v2848_v57 }
 0x1ad   : > { %1468 = vmatmul.bf16.gmra.mxu0 %v2849_v32  ;;  %1517 = vmatmul.bf16.gmra.mxu1 %v2849_v32 }
 0x1ae   : > { %1566 = vmatmul.bf16.gmra.mxu2 %v2849_v32  ;;  %1615 = vmatmul.bf16.gmra.mxu3 %v2849_v32 }
 0x1bd   : > { %1473 = vmatmul.bf16.gmra.mxu0 %v2850_v40  ;;  %1522 = vmatmul.bf16.gmra.mxu1 %v2850_v40 }
 0x1be   : > { %1571 = vmatmul.bf16.gmra.mxu2 %v2850_v40  ;;  %1620 = vmatmul.bf16.gmra.mxu3 %v2850_v40 }
 0x1cd   : > { %1478 = vmatmul.bf16.gmra.mxu0 %v2851_v37  ;;  %1527 = vmatmul.bf16.gmra.mxu1 %v2851_v37 }
 0x1ce   : > { %1576 = vmatmul.bf16.gmra.mxu2 %v2851_v37  ;;  %1625 = vmatmul.bf16.gmra.mxu3 %v2851_v37 }
 0x1dd   : > { %1483 = vmatmul.bf16.gmra.mxu0 %v2852_v10  ;;  %1532 = vmatmul.bf16.gmra.mxu1 %v2852_v10 }
 0x1de   : > { %1581 = vmatmul.bf16.gmra.mxu2 %v2852_v10  ;;  %1630 = vmatmul.bf16.gmra.mxu3 %v2852_v10  ;;  %v1315_v10 = vpop.permute.xlu0 %1314 }
 0x1ea   : > { %v3924_v12 = vpop.f32.mrf.mxu0  ;;  %v3926_v14 = vpop.f32.mrf.mxu1 }
 0x1f1   : > { %v3928_v21 = vpop.f32.mrf.mxu2  ;;  %v3930_v49 = vpop.f32.mrf.mxu3 }
 0x1f2   : > { %v3932_v20 = vpop.f32.mrf.mxu0  ;;  %v3934_v15 = vpop.f32.mrf.mxu1 }
 0x1f9   : > { %v3936_v25 = vpop.f32.mrf.mxu2  ;;  %v3938_v45 = vpop.f32.mrf.mxu3 }
 0x1fa   : > { %v1454_v5 = vpop.f32.mrf.mxu0  ;;  %v1503_v28 = vpop.f32.mrf.mxu1 }
 0x1fb   : > { %v4054_v62 = vadd.f32 %v1503_v28, %v1325_v4  ;;  %v4075_v28 = vadd.f32 %v3928_v21, %v1315_v10 }
 0x1fd   : > { %4660 = vst [vmem:[#allocation21_spill] sm:$0xff] %v4054_v62 }
 0x1fe   : > { %4666 = vst [vmem:[#allocation27_spill] sm:$0xff] %v4075_v28 }
 0x201   : > { %v3940_v23 = vpop.f32.mrf.mxu2  ;;  %v3942_v2 = vpop.f32.mrf.mxu3 }
 0x202   : > { %v3944_v22 = vpop.f32.mrf.mxu0  ;;  %v3946_v46 = vpop.f32.mrf.mxu1 }
 0x209   : > { %v3948_v8 = vpop.f32.mrf.mxu2  ;;  %v3950_v19 = vpop.f32.mrf.mxu3 }
 0x20a   : > { %v3952_v26 = vpop.f32.mrf.mxu0  ;;  %v3954_v42 = vpop.f32.mrf.mxu1 }
 0x20b   : > { %v4096_v21 = vadd.f32 %v3954_v42, %v1335_v48 }
 0x20d   : > { %4673 = vst [vmem:[#allocation34_spill] sm:$0xff] %v4096_v21 }
 0x211   : > { %v3956_v56 = vpop.f32.mrf.mxu2  ;;  %v3958_v36 = vpop.f32.mrf.mxu3 }
 0x212   : > { %v3960_v6 = vpop.f32.mrf.mxu0  ;;  %v3962_v63 = vpop.f32.mrf.mxu1 }
 0x219   : > { %v3966_v51 = vpop.f32.mrf.mxu2  ;;  %v3968_v31 = vpop.f32.mrf.mxu3 }
 0x21a   : > { %v3970_v39 = vpop.f32.mrf.mxu0  ;;  %v3972_v17 = vpop.f32.mrf.mxu1 }
 0x221   : > { %v3974_v38 = vpop.f32.mrf.mxu2  ;;  %v3976_v24 = vpop.f32.mrf.mxu3 }
 0x222   : > { %v3978_v59 = vpop.f32.mrf.mxu0  ;;  %v3980_v60 = vpop.f32.mrf.mxu1 }
 0x229   : > { %v3988_v41 = vpop.f32.mrf.mxu2  ;;  %v3990_v47 = vpop.f32.mrf.mxu3 }
 0x22a   : > { %v3992_v27 = vpop.f32.mrf.mxu0  ;;  %v3994_v0 = vpop.f32.mrf.mxu1 }
 0x231   : > { %v4002_v50 = vpop.f32.mrf.mxu2  ;;  %v4004_v61 = vpop.f32.mrf.mxu3 }
 0x232   : > { %v4006_v16 = vpop.f32.mrf.mxu0  ;;  %v4008_v3 = vpop.f32.mrf.mxu1 }
 0x239   : > { %v4014_v11 = vpop.f32.mrf.mxu2  ;;  %v4016_v7 = vpop.f32.mrf.mxu3 }
 0x23a   : > { %4647 = vst [vmem:[#allocation6_spill] sm:$0xff] %v4014_v11  ;;  %v4018_v18 = vpop.f32.mrf.mxu0  ;;  %v4020_v34 = vpop.f32.mrf.mxu1  ;;  %v4050_v11 = vadd.f32 %v3934_v15, %v1320_v53 }
 0x23b   : > { %4648 = vst [vmem:[#allocation7_spill] sm:$0xff] %v4016_v7  ;;  %v4047_v7 = vadd.f32 %v3932_v20, %v1320_v53 }
 0x23c   : > { %4658 = vst [vmem:[#allocation19_spill] sm:$0xff] %v4050_v11 }
 0x23d   : > { %4657 = vst [vmem:[#allocation18_spill] sm:$0xff] %v4047_v7 }
 0x241   : > { %v4024_v35 = vpop.f32.mrf.mxu2  ;;  %v4026_v33 = vpop.f32.mrf.mxu3 }
 0x242   : > { %4649 = vst [vmem:[#allocation8_spill] sm:$0xff] %v4024_v35  ;;  %v4028_v44 = vpop.f32.mrf.mxu0  ;;  %v4030_v52 = vpop.f32.mrf.mxu1  ;;  %v4041_v35 = vadd.f32 %v3924_v12, %v1315_v10 }
 0x243   : > { %4650 = vst [vmem:[#allocation11_spill] sm:$0xff] %v4026_v33  ;;  %v4044_v33 = vadd.f32 %v3926_v14, %v1315_v10 }
 0x244   : > { %4655 = vst [vmem:[#allocation16_spill] sm:$0xff] %v4041_v35  ;;  %v4061_v12 = vmul.f32 0.2, %v4041_v35  ;;  %v4081_v35 = vmul.f32 0.2, %v4047_v7 }
 0x245   : > { %4656 = vst [vmem:[#allocation17_spill] sm:$0xff] %v4044_v33  ;;  %v4064_v14 = vmul.f32 0.2, %v4044_v33  ;;  %v4084_v33 = vmul.f32 0.2, %v4050_v11  ;;  %v4186_v11 = vadd.f32 %v3974_v38, %v4010_v30  ;;  %v4208_v38 = vadd.f32 %v3988_v41, %v4012_v29 }
 0x246   : > { %4662 = vst [vmem:[#allocation23_spill] sm:$0xff] %v4061_v12  ;;  %v4230_v41 = vadd.f32 %v4018_v18, %v4000_v58  ;;  %v4250_v18 = vadd.f32 %v4030_v52, %v3996_v13 }
 0x247   : > { %4663 = vst [vmem:[#allocation24_spill] sm:$0xff] %v4064_v14  ;;  %v4093_v14 = vadd.f32 %v3952_v26, %v1335_v48 }
 0x248   : > { %4668 = vst [vmem:[#allocation29_spill] sm:$0xff] %v4081_v35 }
 0x249   : > { %v4032_v57 = vpop.f32.mrf.mxu2  ;;  %v4034_v32 = vpop.f32.mrf.mxu3  ;;  %4669 = vst [vmem:[#allocation30_spill] sm:$0xff] %v4084_v33  ;;  %v4204_v33 = vadd.f32 %v4008_v3, %v4022_v55  ;;  %v4226_v3 = vadd.f32 %v4002_v50, %v3998_v43 }
 0x24a   : > { %4651 = vst [vmem:[#allocation12_spill] sm:$0xff] %v4032_v57  ;;  %v4036_v40 = vpop.f32.mrf.mxu0  ;;  %v4038_v37 = vpop.f32.mrf.mxu1 }
 0x24b   : > { %4652 = vst [vmem:[#allocation13_spill] sm:$0xff] %v4034_v32  ;;  %v1330_v57 = vpop.permute.xlu2 %1329  ;;  %v4052_v32 = vadd.f32 %v1454_v5, %v1325_v4 }
 0x24c   : > { %4653 = vst [vmem:[#allocation14_spill] sm:$0xff] %v4036_v40  ;;  %v4067_v20 = vadd.f32 %v3944_v22, %v1330_v57  ;;  %v4070_v15 = vadd.f32 %v3946_v46, %v1330_v57  ;;  %v4087_v22 = vadd.f32 %v3936_v25, %v1320_v53  ;;  %v4090_v46 = vadd.f32 %v3938_v45, %v1320_v53 }
 0x24d   : > { %4654 = vst [vmem:[#allocation15_spill] sm:$0xff] %v4038_v37  ;;  %v4108_v25 = vadd.f32 %v3960_v6, %v1340_v54  ;;  %v4111_v45 = vadd.f32 %v3942_v2, %v1325_v4  ;;  %v4120_v53 = vadd.f32 %v3962_v63, %v1340_v54  ;;  %v4123_v28 = vadd.f32 %v3948_v8, %v1330_v57 }
 0x24e   : > { %4659 = vst [vmem:[#allocation20_spill] sm:$0xff] %v4052_v32  ;;  %v4114_v26 = vmul.f32 0.2, %v4067_v20  ;;  %v4117_v42 = vmul.f32 0.2, %v4070_v15  ;;  %v4130_v6 = vadd.f32 %v3970_v39, %v4010_v30  ;;  %v4134_v2 = vadd.f32 %v3972_v17, %v4010_v30 }
 0x24f   : > { %4664 = vst [vmem:[#allocation25_spill] sm:$0xff] %v4067_v20  ;;  %v4140_v63 = vmul.f32 0.2, %v4096_v21  ;;  %v4144_v8 = vadd.f32 %v3978_v59, %v4012_v29  ;;  %v4151_v39 = vadd.f32 %v3956_v56, %v1335_v48  ;;  %v4154_v17 = vadd.f32 %v3958_v36, %v1335_v48 }
 0x250   : > { %4665 = vst [vmem:[#allocation26_spill] sm:$0xff] %v4070_v15  ;;  %v4166_v12 = vmul.f32 0.2, %v4120_v53  ;;  %v4172_v56 = vadd.f32 %v3968_v31, %v1340_v54  ;;  %v4176_v36 = vadd.f32 %v3994_v0, %v3998_v43  ;;  %v4194_v31 = vadd.f32 %v3976_v24, %v4010_v30 }
 0x251   : > { %v4056_v37 = vpop.f32.mrf.mxu2  ;;  %v4058_v40 = vpop.f32.mrf.mxu3  ;;  %4670 = vst [vmem:[#allocation31_spill] sm:$0xff] %v4087_v22  ;;  %v4197_v0 = vmul.f32 0.2, %v4144_v8  ;;  %v4219_v30 = vadd.f32 %v4028_v44, %v3996_v13 }
 0x252   : > { %4661 = vst [vmem:[#allocation22_spill] sm:$0xff] %v4058_v40  ;;  %v1481_v5 = vpop.f32.mrf.mxu0  ;;  %v4072_v1 = vpop.f32.mrf.mxu1  ;;  %v4078_v40 = vadd.f32 %v3930_v49, %v1315_v10  ;;  %v4099_v49 = vmul.f32 0.2, %v4052_v32  ;;  %v4102_v10 = vmul.f32 0.2, %v4054_v62 }
 0x253   : > { %4671 = vst [vmem:[#allocation32_spill] sm:$0xff] %v4090_v46  ;;  %v4161_v46 = vadd.f32 %v3992_v27, %v3998_v43  ;;  %v4179_v27 = vmul.f32 0.2, %v4130_v6  ;;  %v4222_v7 = vmul.f32 0.2, %v4176_v36 }
 0x254   : > { %4667 = vst [vmem:[#allocation28_spill] sm:$0xff] %v4078_v40  ;;  %v4105_v40 = vadd.f32 %v3940_v23, %v1325_v4  ;;  %v4126_v23 = vadd.f32 %v3950_v19, %v1330_v57  ;;  %v4137_v4 = vmul.f32 0.2, %v4093_v14  ;;  %v4148_v19 = vadd.f32 %v3980_v60, %v4012_v29 }
 0x255   : > { %4672 = vst [vmem:[#allocation33_spill] sm:$0xff] %v4093_v14  ;;  %v4157_v57 = vmul.f32 0.2, %v4108_v25  ;;  %v4169_v60 = vadd.f32 %v3966_v51, %v1340_v54  ;;  %v4190_v51 = vadd.f32 %v4006_v16, %v4022_v55  ;;  %v4212_v16 = vadd.f32 %v3990_v47, %v4012_v29 }
 0x256   : > { %4674 = vst [vmem:[#allocation35_spill] sm:$0xff] %v4099_v49  ;;  %v4200_v54 = vmul.f32 0.2, %v4148_v19  ;;  %v4215_v24 = vmul.f32 0.2, %v4161_v46  ;;  %v4234_v47 = vadd.f32 %v4020_v34, %v4000_v58  ;;  %v4238_v29 = vadd.f32 %v4004_v61, %v3998_v43  ;;  %v4700_v34 = vld [vmem:[#allocation9_spill] sm:$0xff] }
 0x257   : > { %4675 = vst [vmem:[#allocation36_spill] sm:$0xff] %v4102_v10  ;;  %v4241_v44 = vmul.f32 0.2, %v4190_v51  ;;  %v4702_v10 = vld [vmem:[#allocation5_spill] sm:$0xff]  ;;  %v4703_v61 = vld [vmem:[#allocation6_spill] sm:$0xff] }
 0x258   : > { %4676 = vst [vmem:[#allocation37_spill] sm:$0xff] %v4105_v40  ;;  %v4182_v40 = vmul.f32 0.2, %v4134_v2  ;;  %v1482_v43 = vadd.f32 %v1481_v5, %v4702_v10  ;;  %v4257_v32 = vadd.f32 %v4703_v61, %v4022_v55  ;;  %v1531_v52 = vadd.f32 %v4072_v1, %v4702_v10  ;;  %v4705_v61 = vld [vmem:[#allocation8_spill] sm:$0xff]  ;;  %v4707_v1 = vld [vmem:[#allocation10_spill] sm:$0xff] }
 0x259   : > { %4677 = vst [vmem:[#allocation38_spill] sm:$0xff] %v4108_v25  ;;  %v1579_v22 = vpop.f32.mrf.mxu2  ;;  %v4163_v59 = vpop.f32.mrf.mxu3  ;;  %v4272_v5 = vmul.f32 0.2, %v4234_v47  ;;  %v4276_v15 = vadd.f32 %v4705_v61, %v4000_v58 }
 0x25a   : > { %4678 = vst [vmem:[#allocation39_spill] sm:$0xff] %v4111_v45  ;;  %v1484_v48 = vpop.f32.mrf.mxu0  ;;  %v1533_v45 = vpop.f32.mrf.mxu1  ;;  %v1688_v61 = vmul.f32 0.2, %v1482_v43 }
 0x25b   : > { %4679 = vst [vmem:[#allocation40_spill] sm:$0xff] %v4114_v26  ;;  %v1485_v35 = vadd.f32 %v1484_v48, %v3964_v9  ;;  %v1534_v50 = vadd.f32 %v1533_v45, %v3964_v9  ;;  %v4704_v48 = vld [vmem:[#allocation7_spill] sm:$0xff]  ;;  %v4264_v45 = vmul.f32 0.2, %v4219_v30 }
 0x25c   : > { %4680 = vst [vmem:[#allocation41_spill] sm:$0xff] %v4117_v42  ;;  %v4261_v49 = vadd.f32 %v4704_v48, %v4022_v55  ;;  %v4706_v55 = vld [vmem:[#allocation15_spill] sm:$0xff] }
 0x25d   : > { %4681 = vst [vmem:[#allocation42_spill] sm:$0xff] %v4120_v53  ;;  %v1529_v48 = vadd.f32 %v4706_v55, %v4700_v34  ;;  %v1692_v26 = vmul.f32 0.2, %v1485_v35  ;;  %v1689_v55 = vmul.f32 0.2, %v1531_v52 }
 0x25e   : > { %4682 = vst [vmem:[#allocation43_spill] sm:$0xff] %v4123_v28  ;;  %v4701_v28 = vld [vmem:[#allocation14_spill] sm:$0xff] }
 0x25f   : > { %4683 = vst [vmem:[#allocation44_spill] sm:$0xff] %v4126_v23  ;;  %v4246_v23 = vmul.f32 0.2, %v4204_v33  ;;  %v1480_v62 = vadd.f32 %v4701_v28, %v4700_v34  ;;  %v4269_v28 = vmul.f32 0.2, %v4230_v41 }
 0x260   : > { %4684 = vst [vmem:[#allocation45_spill] sm:$0xff] %v4130_v6  ;;  %v1685_v25 = vmul.f32 0.2, %v1529_v48 }
 0x261   : > { %4685 = vst [vmem:[#allocation46_spill] sm:$0xff] %v4134_v2  ;;  %v4709_v2 = vld [vmem:[#allocation12_spill] sm:$0xff] }
 0x262   : > { %4686 = vst [vmem:[#allocation47_spill] sm:$0xff] %v4137_v4  ;;  %v1486_v42 = vpop.f32.mrf.mxu0  ;;  %v1535_v20 = vpop.f32.mrf.mxu1  ;;  %v1681_v4 = vmul.f32 0.2, %v4250_v18 }
 0x263   : > { %4687 = vst [vmem:[#allocation48_spill] sm:$0xff] %v4140_v63  ;;  %v1536_v21 = vadd.f32 %v1535_v20, %v4707_v1  ;;  %v4708_v63 = vld [vmem:[#allocation11_spill] sm:$0xff] }
 0x264   : > { %4688 = vst [vmem:[#allocation49_spill] sm:$0xff] %v4151_v39  ;;  %v1631_v39 = vpop.f32.mrf.mxu3  ;;  %v4284_v14 = vadd.f32 %v4708_v63, %v4000_v58  ;;  %v1756_v58 = vmax.f32 %v1485_v35, %v1692_v26 }
 0x265   : > { %4689 = vst [vmem:[#allocation50_spill] sm:$0xff] %v4154_v17  ;;  %v1582_v17 = vpop.f32.mrf.mxu2 }
 0x266   : > { %4690 = vst [vmem:[#allocation51_spill] sm:$0xff] %v4157_v57  ;;  %v4290_v57 = vadd.f32 %v1579_v22, %v4702_v10  ;;  %v1583_v20 = vadd.f32 %v1582_v17, %v3964_v9  ;;  %v1629_v22 = vadd.f32 %v4163_v59, %v4702_v10  ;;  %v1752_v17 = vmax.f32 %v1482_v43, %v1688_v61 }
 0x267   : > { %4691 = vst [vmem:[#allocation52_spill] sm:$0xff] %v4166_v12  ;;  %v1697_v12 = vmul.f32 0.2, %v1536_v21  ;;  %v1745_v59 = vmax.f32 %v4250_v18, %v1681_v4 }
 0x268   : > { %4692 = vst [vmem:[#allocation53_spill] sm:$0xff] %v4169_v60  ;;  %v1487_v60 = vadd.f32 %v1486_v42, %v4707_v1  ;;  %v1632_v42 = vadd.f32 %v1631_v39, %v3964_v9  ;;  %v1690_v10 = vmul.f32 0.2, %v4290_v57 }
 0x269   : > { %4693 = vst [vmem:[#allocation54_spill] sm:$0xff] %v4172_v56  ;;  %v1693_v56 = vmul.f32 0.2, %v1534_v50 }
 0x26a   : > { %4694 = vst [vmem:[#allocation55_spill] sm:$0xff] %v4179_v27  ;;  %v1696_v53 = vmul.f32 0.2, %v1487_v60  ;;  %v1753_v27 = vmax.f32 %v1531_v52, %v1689_v55  ;;  %v1754_v18 = vmax.f32 %v4290_v57, %v1690_v10  ;;  %v1732_v57 = vmax.f32 %v4161_v46, %v4215_v24 }
 0x26b   : > { %4695 = vst [vmem:[#allocation56_spill] sm:$0xff] %v4182_v40  ;;  %v1757_v63 = vmax.f32 %v1534_v50, %v1693_v56  ;;  %v4296_v40 = vadd.f32 %v4709_v2, %v3996_v13  ;;  %v1749_v50 = vmax.f32 %v1529_v48, %v1685_v25  ;;  %v1741_v25 = vmax.f32 %v4234_v47, %v4272_v5 }
 0x26c   : > { %4696 = vst [vmem:[#allocation57_spill] sm:$0xff] %v4186_v11  ;;  %v1744_v11 = vmax.f32 %v4219_v30, %v4264_v45  ;;  %v1578_v30 = vadd.f32 %v4056_v37, %v4700_v34  ;;  %v4710_v45 = vld [vmem:[#allocation22_spill] sm:$0xff]  ;;  %v1633_v35 = vpop.f32.mrf.mxu3  ;;  %v4711_v37 = vld [vmem:[#allocation13_spill] sm:$0xff]  ;;  %v1678_v47 = vmul.f32 0.2, %v4276_v15  ;;  %v1728_v46 = vmax.f32 %v4144_v8, %v4197_v0 }
 0x26d   : > { %4697 = vst [vmem:[#allocation58_spill] sm:$0xff] %v4194_v31  ;;  %v1684_v31 = vmul.f32 0.2, %v1480_v62  ;;  %v1627_v6 = vadd.f32 %v4710_v45, %v4700_v34  ;;  %v1584_v9 = vpop.f32.mrf.mxu2  ;;  %v1634_v39 = vadd.f32 %v1633_v35, %v4707_v1  ;;  %v1806_v55 = vpack.c.bf16 %v1753_v27, %v1749_v50 }
 0x26e   : > { %4698 = vst [vmem:[#allocation59_spill] sm:$0xff] %v4208_v38  ;;  %v1761_v38 = vmax.f32 %v1536_v21, %v1697_v12  ;;  %v1694_v12 = vmul.f32 0.2, %v1583_v20  ;;  %v1695_v21 = vmul.f32 0.2, %v1632_v42  ;;  %v1585_v2 = vadd.f32 %v1584_v9, %v4707_v1 }
 0x26f   : > { %4699 = vst [vmem:[#allocation60_spill] sm:$0xff] %v4212_v16  ;;  %v1760_v16 = vmax.f32 %v1487_v60, %v1696_v53  ;;  %v4308_v60 = vadd.f32 %v4711_v37, %v3996_v13  ;;  %v1748_v56 = vmax.f32 %v1480_v62, %v1684_v31  ;;  %v1699_v34 = vmul.f32 0.2, %v1634_v39 }
 0x270   : > { %v1810_v53 = vpack.c.bf16 %v1761_v38, %v1757_v63  ;;  %v1698_v38 = vmul.f32 0.2, %v1585_v2  ;;  %v1686_v43 = vmul.f32 0.2, %v1578_v30  ;;  %v1687_v52 = vmul.f32 0.2, %v1627_v6 }
 0x271   : > { %v1809_v26 = vpack.c.bf16 %v1760_v16, %v1756_v58  ;;  %v1691_v16 = vmul.f32 0.2, %v1629_v22  ;;  %v1805_v61 = vpack.c.bf16 %v1752_v17, %v1748_v56  ;;  %v1758_v1 = vmax.f32 %v1583_v20, %v1694_v12  ;;  %v4713_v12 = vld [vmem:[#allocation45_spill] sm:$0xff] }
 0x272   : > { %2007 = vmatpush.bf16.msrb.mxu1 %v1810_v53  ;;  %v1759_v58 = vmax.f32 %v1632_v42, %v1695_v21  ;;  %v1762_v63 = vmax.f32 %v1585_v2, %v1698_v38  ;;  %v1763_v13 = vmax.f32 %v1634_v39, %v1699_v34  ;;  %v1740_v62 = vmax.f32 %v4230_v41, %v4269_v28  ;;  %v4712_v53 = vld [vmem:[#allocation55_spill] sm:$0xff]  ;;  %v4714_v2 = vld [vmem:[#allocation56_spill] sm:$0xff]  ;;  %v4715_v39 = vld [vmem:[#allocation46_spill] sm:$0xff] }
 0x273   : > { %1958 = vmatpush.bf16.msrb.mxu0 %v1809_v26  ;;  %v1682_v31 = vmul.f32 0.2, %v4296_v40  ;;  %v1683_v4 = vmul.f32 0.2, %v4308_v60  ;;  %v1755_v48 = vmax.f32 %v1629_v22, %v1691_v16  ;;  %v1736_v42 = vmax.f32 %v4190_v51, %v4241_v44  ;;  %v4719_v16 = vld [vmem:[#allocation38_spill] sm:$0xff]  ;;  %v4720_v34 = vld [vmem:[#allocation52_spill] sm:$0xff] }
 0x274   : > { %v1811_v27 = vpack.c.bf16 %v1762_v63, %v1758_v1  ;;  %v1812_v20 = vpack.c.bf16 %v1763_v13, %v1759_v58  ;;  %v1737_v41 = vmax.f32 %v4204_v33, %v4246_v23  ;;  %v1801_v28 = vpack.c.bf16 %v1744_v11, %v1740_v62  ;;  %v4723_v1 = vld [vmem:[#allocation58_spill] sm:$0xff]  ;;  %v4725_v13 = vld [vmem:[#allocation33_spill] sm:$0xff] }
 0x275   : > { %v1802_v45 = vpack.c.bf16 %v1745_v59, %v1741_v25  ;;  %v1679_v5 = vmul.f32 0.2, %v4284_v14  ;;  %v1750_v17 = vmax.f32 %v1578_v30, %v1686_v43  ;;  %v1751_v9 = vmax.f32 %v1627_v6, %v1687_v52  ;;  %v4716_v8 = vld [vmem:[#allocation59_spill] sm:$0xff]  ;;  %v4721_v43 = vld [vmem:[#allocation42_spill] sm:$0xff]  ;;  %v4726_v25 = vld [vmem:[#allocation48_spill] sm:$0xff] }
 0x276   : > { %2008 = vmatpush.bf16.msrb.mxu1 %v1806_v55  ;;  %2056 = vmatpush.bf16.msrb.mxu2 %v1811_v27  ;;  %v1733_v22 = vmax.f32 %v4176_v36, %v4222_v7  ;;  %v1674_v51 = vmul.f32 0.2, %v4257_v32  ;;  %v1675_v33 = vmul.f32 0.2, %v4261_v49  ;;  %v1746_v11 = vmax.f32 %v4296_v40, %v1682_v31  ;;  %v4718_v59 = vld [vmem:[#allocation51_spill] sm:$0xff]  ;;  %v4727_v31 = vld [vmem:[#allocation34_spill] sm:$0xff] }
 0x277   : > { %1959 = vmatpush.bf16.msrb.mxu0 %v1805_v61  ;;  %2105 = vmatpush.bf16.msrb.mxu3 %v1812_v20  ;;  %v1747_v23 = vmax.f32 %v4308_v60, %v1683_v4  ;;  %v1807_v44 = vpack.c.bf16 %v1754_v18, %v1750_v17  ;;  %v1808_v6 = vpack.c.bf16 %v1755_v48, %v1751_v9  ;;  %v1670_v36 = vmul.f32 0.2, %v4226_v3  ;;  %v4717_v60 = vld [vmem:[#allocation60_spill] sm:$0xff]  ;;  %v4722_v61 = vld [vmem:[#allocation57_spill] sm:$0xff]  ;;  %v4729_v27 = vld [vmem:[#allocation54_spill] sm:$0xff] }
 0x278   : > { %v1797_v30 = vpack.c.bf16 %v1736_v42, %v1732_v57  ;;  %v1798_v35 = vpack.c.bf16 %v1737_v41, %v1733_v22  ;;  %v1729_v7 = vmax.f32 %v4148_v19, %v4200_v54  ;;  %v1671_v24 = vmul.f32 0.2, %v4238_v29  ;;  %v4728_v18 = vld [vmem:[#allocation53_spill] sm:$0xff]  ;;  %v4733_v57 = vld [vmem:[#allocation26_spill] sm:$0xff] }
 0x279   : > { %v1742_v26 = vmax.f32 %v4276_v15, %v1678_v47  ;;  %v1743_v40 = vmax.f32 %v4284_v14, %v1679_v5  ;;  %v1724_v21 = vmax.f32 %v4713_v12, %v4712_v53  ;;  %v1725_v37 = vmax.f32 %v4715_v39, %v4714_v2  ;;  %v4730_v47 = vld [vmem:[#allocation40_spill] sm:$0xff]  ;;  %v4731_v5 = vld [vmem:[#allocation25_spill] sm:$0xff] }
 0x27a   : > { %2009 = vmatpush.bf16.msrb.mxu1 %v1802_v45  ;;  %2057 = vmatpush.bf16.msrb.mxu2 %v1807_v44  ;;  %v1666_v0 = vmul.f32 0.2, %v4716_v8  ;;  %v1667_v19 = vmul.f32 0.2, %v4717_v60  ;;  %v1738_v54 = vmax.f32 %v4257_v32, %v1674_v51  ;;  %v1739_v15 = vmax.f32 %v4261_v49, %v1675_v33  ;;  %v4724_v49 = vld [vmem:[#allocation47_spill] sm:$0xff]  ;;  %v4732_v9 = vld [vmem:[#allocation41_spill] sm:$0xff] }
 0x27b   : > { %1960 = vmatpush.bf16.msrb.mxu0 %v1801_v28  ;;  %2106 = vmatpush.bf16.msrb.mxu3 %v1808_v6  ;;  %v1803_v56 = vpack.c.bf16 %v1746_v11, %v1742_v26  ;;  %v1804_v14 = vpack.c.bf16 %v1747_v23, %v1743_v40  ;;  %v1793_v50 = vpack.c.bf16 %v1728_v46, %v1724_v21  ;;  %v1662_v55 = vmul.f32 0.2, %v4722_v61  ;;  %v4734_v51 = vld [vmem:[#allocation49_spill] sm:$0xff]  ;;  %v4735_v11 = vld [vmem:[#allocation50_spill] sm:$0xff]  ;;  %v4740_v26 = vld [vmem:[#allocation43_spill] sm:$0xff] }
 0x27c   : > { %v1794_v10 = vpack.c.bf16 %v1729_v7, %v1725_v37  ;;  %v1720_v38 = vmax.f32 %v4719_v16, %v4718_v59  ;;  %v1721_v52 = vmax.f32 %v4721_v43, %v4720_v34  ;;  %v1663_v58 = vmul.f32 0.2, %v4723_v1  ;;  %v4738_v7 = vld [vmem:[#allocation36_spill] sm:$0xff]  ;;  %v4747_v59 = vld [vmem:[#allocation39_spill] sm:$0xff] }
 0x27d   : > { %v1734_v63 = vmax.f32 %v4226_v3, %v1670_v36  ;;  %v1735_v32 = vmax.f32 %v4238_v29, %v1671_v24  ;;  %v1716_v62 = vmax.f32 %v4725_v13, %v4724_v49  ;;  %v1717_v4 = vmax.f32 %v4727_v31, %v4726_v25  ;;  %v4739_v36 = vld [vmem:[#allocation21_spill] sm:$0xff]  ;;  %v4741_v53 = vld [vmem:[#allocation44_spill] sm:$0xff]  ;;  %v4748_v43 = vld [vmem:[#allocation23_spill] sm:$0xff] }
 0x27e   : > { %2010 = vmatpush.bf16.msrb.mxu1 %v1798_v35  ;;  %2058 = vmatpush.bf16.msrb.mxu2 %v1803_v56  ;;  %v1658_v48 = vmul.f32 0.2, %v4728_v18  ;;  %v1659_v20 = vmul.f32 0.2, %v4729_v27  ;;  %v1730_v3 = vmax.f32 %v4716_v8, %v1666_v0  ;;  %v1731_v29 = vmax.f32 %v4717_v60, %v1667_v19  ;;  %v4737_v35 = vld [vmem:[#allocation20_spill] sm:$0xff]  ;;  %v4742_v60 = vld [vmem:[#allocation29_spill] sm:$0xff] }
 0x27f   : > { %1961 = vmatpush.bf16.msrb.mxu0 %v1797_v30  ;;  %2107 = vmatpush.bf16.msrb.mxu3 %v1804_v14  ;;  %v1799_v42 = vpack.c.bf16 %v1738_v54, %v1734_v63  ;;  %v1800_v41 = vpack.c.bf16 %v1739_v15, %v1735_v32  ;;  %v1789_v28 = vpack.c.bf16 %v1720_v38, %v1716_v62  ;;  %v1654_v33 = vmul.f32 0.2, %v4734_v51  ;;  %v4736_v30 = vld [vmem:[#allocation35_spill] sm:$0xff]  ;;  %v4743_v19 = vld [vmem:[#allocation18_spill] sm:$0xff]  ;;  %v4753_v49 = vld [vmem:[#allocation32_spill] sm:$0xff] }
 0x280   : > { %v1790_v45 = vpack.c.bf16 %v1721_v52, %v1717_v4  ;;  %v1712_v17 = vmax.f32 %v4731_v5, %v4730_v47  ;;  %v1713_v22 = vmax.f32 %v4733_v57, %v4732_v9  ;;  %v1655_v23 = vmul.f32 0.2, %v4735_v11  ;;  %v4744_v15 = vld [vmem:[#allocation30_spill] sm:$0xff]  ;;  %v4745_v56 = vld [vmem:[#allocation19_spill] sm:$0xff]  ;;  %v4749_v52 = vld [vmem:[#allocation16_spill] sm:$0xff] }
 0x281   : > { %v1726_v44 = vmax.f32 %v4722_v61, %v1662_v55  ;;  %v1727_v6 = vmax.f32 %v4723_v1, %v1663_v58  ;;  %v1708_v46 = vmax.f32 %v4737_v35, %v4736_v30  ;;  %v1709_v24 = vmax.f32 %v4739_v36, %v4738_v7  ;;  %v4750_v55 = vld [vmem:[#allocation24_spill] sm:$0xff]  ;;  %v4751_v1 = vld [vmem:[#allocation17_spill] sm:$0xff]  ;;  %v4752_v63 = vld [vmem:[#allocation31_spill] sm:$0xff]  ;;  %v1833_v30 = vpop.permute.xlu2 %1832  ;;  %v4411_v35 = vpop.permute.xlu0 %1837 }
 0x282   : > { %2011 = vmatpush.bf16.msrb.mxu1 %v1794_v10  ;;  %2059 = vmatpush.bf16.msrb.mxu2 %v1799_v42  ;;  %v1650_v40 = vmul.f32 0.2, %v4740_v26  ;;  %v1651_v12 = vmul.f32 0.2, %v4741_v53  ;;  %v1722_v39 = vmax.f32 %v4728_v18, %v1658_v48  ;;  %v1723_v37 = vmax.f32 %v4729_v27, %v1659_v20  ;;  %v4754_v27 = vld [vmem:[#allocation27_spill] sm:$0xff]  ;;  %v4755_v42 = vld [vmem:[#allocation28_spill] sm:$0xff] }
 0x283   : > { %1962 = vmatpush.bf16.msrb.mxu0 %v1793_v50  ;;  %2108 = vmatpush.bf16.msrb.mxu3 %v1800_v41  ;;  %v1795_v21 = vpack.c.bf16 %v1730_v3, %v1726_v44  ;;  %v1796_v2 = vpack.c.bf16 %v1731_v29, %v1727_v6  ;;  %v1785_v8 = vpack.c.bf16 %v1712_v17, %v1708_v46  ;;  %v4746_v50 = vld [vmem:[#allocation37_spill] sm:$0xff]  ;;  %v1647_v16 = vmul.f32 0.2, %v4747_v59  ;;  %v2857_v44 = vld [vmem:[%s3909_s17 + $0x60] sm:$0xff]  ;;  %v4413_v46 = vpop.permute.xlu1 %1842  ;;  %v2859_v7 = vld [vmem:[%s3909_s17 + $0x70] sm:$0xff] }
 0x284   : > { %v1786_v0 = vpack.c.bf16 %v1713_v22, %v1709_v24  ;;  %v1704_v54 = vmax.f32 %v4743_v19, %v4742_v60  ;;  %v1705_v14 = vmax.f32 %v4745_v56, %v4744_v15  ;;  %v1646_v10 = vmul.f32 0.2, %v4746_v50  ;;  %v2858_v6 = vld [vmem:[%s3909_s17 + $0x68] sm:$0xff] }
 0x285   : > { %v1718_v38 = vmax.f32 %v4734_v51, %v1654_v33  ;;  %v1719_v34 = vmax.f32 %v4735_v11, %v1655_v23  ;;  %v1700_v61 = vmax.f32 %v4749_v52, %v4748_v43  ;;  %v1701_v58 = vmax.f32 %v4751_v1, %v4750_v55  ;;  %v2854_v33 = vld [vmem:[%s3909_s17 + $0x48] sm:$0xff]  ;;  %v2855_v11 = vld [vmem:[%s3909_s17 + $0x50] sm:$0xff]  ;;  %v2856_v23 = vld [vmem:[%s3909_s17 + $0x58] sm:$0xff] }
 0x286   : > { %2012 = vmatpush.bf16.msrb.mxu1 %v1790_v45  ;;  %2060 = vmatpush.bf16.msrb.mxu2 %v1795_v21  ;;  %v1642_v32 = vmul.f32 0.2, %v4752_v63  ;;  %v1643_v13 = vmul.f32 0.2, %v4753_v49  ;;  %v1714_v31 = vmax.f32 %v4740_v26, %v1650_v40  ;;  %v1715_v4 = vmax.f32 %v4741_v53, %v1651_v12  ;;  %v2860_v53 = vld [vmem:[%s3909_s17 + $0x78] sm:$0xff] }
 0x287   : > { %1963 = vmatpush.bf16.msrb.mxu0 %v1789_v28  ;;  %2109 = vmatpush.bf16.msrb.mxu3 %v1796_v2  ;;  %v1791_v62 = vpack.c.bf16 %v1722_v39, %v1718_v38  ;;  %v1792_v25 = vpack.c.bf16 %v1723_v37, %v1719_v34  ;;  %v1781_v18 = vpack.c.bf16 %v1704_v54, %v1700_v61  ;;  %v1638_v20 = vmul.f32 0.2, %v4754_v27  ;;  %v2853_v28 = vld [vmem:[%s3909_s17 + $0x40] sm:$0xff]  ;;  %s2989_s17 = scalar_lea.hbm %s2988_s16, 4 }
 0x288   : > { %v1782_v48 = vpack.c.bf16 %v1705_v14, %v1701_v58  ;;  %v1639_v41 = vmul.f32 0.2, %v4755_v42  ;;  %v1710_v3 = vmax.f32 %v4746_v50, %v1646_v10  ;;  %v1711_v29 = vmax.f32 %v4747_v59, %v1647_v16  ;;  %p2990_p12 = scmp.ne.s32.totalorder %s2988_s16, %s2989_s17  ;;  %p2995_p2 = scmp.lt.s32.totalorder %s2993_s19, %s2989_s17 }
 0x289   : > { %v1706_v5 = vmax.f32 %v4752_v63, %v1642_v32  ;;  %v1707_v17 = vmax.f32 %v4753_v49, %v1643_v13  ;;  %v1702_v9 = vmax.f32 %v4754_v27, %v1638_v20  ;;  %v4416_v36 = vpop.permute.xlu2 %1847  ;;  %v4418_v24 = vpop.permute.xlu0 %1852 }
 0x28a   : > { %2013 = vmatpush.bf16.msrb.mxu1 %v1786_v0  ;;  %2061 = vmatpush.bf16.msrb.mxu2 %v1791_v62  ;;  %v1787_v45 = vpack.c.bf16 %v1714_v31, %v1710_v3  ;;  %v1788_v47 = vpack.c.bf16 %v1715_v4, %v1711_v29  ;;  %v1703_v57 = vmax.f32 %v4755_v42, %v1639_v41  ;;  %p2991_p13 = pnand %p2990_p12, %p3131_p4  ;;  %p2996_p3 = por %p2995_p2, %p2994_p1 }
 0x28b   : > { %1964 = vmatpush.bf16.msrb.mxu0 %v1785_v8  ;;  %2110 = vmatpush.bf16.msrb.mxu3 %v1792_v25  ;;  %v1783_v22 = vpack.c.bf16 %v1706_v5, %v1702_v9  ;;  %v4420_v26 = vpop.permute.xlu1 %1857 }
 0x28c   : > { %v1784_v51 = vpack.c.bf16 %v1707_v17, %v1703_v57  ;;  %p2992_p0 = pneg %p2991_p13 }
 0x28e   : > { %2014 = vmatpush.bf16.msrb.mxu1 %v1782_v48  ;;  %2062 = vmatpush.bf16.msrb.mxu2 %v1787_v45  ;;  %p2997_p5 = pnand %p2996_p3, %p2992_p0 }
 0x28f   : > { %1965 = vmatpush.bf16.msrb.mxu0 %v1781_v18  ;;  %2111 = vmatpush.bf16.msrb.mxu3 %v1788_v47 }
 0x291   : > { %2015 = vmatmul.bf16.vlgmr.msrb.gmra.mxu1 %v2853_v28  ;;  %v4422_v40 = vpop.permute.xlu2 %1862  ;;  %v4425_v12 = vpop.permute.xlu0 %1867 }
 0x292   : > { %1966 = vmatmul.bf16.vlgmr.msrb.gmra.mxu0 %v2853_v28  ;;  %2063 = vmatpush.bf16.msrb.mxu2 %v1783_v22 }
 0x293   : > { %2112 = vmatpush.bf16.msrb.mxu3 %v1784_v51  ;;  %v4427_v21 = vpop.permute.xlu1 %1872 }
 0x295   : > { %2064 = vmatmul.bf16.vlgmr.msrb.gmra.mxu2 %v2853_v28 }
 0x296   : > { %2113 = vmatmul.bf16.vlgmr.msrb.gmra.mxu3 %v2853_v28 }
 0x299   : > { %v4429_v2 = vpop.permute.xlu2 %1877  ;;  %v4431_v39 = vpop.permute.xlu0 %1882 }
 0x29b   : > { %v4433_v37 = vpop.permute.xlu1 %1887 }
 0x2a1   : > { %2020 = vmatmul.bf16.gmra.mxu1 %v2854_v33  ;;  %v4435_v60 = vpop.permute.xlu2 %1892  ;;  %v4437_v15 = vpop.permute.xlu0 %1897 }
 0x2a2   : > { %1971 = vmatmul.bf16.gmra.mxu0 %v2854_v33 }
 0x2a3   : > { %v4439_v56 = vpop.permute.xlu1 %1902 }
 0x2a5   : > { %2069 = vmatmul.bf16.gmra.mxu2 %v2854_v33 }
 0x2a6   : > { %2118 = vmatmul.bf16.gmra.mxu3 %v2854_v33 }
 0x2a9   : > { %v4443_v58 = vpop.permute.xlu2 %1907  ;;  %v2301_v49 = vpop.permute.xlu0 %2300 }
 0x2ab   : > { %v2306_v13 = vpop.permute.xlu1 %2305 }
 0x2b1   : > { %2025 = vmatmul.bf16.gmra.mxu1 %v2855_v11 }
 0x2b2   : > { %1976 = vmatmul.bf16.gmra.mxu0 %v2855_v11 }
 0x2b5   : > { %2074 = vmatmul.bf16.gmra.mxu2 %v2855_v11 }
 0x2b6   : > { %2123 = vmatmul.bf16.gmra.mxu3 %v2855_v11 }
 0x2c1   : > { %2030 = vmatmul.bf16.gmra.mxu1 %v2856_v23 }
 0x2c2   : > { %1981 = vmatmul.bf16.gmra.mxu0 %v2856_v23 }
 0x2c5   : > { %2079 = vmatmul.bf16.gmra.mxu2 %v2856_v23 }
 0x2c6   : > { %2128 = vmatmul.bf16.gmra.mxu3 %v2856_v23 }
 0x2d1   : > { %2035 = vmatmul.bf16.gmra.mxu1 %v2857_v44 }
 0x2d2   : > { %1986 = vmatmul.bf16.gmra.mxu0 %v2857_v44 }
 0x2d5   : > { %2084 = vmatmul.bf16.gmra.mxu2 %v2857_v44 }
 0x2d6   : > { %2133 = vmatmul.bf16.gmra.mxu3 %v2857_v44  ;;  %v2311_v44 = vpop.permute.xlu2 %2310 }
 0x2e1   : > { %2040 = vmatmul.bf16.gmra.mxu1 %v2858_v6 }
 0x2e2   : > { %1991 = vmatmul.bf16.gmra.mxu0 %v2858_v6 }
 0x2e5   : > { %2089 = vmatmul.bf16.gmra.mxu2 %v2858_v6 }
 0x2e6   : > { %2138 = vmatmul.bf16.gmra.mxu3 %v2858_v6 }
 0x2f1   : > { %2045 = vmatmul.bf16.gmra.mxu1 %v2859_v7 }
 0x2f2   : > { %1996 = vmatmul.bf16.gmra.mxu0 %v2859_v7 }
 0x2f5   : > { %2094 = vmatmul.bf16.gmra.mxu2 %v2859_v7 }
 0x2f6   : > { %2143 = vmatmul.bf16.gmra.mxu3 %v2859_v7 }
 0x301   : > { %2050 = vmatmul.bf16.gmra.mxu1 %v2860_v53 }
 0x302   : > { %2001 = vmatmul.bf16.gmra.mxu0 %v2860_v53 }
 0x305   : > { %2099 = vmatmul.bf16.gmra.mxu2 %v2860_v53 }
 0x306   : > { %2148 = vmatmul.bf16.gmra.mxu3 %v2860_v53 }
 0x30e   : > { %v2016_v0 = vpop.f32.mrf.mxu1 }
 0x30f   : > { %v1967_v8 = vpop.f32.mrf.mxu0  ;;  %v2017_v54 = vadd.f32 %v2016_v0, %v1833_v30 }
 0x310   : > { %v1968_v19 = vadd.f32 %v1967_v8, %v1833_v30 }
 0x311   : > { %v2155_v50 = vmul.f32 0.2, %v2017_v54 }
 0x312   : > { %v2154_v14 = vmul.f32 0.2, %v1968_v19 }
 0x313   : > { %v2219_v43 = vmax.f32 %v2017_v54, %v2155_v50 }
 0x314   : > { %v2218_v34 = vmax.f32 %v1968_v19, %v2154_v14 }
 0x315   : > { %v2379_v4 = vmul.f32 %v2301_v49, %v2219_v43 }
 0x316   : > { %v2018_v59 = vpop.f32.mrf.mxu1  ;;  %v2378_v31 = vmul.f32 %v2301_v49, %v2218_v34 }
 0x317   : > { %v1969_v10 = vpop.f32.mrf.mxu0  ;;  %v2019_v38 = vadd.f32 %v2018_v59, %v4411_v35 }
 0x318   : > { %v1970_v16 = vadd.f32 %v1969_v10, %v4411_v35  ;;  %v2065_v55 = vpop.f32.mrf.mxu2 }
 0x319   : > { %v2159_v61 = vmul.f32 0.2, %v2019_v38  ;;  %v2114_v1 = vpop.f32.mrf.mxu3  ;;  %v2066_v62 = vadd.f32 %v2065_v55, %v1833_v30 }
 0x31a   : > { %v2158_v52 = vmul.f32 0.2, %v1970_v16  ;;  %v2115_v25 = vadd.f32 %v2114_v1, %v1833_v30 }
 0x31b   : > { %v2223_v32 = vmax.f32 %v2019_v38, %v2159_v61  ;;  %v2156_v3 = vmul.f32 0.2, %v2066_v62 }
 0x31c   : > { %v2222_v63 = vmax.f32 %v1970_v16, %v2158_v52  ;;  %v2157_v29 = vmul.f32 0.2, %v2115_v25 }
 0x31d   : > { %v2383_v48 = vmul.f32 %v2306_v13, %v2223_v32  ;;  %v2220_v51 = vmax.f32 %v2066_v62, %v2156_v3 }
 0x31e   : > { %v2382_v18 = vmul.f32 %v2306_v13, %v2222_v63  ;;  %v2021_v20 = vpop.f32.mrf.mxu1  ;;  %v2221_v33 = vmax.f32 %v2115_v25, %v2157_v29  ;;  %v2316_v25 = vpop.permute.xlu0 %2315 }
 0x31f   : > { %v1972_v27 = vpop.f32.mrf.mxu0  ;;  %v2463_v41 = vadd.f32 %v2383_v48, %v2379_v4  ;;  %v2022_v45 = vadd.f32 %v2021_v20, %v4413_v46  ;;  %v2380_v10 = vmul.f32 %v2301_v49, %v2220_v51 }
 0x320   : > { %v2442_v42 = vadd.f32 %v2382_v18, %v2378_v31  ;;  %v1973_v28 = vadd.f32 %v1972_v27, %v4413_v46  ;;  %v2067_v17 = vpop.f32.mrf.mxu2  ;;  %v2381_v59 = vmul.f32 %v2301_v49, %v2221_v33 }
 0x321   : > { %v2163_v5 = vmul.f32 0.2, %v2022_v45  ;;  %v2116_v9 = vpop.f32.mrf.mxu3  ;;  %v2068_v57 = vadd.f32 %v2067_v17, %v4411_v35 }
 0x322   : > { %v2162_v47 = vmul.f32 0.2, %v1973_v28  ;;  %v2117_v22 = vadd.f32 %v2116_v9, %v4411_v35 }
 0x323   : > { %v2227_v23 = vmax.f32 %v2022_v45, %v2163_v5  ;;  %v2160_v6 = vmul.f32 0.2, %v2068_v57 }
 0x324   : > { %v2226_v11 = vmax.f32 %v1973_v28, %v2162_v47  ;;  %v2161_v30 = vmul.f32 0.2, %v2117_v22 }
 0x325   : > { %v2387_v53 = vmul.f32 %v2311_v44, %v2227_v23  ;;  %v2224_v19 = vmax.f32 %v2068_v57, %v2160_v6  ;;  %v2321_v23 = vpop.permute.xlu1 %2320 }
 0x326   : > { %v2386_v7 = vmul.f32 %v2311_v44, %v2226_v11  ;;  %v2023_v0 = vpop.f32.mrf.mxu1  ;;  %v2225_v54 = vmax.f32 %v2117_v22, %v2161_v30 }
 0x327   : > { %v1974_v8 = vpop.f32.mrf.mxu0  ;;  %v2024_v50 = vadd.f32 %v2023_v0, %v4416_v36  ;;  %v2464_v16 = vadd.f32 %v2463_v41, %v2387_v53  ;;  %v2384_v38 = vmul.f32 %v2306_v13, %v2224_v19 }
 0x328   : > { %v1975_v14 = vadd.f32 %v1974_v8, %v4416_v36  ;;  %v2443_v35 = vadd.f32 %v2442_v42, %v2386_v7  ;;  %v2385_v34 = vmul.f32 %v2306_v13, %v2225_v54  ;;  %v2070_v61 = vpop.f32.mrf.mxu2 }
 0x329   : > { %v2167_v52 = vmul.f32 0.2, %v2024_v50  ;;  %v2119_v55 = vpop.f32.mrf.mxu3  ;;  %v2484_v1 = vadd.f32 %v2384_v38, %v2380_v10  ;;  %v2071_v31 = vadd.f32 %v2070_v61, %v4413_v46 }
 0x32a   : > { %v2166_v43 = vmul.f32 0.2, %v1975_v14  ;;  %v2505_v63 = vadd.f32 %v2385_v34, %v2381_v59  ;;  %v2120_v4 = vadd.f32 %v2119_v55, %v4413_v46 }
 0x32b   : > { %v2231_v62 = vmax.f32 %v2024_v50, %v2167_v52  ;;  %v2164_v49 = vmul.f32 0.2, %v2071_v31 }
 0x32c   : > { %v2230_v32 = vmax.f32 %v1975_v14, %v2166_v43  ;;  %v2165_v27 = vmul.f32 0.2, %v2120_v4 }
 0x32d   : > { %v2391_v48 = vmul.f32 %v2316_v25, %v2231_v62  ;;  %v2228_v28 = vmax.f32 %v2071_v31, %v2164_v49 }
 0x32e   : > { %v2390_v18 = vmul.f32 %v2316_v25, %v2230_v32  ;;  %v2026_v42 = vpop.f32.mrf.mxu1  ;;  %v2229_v45 = vmax.f32 %v2120_v4, %v2165_v27 }
 0x32f   : > { %v1977_v20 = vpop.f32.mrf.mxu0  ;;  %v2465_v41 = vadd.f32 %v2464_v16, %v2391_v48  ;;  %v2027_v29 = vadd.f32 %v2026_v42, %v4418_v24  ;;  %v2388_v17 = vmul.f32 %v2311_v44, %v2228_v28 }
 0x330   : > { %v2444_v13 = vadd.f32 %v2443_v35, %v2390_v18  ;;  %v1978_v3 = vadd.f32 %v1977_v20, %v4418_v24  ;;  %v2389_v9 = vmul.f32 %v2311_v44, %v2229_v45  ;;  %v2072_v57 = vpop.f32.mrf.mxu2 }
 0x331   : > { %v2171_v5 = vmul.f32 0.2, %v2027_v29  ;;  %v2121_v46 = vpop.f32.mrf.mxu3  ;;  %v2073_v33 = vadd.f32 %v2072_v57, %v4416_v36  ;;  %v2485_v6 = vadd.f32 %v2484_v1, %v2388_v17 }
 0x332   : > { %v2170_v47 = vmul.f32 0.2, %v1978_v3  ;;  %v2122_v11 = vadd.f32 %v2121_v46, %v4416_v36  ;;  %v2506_v30 = vadd.f32 %v2505_v63, %v2389_v9 }
 0x333   : > { %v2235_v51 = vmax.f32 %v2027_v29, %v2171_v5  ;;  %v2168_v8 = vmul.f32 0.2, %v2073_v33 }
 0x334   : > { %v2234_v22 = vmax.f32 %v1978_v3, %v2170_v47  ;;  %v2169_v0 = vmul.f32 0.2, %v2122_v11 }
 0x335   : > { %v2395_v53 = vmul.f32 %v2321_v23, %v2235_v51  ;;  %v2232_v50 = vmax.f32 %v2073_v33, %v2168_v8 }
 0x336   : > { %v2394_v7 = vmul.f32 %v2321_v23, %v2234_v22  ;;  %v2028_v54 = vpop.f32.mrf.mxu1  ;;  %v2233_v10 = vmax.f32 %v2122_v11, %v2169_v0 }
 0x337   : > { %v1979_v19 = vpop.f32.mrf.mxu0  ;;  %v4459_v44 = vadd.f32 %v2465_v41, %v2395_v53  ;;  %v2392_v59 = vmul.f32 %v2316_v25, %v2232_v50  ;;  %v2029_v5 = vadd.f32 %v2028_v54, %v4420_v26 }
 0x338   : > { %v4457_v14 = vadd.f32 %v2444_v13, %v2394_v7  ;;  %v2393_v35 = vmul.f32 %v2316_v25, %v2233_v10  ;;  %v2075_v16 = vpop.f32.mrf.mxu2  ;;  %v1980_v47 = vadd.f32 %v1979_v19, %v4420_v26 }
 0x339   : > { %v2124_v38 = vpop.f32.mrf.mxu3  ;;  %v2486_v36 = vadd.f32 %v2485_v6, %v2392_v59  ;;  %v2076_v43 = vadd.f32 %v2075_v16, %v4418_v24  ;;  %v2175_v51 = vmul.f32 0.2, %v2029_v5 }
 0x33a   : > { %v2507_v34 = vadd.f32 %v2506_v30, %v2393_v35  ;;  %v2125_v52 = vadd.f32 %v2124_v38, %v4418_v24  ;;  %v2174_v22 = vmul.f32 0.2, %v1980_v47  ;;  %v2326_v38 = vpop.permute.xlu2 %2325 }
 0x33b   : > { %v2172_v61 = vmul.f32 0.2, %v2076_v43  ;;  %v2239_v19 = vmax.f32 %v2029_v5, %v2175_v51 }
 0x33c   : > { %v2173_v55 = vmul.f32 0.2, %v2125_v52  ;;  %v2238_v0 = vmax.f32 %v1980_v47, %v2174_v22 }
 0x33d   : > { %v2236_v32 = vmax.f32 %v2076_v43, %v2172_v61  ;;  %v2399_v43 = vmul.f32 %v2326_v38, %v2239_v19 }
 0x33e   : > { %v2031_v63 = vpop.f32.mrf.mxu1  ;;  %v2237_v62 = vmax.f32 %v2125_v52, %v2173_v55  ;;  %v2331_v55 = vpop.permute.xlu0 %2330 }
 0x33f   : > { %v1982_v1 = vpop.f32.mrf.mxu0  ;;  %v2396_v31 = vmul.f32 %v2321_v23, %v2236_v32  ;;  %v2032_v9 = vadd.f32 %v2031_v63, %v4422_v40 }
 0x340   : > { %v2397_v4 = vmul.f32 %v2321_v23, %v2237_v62  ;;  %v2077_v18 = vpop.f32.mrf.mxu2  ;;  %v1983_v17 = vadd.f32 %v1982_v1, %v4422_v40 }
 0x341   : > { %v2126_v48 = vpop.f32.mrf.mxu3  ;;  %v4463_v49 = vadd.f32 %v2486_v36, %v2396_v31  ;;  %v2078_v33 = vadd.f32 %v2077_v18, %v4420_v26  ;;  %v2179_v23 = vmul.f32 0.2, %v2032_v9 }
 0x342   : > { %v4465_v25 = vadd.f32 %v2507_v34, %v2397_v4  ;;  %v2178_v11 = vmul.f32 0.2, %v1983_v17  ;;  %v2127_v6 = vadd.f32 %v2126_v48, %v4420_v26  ;;  %v2398_v26 = vmul.f32 %v2326_v38, %v2238_v0 }
 0x343   : > { %v2176_v54 = vmul.f32 0.2, %v2078_v33  ;;  %v2243_v10 = vmax.f32 %v2032_v9, %v2179_v23 }
 0x344   : > { %v2242_v50 = vmax.f32 %v1983_v17, %v2178_v11  ;;  %v2177_v59 = vmul.f32 0.2, %v2127_v6 }
 0x345   : > { %v2240_v1 = vmax.f32 %v2078_v33, %v2176_v54  ;;  %v2403_v31 = vmul.f32 %v2331_v55, %v2243_v10 }
 0x346   : > { %v2033_v20 = vpop.f32.mrf.mxu1  ;;  %v2402_v62 = vmul.f32 %v2331_v55, %v2242_v50  ;;  %v2241_v4 = vmax.f32 %v2127_v6, %v2177_v59 }
 0x347   : > { %v1984_v27 = vpop.f32.mrf.mxu0  ;;  %v2034_v8 = vadd.f32 %v2033_v20, %v4425_v12  ;;  %v2400_v9 = vmul.f32 %v2326_v38, %v2240_v1 }
 0x348   : > { %v2080_v42 = vpop.f32.mrf.mxu2  ;;  %v1985_v53 = vadd.f32 %v1984_v27, %v4425_v12  ;;  %v2401_v23 = vmul.f32 %v2326_v38, %v2241_v4 }
 0x349   : > { %v2129_v13 = vpop.f32.mrf.mxu3  ;;  %v2183_v34 = vmul.f32 0.2, %v2034_v8  ;;  %v2081_v52 = vadd.f32 %v2080_v42, %v4422_v40  ;;  %v2446_v42 = vadd.f32 %v4457_v14, %v2398_v26 }
 0x34a   : > { %v2182_v36 = vmul.f32 0.2, %v1985_v53  ;;  %v2130_v61 = vadd.f32 %v2129_v13, %v4422_v40  ;;  %v2467_v40 = vadd.f32 %v4459_v44, %v2399_v43 }
 0x34b   : > { %v2247_v20 = vmax.f32 %v2034_v8, %v2183_v34  ;;  %v2180_v13 = vmul.f32 0.2, %v2081_v52  ;;  %v2447_v33 = vadd.f32 %v2446_v42, %v2402_v62  ;;  %v2341_v62 = vpop.permute.xlu2 %2340 }
 0x34c   : > { %v2246_v27 = vmax.f32 %v1985_v53, %v2182_v36  ;;  %v2181_v17 = vmul.f32 0.2, %v2130_v61  ;;  %v2468_v11 = vadd.f32 %v2467_v40, %v2403_v31 }
 0x34d   : > { %v2244_v8 = vmax.f32 %v2081_v52, %v2180_v13 }
 0x34e   : > { %v2036_v24 = vpop.f32.mrf.mxu1  ;;  %v2245_v0 = vmax.f32 %v2130_v61, %v2181_v17  ;;  %v2346_v17 = vpop.permute.xlu0 %2345 }
 0x34f   : > { %v1987_v41 = vpop.f32.mrf.mxu0  ;;  %v2037_v32 = vadd.f32 %v2036_v24, %v4427_v21 }
 0x350   : > { %v2082_v3 = vpop.f32.mrf.mxu2  ;;  %v1988_v63 = vadd.f32 %v1987_v41, %v4427_v21  ;;  %v2336_v41 = vpop.permute.xlu1 %2335 }
 0x351   : > { %v2131_v29 = vpop.f32.mrf.mxu3  ;;  %v2083_v47 = vadd.f32 %v2082_v3, %v4425_v12  ;;  %v2187_v22 = vmul.f32 0.2, %v2037_v32  ;;  %v2406_v14 = vmul.f32 %v2336_v41, %v2246_v27 }
 0x352   : > { %v2132_v5 = vadd.f32 %v2131_v29, %v4425_v12  ;;  %v2186_v24 = vmul.f32 0.2, %v1988_v63  ;;  %v2407_v29 = vmul.f32 %v2336_v41, %v2247_v20 }
 0x353   : > { %v2184_v44 = vmul.f32 0.2, %v2083_v47  ;;  %v2251_v10 = vmax.f32 %v2037_v32, %v2187_v22  ;;  %v2448_v52 = vadd.f32 %v2447_v33, %v2406_v14 }
 0x354   : > { %v2185_v53 = vmul.f32 0.2, %v2132_v5  ;;  %v2250_v50 = vmax.f32 %v1988_v63, %v2186_v24  ;;  %v2469_v61 = vadd.f32 %v2468_v11, %v2407_v29 }
 0x355   : > { %v2248_v1 = vmax.f32 %v2083_v47, %v2184_v44  ;;  %v2411_v31 = vmul.f32 %v2341_v62, %v2251_v10 }
 0x356   : > { %v2038_v45 = vpop.f32.mrf.mxu1  ;;  %v2410_v32 = vmul.f32 %v2341_v62, %v2250_v50 }
 0x357   : > { %v1989_v28 = vpop.f32.mrf.mxu0  ;;  %v2039_v6 = vadd.f32 %v2038_v45, %v4429_v2  ;;  %v2509_v45 = vadd.f32 %v4465_v25, %v2401_v23  ;;  %v2470_v33 = vadd.f32 %v2469_v61, %v2411_v31 }
 0x358   : > { %v2085_v57 = vpop.f32.mrf.mxu2  ;;  %v1990_v51 = vadd.f32 %v1989_v28, %v4429_v2  ;;  %v2488_v28 = vadd.f32 %v4463_v49, %v2400_v9 }
 0x359   : > { %v2134_v46 = vpop.f32.mrf.mxu3  ;;  %v2086_v19 = vadd.f32 %v2085_v57, %v4427_v21  ;;  %v2191_v38 = vmul.f32 0.2, %v2039_v6  ;;  %v2249_v57 = vmax.f32 %v2132_v5, %v2185_v53  ;;  %v2408_v5 = vmul.f32 %v2336_v41, %v2248_v1 }
 0x35a   : > { %v2135_v54 = vadd.f32 %v2134_v46, %v4427_v21  ;;  %v2190_v59 = vmul.f32 0.2, %v1990_v51  ;;  %v2404_v21 = vmul.f32 %v2331_v55, %v2244_v8  ;;  %v2405_v46 = vmul.f32 %v2331_v55, %v2245_v0 }
 0x35b   : > { %v2188_v49 = vmul.f32 0.2, %v2086_v19  ;;  %v2409_v40 = vmul.f32 %v2336_v41, %v2249_v57 }
 0x35c   : > { %v2189_v63 = vmul.f32 0.2, %v2135_v54  ;;  %v2254_v4 = vmax.f32 %v1990_v51, %v2190_v59  ;;  %v2489_v9 = vadd.f32 %v2488_v28, %v2404_v21  ;;  %v2510_v24 = vadd.f32 %v2509_v45, %v2405_v46 }
 0x35d   : > { %v2252_v22 = vmax.f32 %v2086_v19, %v2188_v49 }
 0x35e   : > { %v2041_v7 = vpop.f32.mrf.mxu1  ;;  %v2253_v51 = vmax.f32 %v2135_v54, %v2189_v63  ;;  %v2414_v11 = vmul.f32 %v2346_v17, %v2254_v4  ;;  %v2490_v41 = vadd.f32 %v2489_v9, %v2408_v5  ;;  %v2511_v53 = vadd.f32 %v2510_v24, %v2409_v40  ;;  %v2351_v54 = vpop.permute.xlu1 %2350 }
 0x35f   : > { %v1992_v30 = vpop.f32.mrf.mxu0  ;;  %v2042_v34 = vadd.f32 %v2041_v7, %v4431_v39 }
 0x360   : > { %v4475_v35 = vpop.f32.mrf.mxu2  ;;  %v1993_v36 = vadd.f32 %v1992_v30, %v4431_v39  ;;  %v2255_v30 = vmax.f32 %v2039_v6, %v2191_v38  ;;  %v2413_v0 = vmul.f32 %v2341_v62, %v2253_v51 }
 0x361   : > { %v4477_v16 = vpop.f32.mrf.mxu3  ;;  %v2088_v25 = vadd.f32 %v4475_v35, %v4429_v2  ;;  %v2195_v7 = vmul.f32 0.2, %v2042_v34  ;;  %v2449_v35 = vadd.f32 %v2448_v52, %v2410_v32 }
 0x362   : > { %v2194_v27 = vmul.f32 0.2, %v1993_v36  ;;  %v2137_v20 = vadd.f32 %v4477_v16, %v4429_v2  ;;  %v2415_v6 = vmul.f32 %v2346_v17, %v2255_v30  ;;  %v2512_v46 = vadd.f32 %v2511_v53, %v2413_v0 }
 0x363   : > { %v2192_v23 = vmul.f32 0.2, %v2088_v25  ;;  %v2259_v2 = vmax.f32 %v2042_v34, %v2195_v7  ;;  %v2450_v50 = vadd.f32 %v2449_v35, %v2414_v11 }
 0x364   : > { %v2258_v14 = vmax.f32 %v1993_v36, %v2194_v27  ;;  %v2193_v16 = vmul.f32 0.2, %v2137_v20  ;;  %v2471_v38 = vadd.f32 %v2470_v33, %v2415_v6 }
 0x365   : > { %v2256_v10 = vmax.f32 %v2088_v25, %v2192_v23  ;;  %v2419_v34 = vmul.f32 %v2351_v54, %v2259_v2 }
 0x366   : > { %v2043_v48 = vpop.f32.mrf.mxu1  ;;  %v2418_v36 = vmul.f32 %v2351_v54, %v2258_v14  ;;  %v2257_v52 = vmax.f32 %v2137_v20, %v2193_v16  ;;  %v2366_v0 = vpop.permute.xlu1 %2365 }
 0x367   : > { %v1994_v18 = vpop.f32.mrf.mxu0  ;;  %v2044_v13 = vadd.f32 %v2043_v48, %v4433_v37  ;;  %v2412_v48 = vmul.f32 %v2341_v62, %v2252_v22  ;;  %v2416_v32 = vmul.f32 %v2346_v17, %v2256_v10  ;;  %v2472_v25 = vadd.f32 %v2471_v38, %v2419_v34 }
 0x368   : > { %v4489_v3 = vpop.f32.mrf.mxu2  ;;  %v1995_v55 = vadd.f32 %v1994_v18, %v4433_v37  ;;  %v2451_v4 = vadd.f32 %v2450_v50, %v2418_v36  ;;  %v2417_v30 = vmul.f32 %v2346_v17, %v2257_v52 }
 0x369   : > { %v4491_v12 = vpop.f32.mrf.mxu3  ;;  %v2199_v8 = vmul.f32 0.2, %v2044_v13  ;;  %v2091_v59 = vadd.f32 %v4489_v3, %v4431_v39  ;;  %v2491_v21 = vadd.f32 %v2490_v41, %v2412_v48  ;;  %v4513_v3 = vpop.permute.xlu2 %2355 }
 0x36a   : > { %v2198_v18 = vmul.f32 0.2, %v1995_v55  ;;  %v2140_v45 = vadd.f32 %v4491_v12, %v4431_v39  ;;  %v2513_v33 = vadd.f32 %v2512_v46, %v2417_v30 }
 0x36b   : > { %v2263_v62 = vmax.f32 %v2044_v13, %v2199_v8  ;;  %v2196_v39 = vmul.f32 0.2, %v2091_v59  ;;  %v4523_v35 = vadd.f32 %v2491_v21, %v2416_v32 }
 0x36c   : > { %v2262_v57 = vmax.f32 %v1995_v55, %v2198_v18  ;;  %v2197_v12 = vmul.f32 0.2, %v2140_v45 }
 0x36d   : > { %v2423_v40 = vmul.f32 %v4513_v3, %v2263_v62  ;;  %v2260_v17 = vmax.f32 %v2091_v59, %v2196_v39 }
 0x36e   : > { %v2046_v43 = vpop.f32.mrf.mxu1  ;;  %v2422_v5 = vmul.f32 %v4513_v3, %v2262_v57 }
 0x36f   : > { %v1997_v26 = vpop.f32.mrf.mxu0  ;;  %v2047_v19 = vadd.f32 %v2046_v43, %v4435_v60 }
 0x370   : > { %v2092_v42 = vpop.f32.mrf.mxu2  ;;  %v1998_v28 = vadd.f32 %v1997_v26, %v4435_v60  ;;  %v2452_v16 = vadd.f32 %v2451_v4, %v2422_v5 }
 0x371   : > { %v2141_v47 = vpop.f32.mrf.mxu3  ;;  %v2203_v63 = vmul.f32 0.2, %v2047_v19  ;;  %v2093_v31 = vadd.f32 %v2092_v42, %v4433_v37  ;;  %v4521_v42 = vpop.permute.xlu0 %2360 }
 0x372   : > { %v2202_v49 = vmul.f32 0.2, %v1998_v28  ;;  %v2142_v27 = vadd.f32 %v2141_v47, %v4433_v37  ;;  %v2261_v37 = vmax.f32 %v2140_v45, %v2197_v12 }
 0x373   : > { %v2267_v24 = vmax.f32 %v2047_v19, %v2203_v63  ;;  %v2200_v47 = vmul.f32 0.2, %v2093_v31 }
 0x374   : > { %v2266_v9 = vmax.f32 %v1998_v28, %v2202_v49  ;;  %v2201_v11 = vmul.f32 0.2, %v2142_v27  ;;  %v2420_v28 = vmul.f32 %v2351_v54, %v2260_v17  ;;  %v2421_v19 = vmul.f32 %v2351_v54, %v2261_v37 }
 0x375   : > { %v2427_v18 = vmul.f32 %v4521_v42, %v2267_v24  ;;  %v2264_v59 = vmax.f32 %v2093_v31, %v2200_v47 }
 0x376   : > { %v2048_v44 = vpop.f32.mrf.mxu1  ;;  %v2426_v53 = vmul.f32 %v4521_v42, %v2266_v9  ;;  %v2265_v45 = vmax.f32 %v2142_v27, %v2201_v11 }
 0x377   : > { %v1999_v29 = vpop.f32.mrf.mxu0  ;;  %v2049_v43 = vadd.f32 %v2048_v44, %v4437_v15  ;;  %v2424_v39 = vmul.f32 %v4513_v3, %v2264_v59 }
 0x378   : > { %v2095_v61 = vpop.f32.mrf.mxu2  ;;  %v2000_v26 = vadd.f32 %v1999_v29, %v4437_v15  ;;  %v2473_v29 = vadd.f32 %v2472_v25, %v2423_v40 }
 0x379   : > { %v2144_v1 = vpop.f32.mrf.mxu3  ;;  %v2207_v13 = vmul.f32 0.2, %v2049_v43  ;;  %v2096_v8 = vadd.f32 %v2095_v61, %v4435_v60  ;;  %v2376_v5 = vpop.permute.xlu0 %2375 }
 0x37a   : > { %v2206_v55 = vmul.f32 0.2, %v2000_v26  ;;  %v2145_v48 = vadd.f32 %v2144_v1, %v4435_v60  ;;  %v2371_v60 = vpop.permute.xlu2 %2370  ;;  %v2453_v1 = vadd.f32 %v2452_v16, %v2426_v53 }
 0x37b   : > { %v2271_v41 = vmax.f32 %v2049_v43, %v2207_v13  ;;  %v2474_v43 = vadd.f32 %v2473_v29, %v2427_v18  ;;  %v2204_v54 = vmul.f32 0.2, %v2096_v8 }
 0x37c   : > { %v2270_v44 = vmax.f32 %v2000_v26, %v2206_v55  ;;  %v2205_v21 = vmul.f32 0.2, %v2145_v48 }
 0x37d   : > { %v2431_v62 = vmul.f32 %v2366_v0, %v2271_v41  ;;  %v2268_v40 = vmax.f32 %v2096_v8, %v2204_v54 }
 0x37e   : > { %v2051_v20 = vpop.f32.mrf.mxu1  ;;  %v2430_v57 = vmul.f32 %v2366_v0, %v2270_v44  ;;  %v2269_v55 = vmax.f32 %v2145_v48, %v2205_v21 }
 0x37f   : > { %v2002_v7 = vpop.f32.mrf.mxu0  ;;  %v2052_v51 = vadd.f32 %v2051_v20, %v4439_v56  ;;  %v2475_v27 = vadd.f32 %v2474_v43, %v2431_v62  ;;  %v2428_v16 = vmul.f32 %v4521_v42, %v2268_v40 }
 0x380   : > { %v2003_v22 = vadd.f32 %v2002_v7, %v4439_v56  ;;  %v2097_v14 = vpop.f32.mrf.mxu2  ;;  %v2454_v30 = vadd.f32 %v2453_v1, %v2430_v57  ;;  %v2429_v29 = vmul.f32 %v4521_v42, %v2269_v55  ;;  %v2530_v1 = vpop.permute.xlu1 %2529 }
 0x381   : > { %v2211_v6 = vmul.f32 0.2, %v2052_v51  ;;  %v2146_v2 = vpop.f32.mrf.mxu3  ;;  %v2098_v38 = vadd.f32 %v2097_v14, %v4437_v15 }
 0x382   : > { %v2210_v23 = vmul.f32 0.2, %v2003_v22  ;;  %v2147_v36 = vadd.f32 %v2146_v2, %v4437_v15  ;;  %v2425_v15 = vmul.f32 %v4513_v3, %v2265_v45 }
 0x383   : > { %v2275_v10 = vmax.f32 %v2052_v51, %v2211_v6  ;;  %v2208_v12 = vmul.f32 0.2, %v2098_v38  ;;  %v2514_v6 = vadd.f32 %v2513_v33, %v2421_v19 }
 0x384   : > { %v2274_v50 = vmax.f32 %v2003_v22, %v2210_v23  ;;  %v2209_v31 = vmul.f32 0.2, %v2147_v36  ;;  %v2493_v23 = vadd.f32 %v4523_v35, %v2420_v28 }
 0x385   : > { %v2435_v49 = vmul.f32 %v2371_v60, %v2275_v10  ;;  %v2272_v3 = vmax.f32 %v2098_v38, %v2208_v12  ;;  %v2515_v8 = vadd.f32 %v2514_v6, %v2425_v15  ;;  %v2532_v15 = vperm.slane %v2530_v1, 0 }
 0x386   : > { %v2053_v52 = vpop.f32.mrf.mxu1  ;;  %v2434_v46 = vmul.f32 %v2371_v60, %v2274_v50  ;;  %v2273_v37 = vmax.f32 %v2147_v36, %v2209_v31  ;;  %v2494_v18 = vadd.f32 %v2493_v23, %v2424_v39 }
 0x387   : > { %v2004_v34 = vpop.f32.mrf.mxu0  ;;  %v2054_v61 = vadd.f32 %v2053_v52, %v4443_v58  ;;  %v2476_v22 = vadd.f32 %v2475_v27, %v2435_v49  ;;  %v2432_v48 = vmul.f32 %v2366_v0, %v2272_v3  ;;  %v2516_v19 = vadd.f32 %v2515_v8, %v2429_v29 }
 0x388   : > { %v2005_v26 = vadd.f32 %v2004_v34, %v4443_v58  ;;  %v2100_v4 = vpop.f32.mrf.mxu2  ;;  %v2455_v24 = vadd.f32 %v2454_v30, %v2434_v46  ;;  %v2433_v50 = vmul.f32 %v2366_v0, %v2273_v37  ;;  %v2495_v28 = vadd.f32 %v2494_v18, %v2428_v16 }
 0x389   : > { %v2215_v32 = vmul.f32 0.2, %v2054_v61  ;;  %v2149_v25 = vpop.f32.mrf.mxu3  ;;  %v2101_v13 = vadd.f32 %v2100_v4, %v4439_v56 }
 0x38a   : > { %v2214_v63 = vmul.f32 0.2, %v2005_v26  ;;  %v2150_v9 = vadd.f32 %v2149_v25, %v4439_v56 }
 0x38b   : > { %v2279_v20 = vmax.f32 %v2054_v61, %v2215_v32  ;;  %v2212_v47 = vmul.f32 0.2, %v2101_v13  ;;  %v2517_v61 = vadd.f32 %v2516_v19, %v2433_v50 }
 0x38c   : > { %v2278_v7 = vmax.f32 %v2005_v26, %v2214_v63  ;;  %v2213_v11 = vmul.f32 0.2, %v2150_v9  ;;  %v2496_v26 = vadd.f32 %v2495_v28, %v2432_v48 }
 0x38d   : > { %v2439_v17 = vmul.f32 %v2376_v5, %v2279_v20  ;;  %v2276_v44 = vmax.f32 %v2101_v13, %v2212_v47 }
 0x38e   : > { %v2438_v51 = vmul.f32 %v2376_v5, %v2278_v7  ;;  %v2277_v41 = vmax.f32 %v2150_v9, %v2213_v11 }
 0x38f   : > { %v2477_v2 = vadd.f32 %v2476_v22, %v2439_v17  ;;  %v2436_v36 = vmul.f32 %v2371_v60, %v2276_v44 }
 0x390   : > { %v2456_v14 = vadd.f32 %v2455_v24, %v2438_v51  ;;  %v2102_v10 = vpop.f32.mrf.mxu2  ;;  %v2437_v42 = vmul.f32 %v2371_v60, %v2277_v41 }
 0x391   : > { %v2478_v53 = vrot.slane %v2477_v2, 4  ;;  %v2151_v59 = vpop.f32.mrf.mxu3  ;;  %v2103_v35 = vadd.f32 %v2102_v10, %v4443_v58  ;;  %v2497_v46 = vadd.f32 %v2496_v26, %v2436_v36 }
 0x392   : > { %v2457_v56 = vrot.slane %v2456_v14, 4  ;;  %v2152_v33 = vadd.f32 %v2151_v59, %v4443_v58  ;;  %v2518_v49 = vadd.f32 %v2517_v61, %v2437_v42 }
 0x393   : > { %v2479_v38 = vadd.f32 %v2478_v53, %v2477_v2  ;;  %v2216_v57 = vmul.f32 0.2, %v2103_v35 }
 0x394   : > { %v2458_v45 = vadd.f32 %v2457_v56, %v2456_v14  ;;  %v2217_v62 = vmul.f32 0.2, %v2152_v33  ;;  %v2555_v14 = vlaneseq }
 0x395   : > { %v2480_v52 = vrot.slane %v2479_v38, 2  ;;  %v2280_v54 = vmax.f32 %v2103_v35, %v2216_v57 }
 0x396   : > { %v2459_v34 = vrot.slane %v2458_v45, 2  ;;  %v2281_v21 = vmax.f32 %v2152_v33, %v2217_v62  ;;  %vm2557_vm3 = vcmp.lt.s32.totalorder %v2555_v14, 512 }
 0x397   : > { %v2481_v43 = vadd.f32 %v2480_v52, %v2479_v38  ;;  %v2440_v58 = vmul.f32 %v2376_v5, %v2280_v54 }
 0x398   : > { %v2460_v0 = vadd.f32 %v2459_v34, %v2458_v45  ;;  %v2441_v39 = vmul.f32 %v2376_v5, %v2281_v21 }
 0x399   : > { %v2482_v32 = vrot.slane %v2481_v43, 1  ;;  %v2498_v31 = vadd.f32 %v2497_v46, %v2440_v58 }
 0x39a   : > { %v2461_v63 = vrot.slane %v2460_v0, 1  ;;  %v2519_v4 = vadd.f32 %v2518_v49, %v2441_v39 }
 0x39b   : > { %v2483_v60 = vadd.f32 %v2482_v32, %v2481_v43  ;;  %v2499_v30 = vrot.slane %v2498_v31, 4 }
 0x39c   : > { %v2462_v12 = vadd.f32 %v2461_v63, %v2460_v0  ;;  %v2520_v27 = vrot.slane %v2519_v4, 4 }
 0x39d   : > { %v2534_v25 = vadd.f32 %v2532_v15, %v2483_v60  ;;  %v2500_v20 = vadd.f32 %v2499_v30, %v2498_v31 }
 0x39e   : > { %v2533_v7 = vadd.f32 %v2532_v15, %v2462_v12  ;;  %v2521_v40 = vadd.f32 %v2520_v27, %v2519_v4 }
 0x39f   : > { %2965 = vtanh.f32 %v2534_v25  ;;  %v2501_v55 = vrot.slane %v2500_v20, 2 }
 0x3a0   : > { %v2522_v13 = vrot.slane %v2521_v40, 2  ;;  %2967 = vtanh.f32 %v2533_v7 }
 0x3a1   : > { %v2502_v9 = vadd.f32 %v2501_v55, %v2500_v20 }
 0x3a2   : > { %v2523_v24 = vadd.f32 %v2522_v13, %v2521_v40 }
 0x3a3   : > { %v2503_v5 = vrot.slane %v2502_v9, 1 }
 0x3a4   : > { %v2524_v22 = vrot.slane %v2523_v24, 1 }
 0x3a5   : > { %v2966_v51 = vpop.eup %2965  ;;  %v2504_v17 = vadd.f32 %v2503_v5, %v2502_v9 }
 0x3a6   : > { %v2525_v3 = vadd.f32 %v2524_v22, %v2523_v24  ;;  %v2545_v37 = vrot.slane %v2966_v51, 7  ;;  %v2968_v47 = vpop.eup %2967 }
 0x3a7   : > { %v2535_v11 = vadd.f32 %v2532_v15, %v2504_v17 }
 0x3a8   : > { %v2536_v23 = vadd.f32 %v2532_v15, %v2525_v3  ;;  %v2549_v6 = vsel %vm2548_vm0, %v2968_v47, %v2545_v37 }
 0x3a9   : > { %2969 = vtanh.f32 %v2535_v11 }
 0x3aa   : > { %2971 = vtanh.f32 %v2536_v23 }
 0x3af   : > { %v2970_v2 = vpop.eup %2969 }
 0x3b0   : > { %v2972_v16 = vpop.eup %2971  ;;  %v2546_v29 = vrot.slane %v2970_v2, 6 }
 0x3b1   : > { %v2547_v44 = vrot.slane %v2972_v16, 5 }
 0x3b3   : > { %v2551_v41 = vsel %vm2550_vm1, %v2546_v29, %v2547_v44 }
 0x3b4   : > { %v2553_v56 = vsel %vm2552_vm2, %v2549_v6, %v2551_v41 }
 0x3b5   : > { %2559 = vst.msk [vmem:[%s340_s13] sm:$0xf] %vm2557_vm3, %v2553_v56 }
 0x3b6   : > { %3000 = shalt.err (!%p2997_p5)
}
 0x3b7   : > { %2862 = dma.vmem_to_hbm [thread:$0]  (%p3131_p4), %s2576_s14, 64, %s2578_s15, %s2561_s24  }
 0x3b8 PF: > { %p2868_p6 = scmp.ge.s32.totalorder %s3051_s26, 2  ;;  %s2589_s11 = sand.u32 1, %s3031_s21  }
 0x3b9   : > { %s2590_s28 = scalar_lea.sflag [#allocation3], %s2589_s11 }
 0x3ba   : > { %p2865_p7 = pnand %p2868_p6, %p3138_p8 }
 0x3bc   : > { %p2866_p9 = pneg %p2865_p7 }
 0x3be   : > { %3026 = dma.done.wait (%p2866_p9), %s2590_s28, 64  }
 0x3bf   : > { %3028 = vsyncadd (%p2866_p9), %s2590_s28, 4294967232  ;;  %s19_s26 = sadd.s32 1, %s3051_s26   ;;  %s4756_s21 = smov %s3035_s22 }
 0x3c0   : > { %p16_p10 = scmp.ge.s32.totalorder %s19_s26, 4   ;;  %s4757_s22 = smov %s3039_s23 }
 0x3c1   : > { %s4758_s23 = smov %s3144_s10  ;;  %s4759_s24 = smov %s3047_s25 }
 0x3c2   : > { %s4760_s25 = smov %s4762_s29  ;;  %18 = sbr.rel (!%p16_p10) target bundleno = 4 (0x4), region = 97 }
 0x3c7   :  { %2596 = vsyncpa [#allocation3], 1 }
 0x3c8   :  { %2598 = vsyncpa [#allocation3 + $0x1], 1 }

// kernel: tpu_custom_call.1
= control target key start
LH: loop header
LB: loop body
LE: loop exit
PB: predicated region body
PF: predicated region fallthrough
CT: control target
= control target key end

     0   :  { %11 = vsyncpa [#allocation3], 0  ;;  %s4579_s0 = inlined_call_operand.vmem [shape: f32[2,1,3,512], index: 0, kind: input, shape index: {}]   ;;  %s4580_s1 = inlined_call_operand.vmem [shape: f32[2,1,128,3], index: 1, kind: input, shape index: {}]   ;;  %s4581_s2 = inlined_call_operand.vmem [shape: f32[2,3,128,1], index: 2, kind: input, shape index: {}]   ;;  %s4582_s3 = inlined_call_operand.vmem [shape: bf16[2,2,128,128], index: 3, kind: input, shape index: {}]   ;;  %s4583_s4 = inlined_call_operand.vmem [shape: f32[2,128,1], index: 4, kind: input, shape index: {}]   ;;  %s4584_s5 = inlined_call_operand.vmem [shape: f32[2,1,1], index: 5, kind: input, shape index: {}]   ;;  %s4585_s6 = inlined_call_operand.hbm [shape: f32[2,1,512], index: 6, kind: output, shape index: {}]  }
   0x1   :  { %13 = vsyncpa [#allocation3 + $0x1], 0  ;;  %s3091_s21 = smov 0   ;;  %s3093_s22 = smov 0  }
   0x2   :  { %s3095_s23 = smov 0   ;;  %s3097_s24 = smov 0  }
   0x3   :  { %s3099_s25 = smov 0   ;;  %s3101_s26 = smov 0  }
   0x4 LB: > { %s2710_s27 = sadd.s32 4294967295, %s3051_s26   ;;  %s2711_s28 = sadd.s32 4294967294, %s3051_s26   ;;  %s3051_s26 = sphi %s3101_s26, %s19_s26   ;;  %s3047_s25 = sphi %s3099_s25, %s4760_s25   ;;  %s3043_s24 = sphi %s3097_s24, %s4759_s24   ;;  %s3039_s23 = sphi %s3095_s23, %s4758_s23   ;;  %s3035_s22 = sphi %s3093_s22, %s4757_s22   ;;  %s3031_s21 = sphi %s3091_s21, %s4756_s21  }
   0x5   : > { %s31_s29 = sadd.s32 1, %s3047_s25  ;;  %s198_s30 = sadd.s32 1, %s3039_s23 }
   0x6   : > { %p33_p0 = scmp.ge.s32.totalorder %s31_s29, 2  ;;  %p208_p1 = scmp.ne.s32.totalorder %s3039_s23, %s3035_s22 }
   0x7   : > { %p209_p2 = scmp.eq.s32.totalorder %s2710_s27, 1  ;;  %p214_p3 = scmp.ne.s32.totalorder %s3035_s22, %s3031_s21 }
   0x8   : > { %s4762_s29 = smov (%p33_p0, %s31_s29), 0  ;;  %p215_p5 = scmp.eq.s32.totalorder %s2711_s28, 1 }
   0x9   : > { %p3131_p4 = por %p209_p2, %p208_p1  ;;  %s193_s8 = ssub.s32 %s3047_s25, %s4762_s29 }
   0xa   : > { %p2714_p6 = scmp.ge.s32.totalorder %s3051_s26, 1  ;;  %p196_p7 = scmp.eq.s32.totalorder %s193_s8, 0 }
   0xb   : > { %p3138_p8 = por %p215_p5, %p214_p3  ;;  %p284_p9 = scmp.lt.s32.totalorder %s3051_s26, 3 }
   0xc   : > { %s3144_s10 = scalar_select %p196_p7, %s3039_s23, %s198_s30  }
   0xd   : > { %p285_p10 = pnand %p2714_p6, %p284_p9 }
   0xf   : > { %288 = sbr.rel (%p285_p10) target bundleno = 952 (0x3b8), region = 44 }
  0x14   : > { %p342_p11 = scmp.lt.s32.totalorder %s3043_s24, 1  ;;  %v4588_v0 = vmov 2   ;;  %v4586_v1 = vmov 0   ;;  %v3055_v7 = vmov 1   ;;  %vm2548_vm0 = vcmask 1040384   ;;  %s2838_s27 = sshll.u32 %s3043_s24, 2 }
  0x15   : > { %2929 = vset.pattern.permute.xlu0 %v4588_v0  ;;  %2921 = vset.pattern.permute.xlu2 %v4586_v1  ;;  %s2573_s8 = scalar_lea.hbm %s4585_s6, %s2838_s27  ;;  %vm2550_vm1 = vcmask 1042434   ;;  %vm2552_vm2 = vcmask 1041408  }
  0x16   : > { %2920 = vset.pattern.permute.xlu1 %v4586_v1  ;;  %s3151_s11 = scalar_select %p342_p11, %s3043_s24, 1 }
  0x18   : > { %s3154_s12 = sshll.u32 %s3151_s11, 7  ;;  %s2861_s16 = smul.u32 384, %s3151_s11 }
  0x19   : > { %s3160_s15 = scalar_lea.vmem %s4580_s1, %s3154_s12  ;;  %s2841_s20 = sshll.u32 %s3151_s11, 4 }
  0x1a   : > { %v392_v2 = vld [vmem:[%s3160_s15 + $0x78] sm:$0xff]  ;;  %v390_v3 = vld [vmem:[%s3160_s15 + $0x68] sm:$0xff]  ;;  %v3165_v4 = vld [vmem:[%s3160_s15 + $0x10] sm:$0xff]  ;;  %s3191_s19 = scalar_lea.vmem %s4581_s2, %s2861_s16  ;;  %s349_s30 = scalar_lea.vmem %s4579_s0, %s2841_s20 }
  0x1b   : > { %470 = vperm.xlu2 %2921, %v392_v2   ;;  %808 = vperm.xlu0 %2929, %v390_v3   ;;  %v3169_v5 = vld [vmem:[%s3160_s15 + $0x40] sm:$0xff]  ;;  %v391_v6 = vld [vmem:[%s3160_s15 + $0x70] sm:$0xff]  ;;  %v974_v12 = vld [vmem:[%s3191_s19 + $0x78] sm:$0xff]  ;;  %s3504_s14 = scalar_lea.vmem %s4583_s4, %s3154_s12  ;;  %s3909_s17 = scalar_lea.vmem %s4582_s3, %s3154_s12 }
  0x1c   : > { %405 = vperm.xlu1 %2920, %v3165_v4   ;;  %v3175_v8 = vld [vmem:[%s3160_s15 + $0x20] sm:$0xff]  ;;  %v387_v10 = vld [vmem:[%s3160_s15 + $0x50] sm:$0xff]  ;;  %v388_v13 = vld [vmem:[%s3160_s15 + $0x58] sm:$0xff] }
  0x1d   : > { %v389_v9 = vld [vmem:[%s3160_s15 + $0x60] sm:$0xff]  ;;  %v973_v11 = vld [vmem:[%s3191_s19 + $0x70] sm:$0xff]  ;;  %v3207_v15 = vld [vmem:[%s3160_s15 + $0x8] sm:$0xff] }
  0x1e   : > { %v3200_v14 = vld [vmem:[%s3160_s15] sm:$0xff]  ;;  %v972_v17 = vld [vmem:[%s3191_s19 + $0x68] sm:$0xff]  ;;  %v384_v19 = vld [vmem:[%s3160_s15 + $0x38] sm:$0xff] }
  0x1f   : > { %v971_v16 = vld [vmem:[%s3191_s19 + $0x60] sm:$0xff]  ;;  %v386_v18 = vld [vmem:[%s3160_s15 + $0x48] sm:$0xff]  ;;  %v969_v22 = vld [vmem:[%s3191_s19 + $0x50] sm:$0xff] }
  0x20   : > { %v967_v20 = vld [vmem:[%s3191_s19 + $0x40] sm:$0xff]  ;;  %v3226_v23 = vld [vmem:[%s3160_s15 + $0x28] sm:$0xff]  ;;  %v383_v25 = vld [vmem:[%s3160_s15 + $0x30] sm:$0xff] }
  0x21   : > { %v964_v26 = vld [vmem:[%s3191_s19 + $0x28] sm:$0xff]  ;;  %v970_v27 = vld [vmem:[%s3191_s19 + $0x58] sm:$0xff]  ;;  %v961_v29 = vld [vmem:[%s3191_s19 + $0x10] sm:$0xff] }
  0x22   : > { %v960_v33 = vld [vmem:[%s3191_s19 + $0x8] sm:$0xff]  ;;  %v2737_v37 = vld [vmem:[%s3191_s19 + $0xe0] sm:$0xff]  ;;  %v2736_v44 = vld [vmem:[%s3191_s19 + $0xd8] sm:$0xff] }
  0x23   : > { %2922 = vset.pattern.permute.xlu2 %v3055_v7  ;;  %788 = vperm.xlu0 %2929, %v3169_v5   ;;  %v968_v39 = vld [vmem:[%s3191_s19 + $0x48] sm:$0xff]  ;;  %v375_v41 = vld [vmem:[%s349_s30] sm:$0x77] }
  0x24   : > { %465 = vperm.xlu1 %2920, %v391_v6   ;;  %608 = vperm.xlu2 %2922, %v391_v6   ;;  %v376_v42 = vld [vmem:[%s349_s30 + $0x8] sm:$0x77]  ;;  %v475_v45 = vperm.slane %v375_v41, 0  ;;  %v476_v46 = vperm.slane %v375_v41, 4  ;;  %v615_v48 = vperm.slane %v375_v41, 1  ;;  %v616_v50 = vperm.slane %v375_v41, 5 }
  0x25   : > { %v477_v47 = vperm.slane %v376_v42, 0  ;;  %v478_v49 = vperm.slane %v376_v42, 4  ;;  %v617_v51 = vperm.slane %v376_v42, 1  ;;  %v618_v52 = vperm.slane %v376_v42, 5 }
  0x26   : > { %v3273_v54 = vperm.slane %v475_v45, 0  ;;  %v3275_v55 = vperm.slane %v476_v46, 0  ;;  %v3279_v57 = vperm.slane %v615_v48, 1  ;;  %v3284_v59 = vperm.slane %v616_v50, 1 }
  0x27   : > { %v3277_v56 = vperm.slane %v477_v47, 0  ;;  %v3282_v58 = vperm.slane %v478_v49, 0  ;;  %v3286_v60 = vperm.slane %v617_v51, 1  ;;  %v3288_v61 = vperm.slane %v618_v52, 1 }
  0x28   : > { %v819_v63 = vperm.slane %v375_v41, 2 }
  0x2b   : > { %772 = vperm.xlu0 %2929, %v3175_v8  }
  0x2c   : > { %2923 = vset.pattern.permute.xlu1 %v4588_v0  ;;  %2924 = vset.pattern.permute.xlu2 %v4588_v0 }
  0x2d   : > { %812 = vperm.xlu1 %2923, %v391_v6   ;;  %816 = vperm.xlu2 %2924, %v392_v2   ;;  %v822_v6 = vperm.slane %v376_v42, 6 }
  0x33   : > { %2950 = vset.pattern.permute.xlu0 %v3055_v7 }
  0x34   : > { %612 = vperm.xlu0 %2950, %v392_v2   ;;  %v820_v2 = vperm.slane %v375_v41, 6 }
  0x35   : > { %2925 = vset.pattern.permute.xlu1 %v4586_v1  ;;  %2926 = vset.pattern.permute.xlu2 %v4586_v1 }
  0x36   : > { %455 = vperm.xlu1 %2925, %v389_v9   ;;  %460 = vperm.xlu2 %2926, %v390_v3  }
  0x3c   : > { %600 = vperm.xlu0 %2950, %v389_v9  }
  0x3e   : > { %2927 = vset.pattern.permute.xlu1 %v3055_v7  ;;  %2928 = vset.pattern.permute.xlu2 %v4588_v0 }
  0x3f   : > { %604 = vperm.xlu1 %2927, %v390_v3   ;;  %804 = vperm.xlu2 %2928, %v389_v9   ;;  %v821_v3 = vperm.slane %v376_v42, 2 }
  0x44   : > { %592 = vperm.xlu0 %2950, %v387_v10  }
  0x47   : > { %2930 = vset.pattern.permute.xlu1 %v4586_v1  ;;  %2931 = vset.pattern.permute.xlu2 %v4586_v1 }
  0x48   : > { %1047 = vperm.xlu1 %2930, %v973_v11   ;;  %1052 = vperm.xlu2 %2931, %v974_v12  }
  0x4c   : > { %560 = vperm.xlu0 %2950, %v3165_v4  }
  0x50   : > { %445 = vperm.xlu1 %2930, %v387_v10   ;;  %450 = vperm.xlu2 %2931, %v388_v13  }
  0x54   : > { %2954 = vset.pattern.permute.xlu0 %v4586_v1 }
  0x55   : > { %395 = vperm.xlu0 %2954, %v3200_v14  }
  0x58   : > { %2932 = vset.pattern.permute.xlu1 %v3055_v7  ;;  %2933 = vset.pattern.permute.xlu2 %v4588_v0 }
  0x59   : > { %596 = vperm.xlu1 %2932, %v388_v13   ;;  %796 = vperm.xlu2 %2933, %v387_v10  }
  0x5d   : > { %400 = vperm.xlu0 %2954, %v3207_v15  }
  0x61   : > { %2934 = vset.pattern.permute.xlu1 %v4588_v0  ;;  %2935 = vset.pattern.permute.xlu2 %v4586_v1 }
  0x62   : > { %800 = vperm.xlu1 %2934, %v388_v13   ;;  %1037 = vperm.xlu2 %2935, %v971_v16   ;;  %v2731_v13 = vld [vmem:[%s3191_s19 + $0xb0] sm:$0xff] }
  0x65   : > { %1042 = vperm.xlu0 %2954, %v972_v17  }
  0x6a   : > { %2936 = vset.pattern.permute.xlu1 %v4586_v1  ;;  %440 = vperm.xlu2 %2935, %v386_v18  }
  0x6b   : > { %435 = vperm.xlu1 %2936, %v3169_v5  }
  0x6d   : > { %430 = vperm.xlu0 %2954, %v384_v19  }
  0x72   : > { %2938 = vset.pattern.permute.xlu2 %v3055_v7 }
  0x73   : > { %2937 = vset.pattern.permute.xlu1 %v3055_v7  ;;  %588 = vperm.xlu2 %2938, %v386_v18  }
  0x74   : > { %584 = vperm.xlu1 %2937, %v3169_v5  }
  0x75   : > { %1017 = vperm.xlu0 %2954, %v967_v20   ;;  %v3222_v21 = vpop.permute.xlu2 %470  ;;  %v3310_v20 = vperm.slane %v819_v63, 2 }
  0x76   : > { %v547_v16 = vmul.f32 %v3273_v54, %v3222_v21  ;;  %v548_v17 = vmul.f32 %v3275_v55, %v3222_v21 }
  0x7b   : > { %2940 = vset.pattern.permute.xlu2 %v4586_v1 }
  0x7c   : > { %2939 = vset.pattern.permute.xlu1 %v4588_v0  ;;  %1027 = vperm.xlu2 %2940, %v969_v22   ;;  %v3312_v22 = vperm.slane %v820_v2, 2 }
  0x7d   : > { %792 = vperm.xlu1 %2939, %v386_v18   ;;  %420 = vperm.xlu0 %2954, %v3226_v23   ;;  %v549_v18 = vmul.f32 %v3277_v56, %v3222_v21 }
  0x7e   : > { %v3231_v24 = vpop.permute.xlu2 %608 }
  0x7f   : > { %v683_v45 = vmul.f32 %v3279_v57, %v3231_v24  ;;  %v684_v46 = vmul.f32 %v3284_v59, %v3231_v24  ;;  %v685_v47 = vmul.f32 %v3286_v60, %v3231_v24  ;;  %v686_v63 = vmul.f32 %v3288_v61, %v3231_v24 }
  0x84   : > { %425 = vperm.xlu2 %2940, %v383_v25  }
  0x85   : > { %2941 = vset.pattern.permute.xlu1 %v4586_v1  ;;  %1002 = vperm.xlu0 %2954, %v964_v26   ;;  %v3316_v26 = vperm.slane %v822_v6, 2 }
  0x86   : > { %1032 = vperm.xlu1 %2941, %v970_v27  }
  0x87   : > { %v3237_v28 = vpop.permute.xlu2 %816 }
  0x88   : > { %v892_v41 = vmul.f32 %v3312_v22, %v3237_v28 }
  0x8c   : > { %2943 = vset.pattern.permute.xlu2 %v3055_v7 }
  0x8d   : > { %580 = vperm.xlu2 %2943, %v384_v19   ;;  %987 = vperm.xlu0 %2954, %v961_v29   ;;  %v3241_v30 = vpop.permute.xlu0 %808 }
  0x8e   : > { %2942 = vset.pattern.permute.xlu1 %v3055_v7  ;;  %v3244_v31 = vpop.permute.xlu1 %405 }
  0x8f   : > { %576 = vperm.xlu1 %2942, %v383_v25  }
  0x90   : > { %v3246_v32 = vpop.permute.xlu2 %460 }
  0x95   : > { %2945 = vset.pattern.permute.xlu2 %v4588_v0  ;;  %982 = vperm.xlu0 %2954, %v960_v33   ;;  %v3250_v34 = vpop.permute.xlu0 %788 }
  0x96   : > { %v3252_v35 = vpop.permute.xlu1 %465  ;;  %784 = vperm.xlu2 %2945, %v384_v19   ;;  %v550_v19 = vmul.f32 %v3282_v58, %v3222_v21  ;;  %v891_v21 = vmul.f32 %v3310_v20, %v3237_v28 }
  0x97   : > { %2944 = vset.pattern.permute.xlu1 %v4588_v0  ;;  %v543_v50 = vmul.f32 %v3273_v54, %v3252_v35  ;;  %v544_v2 = vmul.f32 %v3275_v55, %v3252_v35 }
  0x98   : > { %780 = vperm.xlu1 %2944, %v383_v25  }
  0x99   : > { %v3255_v36 = vpop.permute.xlu2 %804 }
  0x9d   : > { %1374 = vperm.xlu0 %2954, %v2737_v37   ;;  %v3262_v38 = vpop.permute.xlu0 %772 }
  0x9e   : > { %2947 = vset.pattern.permute.xlu2 %v4586_v1 }
  0x9f   : > { %v3266_v40 = vpop.permute.xlu1 %812  ;;  %415 = vperm.xlu2 %2947, %v3175_v8  }
  0xa0   : > { %2946 = vset.pattern.permute.xlu1 %v4586_v1 }
  0xa1   : > { %1022 = vperm.xlu1 %2946, %v968_v39   ;;  %v965_v39 = vld [vmem:[%s3191_s19 + $0x30] sm:$0xff] }
  0xa2   : > { %v3270_v43 = vpop.permute.xlu2 %1052 }
  0xa5   : > { %1369 = vperm.xlu0 %2954, %v2736_v44   ;;  %v894_v44 = vmul.f32 %v3316_v26, %v3237_v28 }
  0xa6   : > { %v613_v53 = vpop.permute.xlu0 %612 }
  0xa7   : > { %2949 = vset.pattern.permute.xlu2 %v3055_v7  ;;  %v687_v5 = vmul.f32 %v3279_v57, %v613_v53  ;;  %v688_v9 = vmul.f32 %v3284_v59, %v613_v53  ;;  %v689_v10 = vmul.f32 %v3286_v60, %v613_v53  ;;  %v690_v11 = vmul.f32 %v3288_v61, %v613_v53 }
  0xa8   : > { %v3290_v62 = vpop.permute.xlu1 %455  ;;  %572 = vperm.xlu2 %2949, %v3226_v23  }
  0xa9   : > { %2948 = vset.pattern.permute.xlu1 %v3055_v7  ;;  %v751_v25 = vadd.f32 %v687_v5, %v547_v16  ;;  %v752_v27 = vadd.f32 %v688_v9, %v548_v17  ;;  %v753_v29 = vadd.f32 %v689_v10, %v549_v18  ;;  %v754_v33 = vadd.f32 %v690_v11, %v550_v19  ;;  %v3365_v16 = vld [vmem:[%s3160_s15 + $0x18] sm:$0xff]  ;;  %s2577_s15 = sshll.u32 %s2573_s8, 4  ;;  %s2578_s15 = int_to_ptr.hbm [resolvable:$true] %s2577_s15 }
  0xaa   : > { %568 = vperm.xlu1 %2948, %v3175_v8   ;;  %v3299_v12 = vpop.permute.xlu2 %450  ;;  %v3314_v8 = vperm.slane %v821_v3, 2  ;;  %v545_v3 = vmul.f32 %v3277_v56, %v3252_v35  ;;  %v546_v5 = vmul.f32 %v3282_v58, %v3252_v35  ;;  %v887_v9 = vmul.f32 %v3310_v20, %v3266_v40  ;;  %s2987_s16 = sshra.s32 %s2578_s15, 4  ;;  %s2988_s16 = int_to_ptr.hbm [resolvable:$true] %s2987_s16 }
  0xab   : > { %v955_v49 = vadd.f32 %v891_v21, %v751_v25  ;;  %v956_v51 = vadd.f32 %v892_v41, %v752_v27  ;;  %v958_v53 = vadd.f32 %v894_v44, %v754_v33  ;;  %v888_v10 = vmul.f32 %v3312_v22, %v3266_v40  ;;  %p2994_p1 = scmp.lt.s32.totalorder %s2988_s16, %s4585_s6 }
  0xac   : > { %v893_v42 = vmul.f32 %v3314_v8, %v3237_v28  ;;  %v2730_v28 = vld [vmem:[%s3191_s19 + $0xa8] sm:$0xff]  ;;  %v889_v24 = vmul.f32 %v3314_v8, %v3266_v40  ;;  %v890_v11 = vmul.f32 %v3316_v26, %v3266_v40  ;;  %v748_v25 = vadd.f32 %v684_v46, %v544_v2  ;;  %v966_v40 = vld [vmem:[%s3191_s19 + $0x38] sm:$0xff] }
  0xad   : > { %1344 = vperm.xlu0 %2954, %v2731_v13   ;;  %v1115_v35 = vadd.f32 %v3270_v43, %v955_v49  ;;  %v1116_v17 = vadd.f32 %v3270_v43, %v956_v51  ;;  %v1118_v19 = vadd.f32 %v3270_v43, %v958_v53  ;;  %v749_v27 = vadd.f32 %v685_v47, %v545_v3 }
  0xae   : > { %v3318_v37 = vpop.permute.xlu0 %600  ;;  %v957_v52 = vadd.f32 %v893_v42, %v753_v29  ;;  %v750_v29 = vadd.f32 %v686_v63, %v546_v5  ;;  %v952_v41 = vadd.f32 %v888_v10, %v748_v25  ;;  %v496_v53 = vmul.f32 %v3275_v55, %v3244_v31 }
  0xaf   : > { %v1179_v21 = vmul.f32 0.2, %v1115_v35  ;;  %v953_v42 = vadd.f32 %v889_v24, %v749_v27  ;;  %v1180_v49 = vmul.f32 0.2, %v1116_v17  ;;  %v497_v63 = vmul.f32 %v3277_v56, %v3244_v31 }
  0xb0   : > { %2952 = vset.pattern.permute.xlu2 %v4586_v1  ;;  %v1117_v18 = vadd.f32 %v3270_v43, %v957_v52  ;;  %v954_v44 = vadd.f32 %v890_v11, %v750_v29  ;;  %v495_v52 = vmul.f32 %v3273_v54, %v3244_v31  ;;  %v498_v2 = vmul.f32 %v3282_v58, %v3244_v31 }
  0xb1   : > { %v3336_v48 = vpop.permute.xlu1 %604  ;;  %1007 = vperm.xlu2 %2952, %v965_v39   ;;  %v2725_v39 = vld [vmem:[%s3191_s19 + $0x80] sm:$0xff] }
  0xb2   : > { %2951 = vset.pattern.permute.xlu1 %v4588_v0 }
  0xb3   : > { %776 = vperm.xlu1 %2951, %v3226_v23   ;;  %v3351_v6 = vpop.permute.xlu2 %796  ;;  %v747_v23 = vadd.f32 %v683_v45, %v543_v50  ;;  %v1181_v50 = vmul.f32 0.2, %v1117_v18 }
  0xb5   : > { %1339 = vperm.xlu0 %2954, %v2730_v28   ;;  %v951_v33 = vadd.f32 %v887_v9, %v747_v23  ;;  %v1182_v28 = vmul.f32 0.2, %v1118_v19  ;;  %v1243_v9 = vmax.f32 %v1115_v35, %v1179_v21  ;;  %v1244_v23 = vmax.f32 %v1116_v17, %v1180_v49 }
  0xb6   : > { %v3362_v13 = vpop.permute.xlu0 %592  ;;  %v1245_v25 = vmax.f32 %v1117_v18, %v1181_v50 }
  0xb7   : > { %v1246_v29 = vmax.f32 %v1118_v19, %v1182_v28 }
  0xb9   : > { %410 = vperm.xlu2 %2952, %v3365_v16  }
  0xba   : > { %v1048_v45 = vpop.permute.xlu1 %1047 }
  0xbb   : > { %2953 = vset.pattern.permute.xlu1 %v4586_v1  ;;  %v1111_v51 = vadd.f32 %v1048_v45, %v951_v33  ;;  %v1112_v43 = vadd.f32 %v1048_v45, %v952_v41  ;;  %v1113_v46 = vadd.f32 %v1048_v45, %v953_v42  ;;  %v1114_v47 = vadd.f32 %v1048_v45, %v954_v44 }
  0xbc   : > { %1012 = vperm.xlu1 %2953, %v966_v40   ;;  %v3382_v3 = vpop.permute.xlu2 %1037 }
  0xbd   : > { %1314 = vperm.xlu0 %2954, %v2725_v39   ;;  %v1175_v5 = vmul.f32 0.2, %v1111_v51  ;;  %v1176_v10 = vmul.f32 0.2, %v1112_v43  ;;  %v1177_v24 = vmul.f32 0.2, %v1113_v46 }
  0xbe   : > { %v561_v11 = vpop.permute.xlu0 %560  ;;  %v1178_v27 = vmul.f32 0.2, %v1114_v47 }
  0xbf   : > { %v635_v33 = vmul.f32 %v3279_v57, %v561_v11  ;;  %v636_v41 = vmul.f32 %v3284_v59, %v561_v11  ;;  %v637_v42 = vmul.f32 %v3286_v60, %v561_v11  ;;  %v638_v31 = vmul.f32 %v3288_v61, %v561_v11 }
  0xc0   : > { %v1239_v40 = vmax.f32 %v1111_v51, %v1175_v5  ;;  %v1240_v44 = vmax.f32 %v1112_v43, %v1176_v10  ;;  %v1241_v39 = vmax.f32 %v1113_v46, %v1177_v24  ;;  %v1242_v35 = vmax.f32 %v1114_v47, %v1178_v27  ;;  %v2790_v43 = vld [vmem:[%s3191_s19 + $0x108] sm:$0xff]  ;;  %v2793_v27 = vld [vmem:[%s3191_s19 + $0x120] sm:$0xff] }
  0xc1   : > { %v3388_v21 = vadd.f32 %v635_v33, %v495_v52  ;;  %v3390_v45 = vadd.f32 %v636_v41, %v496_v53  ;;  %v3392_v17 = vadd.f32 %v637_v42, %v497_v63  ;;  %v3394_v18 = vadd.f32 %v638_v31, %v498_v2  ;;  %2956 = vset.pattern.permute.xlu2 %v4588_v0 }
  0xc2   : > { %v3397_v19 = vpop.permute.xlu1 %445  ;;  %764 = vperm.xlu2 %2956, %v3165_v4   ;;  %v1291_v49 = vpack.c.bf16 %v1243_v9, %v1239_v40  ;;  %v1292_v50 = vpack.c.bf16 %v1244_v23, %v1240_v44  ;;  %v1293_v28 = vpack.c.bf16 %v1245_v25, %v1241_v39  ;;  %v1294_v51 = vpack.c.bf16 %v1246_v29, %v1242_v35  ;;  %v963_v4 = vld [vmem:[%s3191_s19 + $0x20] sm:$0xff] }
  0xc3   : > { %4628 = vst [vmem:[#allocation5_spill] sm:$0xff] %v3388_v21  ;;  %v675_v52 = vmul.f32 %v3279_v57, %v3318_v37  ;;  %v883_v53 = vmul.f32 %v3310_v20, %v3241_v30  ;;  %v535_v63 = vmul.f32 %v3273_v54, %v3290_v62  ;;  %v676_v2 = vmul.f32 %v3284_v59, %v3318_v37 }
  0xc4   : > { %4629 = vst [vmem:[#allocation6_spill] sm:$0xff] %v3390_v45  ;;  %1440 = vmatpush.bf16.msra.mxu0 %v1291_v49  ;;  %1489 = vmatpush.bf16.msra.mxu1 %v1292_v50  ;;  %v3401_v46 = vpop.permute.xlu2 %440  ;;  %v677_v5 = vmul.f32 %v3286_v60, %v3318_v37  ;;  %v678_v9 = vmul.f32 %v3288_v61, %v3318_v37 }
  0xc5   : > { %4630 = vst [vmem:[#allocation7_spill] sm:$0xff] %v3392_v17  ;;  %1538 = vmatpush.bf16.msra.mxu2 %v1293_v28  ;;  %1587 = vmatpush.bf16.msra.mxu3 %v1294_v51  ;;  %v879_v24 = vmul.f32 %v3310_v20, %v3255_v36  ;;  %v880_v11 = vmul.f32 %v3312_v22, %v3255_v36 }
  0xc6   : > { %4631 = vst [vmem:[#allocation8_spill] sm:$0xff] %v3394_v18  ;;  %2955 = vset.pattern.permute.xlu1 %v3055_v7  ;;  %1837 = vperm.xlu0 %2954, %v2790_v43   ;;  %v881_v23 = vmul.f32 %v3314_v8, %v3255_v36  ;;  %v882_v25 = vmul.f32 %v3316_v26, %v3255_v36 }
  0xc7   : > { %564 = vperm.xlu1 %2955, %v3365_v16   ;;  %v3405_v47 = vpop.permute.xlu0 %395  ;;  %v536_v29 = vmul.f32 %v3275_v55, %v3290_v62  ;;  %v537_v37 = vmul.f32 %v3277_v56, %v3290_v62  ;;  %v538_v33 = vmul.f32 %v3282_v58, %v3290_v62  ;;  %v739_v41 = vadd.f32 %v675_v52, %v535_v63 }
  0xc8   : > { %4632 = vst [vmem:[#allocation9_spill] sm:$0xff] %v3405_v47  ;;  %v679_v31 = vmul.f32 %v3279_v57, %v3336_v48  ;;  %v680_v40 = vmul.f32 %v3284_v59, %v3336_v48  ;;  %v681_v36 = vmul.f32 %v3286_v60, %v3336_v48  ;;  %v682_v44 = vmul.f32 %v3288_v61, %v3336_v48 }
  0xc9   : > { %v740_v39 = vadd.f32 %v676_v2, %v536_v29  ;;  %v741_v35 = vadd.f32 %v677_v5, %v537_v37  ;;  %v742_v49 = vadd.f32 %v678_v9, %v538_v33  ;;  %v539_v50 = vmul.f32 %v3273_v54, %v3246_v32 }
  0xca   : > { %2958 = vset.pattern.permute.xlu2 %v4586_v1  ;;  %v540_v28 = vmul.f32 %v3275_v55, %v3246_v32  ;;  %v541_v51 = vmul.f32 %v3277_v56, %v3246_v32  ;;  %v542_v48 = vmul.f32 %v3282_v58, %v3246_v32  ;;  %v884_v43 = vmul.f32 %v3312_v22, %v3241_v30  ;;  %v2796_v1 = vld [vmem:[%s3191_s19 + $0x138] sm:$0xff] }
  0xcb   : > { %v3421_v10 = vpop.permute.xlu1 %596  ;;  %997 = vperm.xlu2 %2958, %v963_v4   ;;  %v885_v4 = vmul.f32 %v3314_v8, %v3241_v30  ;;  %v886_v52 = vmul.f32 %v3316_v26, %v3241_v30  ;;  %v943_v63 = vadd.f32 %v879_v24, %v739_v41  ;;  %v743_v2 = vadd.f32 %v679_v31, %v539_v50 }
  0xcc   : > { %v744_v5 = vadd.f32 %v680_v40, %v540_v28  ;;  %v745_v9 = vadd.f32 %v681_v36, %v541_v51  ;;  %v945_v29 = vadd.f32 %v881_v23, %v741_v35  ;;  %v946_v37 = vadd.f32 %v882_v25, %v742_v49 }
  0xcd   : > { %v3438_v42 = vpop.permute.xlu2 %588  ;;  %v1103_v32 = vadd.f32 %v3382_v3, %v943_v63  ;;  %v947_v31 = vadd.f32 %v883_v53, %v743_v2 }
  0xce   : > { %1852 = vperm.xlu0 %2954, %v2793_v27   ;;  %v746_v27 = vadd.f32 %v682_v44, %v542_v48  ;;  %v1105_v30 = vadd.f32 %v3382_v3, %v945_v29  ;;  %v1106_v24 = vadd.f32 %v3382_v3, %v946_v37  ;;  %v948_v40 = vadd.f32 %v884_v43, %v744_v5 }
  0xcf   : > { %2957 = vset.pattern.permute.xlu1 %v4588_v0  ;;  %v3449_v62 = vpop.permute.xlu0 %400  ;;  %v949_v36 = vadd.f32 %v885_v4, %v745_v9  ;;  %v1167_v23 = vmul.f32 0.2, %v1103_v32  ;;  %v4634_v4 = vmov 2  }
  0xd0   : > { %4633 = vst [vmem:[#allocation10_spill] sm:$0xff] %v3449_v62  ;;  %768 = vperm.xlu1 %2957, %v3365_v16   ;;  %v944_v16 = vadd.f32 %v880_v11, %v740_v39  ;;  %v950_v44 = vadd.f32 %v886_v52, %v746_v27  ;;  %v1170_v28 = vmul.f32 0.2, %v1106_v24 }
  0xd1   : > { %v1231_v52 = vmax.f32 %v1103_v32, %v1167_v23  ;;  %v667_v23 = vmul.f32 %v3279_v57, %v3362_v13 }
  0xd2   : > { %v1104_v0 = vadd.f32 %v3382_v3, %v944_v16  ;;  %v1169_v3 = vmul.f32 0.2, %v1105_v30  ;;  %v1234_v16 = vmax.f32 %v1106_v24, %v1170_v28  ;;  %v530_v28 = vmul.f32 %v3282_v58, %v3397_v19 }
  0xd3   : > { %2960 = vset.pattern.permute.xlu2 %v3055_v7 }
  0xd4   : > { %v3468_v33 = vpop.permute.xlu1 %800  ;;  %556 = vperm.xlu2 %2960, %v3207_v15   ;;  %v1168_v50 = vmul.f32 0.2, %v1104_v0  ;;  %v1233_v27 = vmax.f32 %v1105_v30, %v1169_v3  ;;  %v4635_v30 = vmov 0   ;;  %v670_v3 = vmul.f32 %v3288_v61, %v3362_v13 }
  0xd6   : > { %v3475_v41 = vpop.permute.xlu2 %1027  ;;  %1867 = vperm.xlu0 %2954, %v2796_v1   ;;  %v2799_v1 = vld [vmem:[%s3191_s19 + $0x150] sm:$0xff]  ;;  %v1232_v9 = vmax.f32 %v1104_v0, %v1168_v50  ;;  %v959_v0 = vld [vmem:[%s3191_s19] sm:$0xff]  ;;  %v2740_v50 = vld [vmem:[%s3191_s19 + $0xf8] sm:$0xff] }
  0xd7   : > { %v1043_v11 = vpop.permute.xlu0 %1042 }
  0xd8   : > { %2959 = vset.pattern.permute.xlu1 %v3055_v7  ;;  %v1107_v25 = vadd.f32 %v1043_v11, %v947_v31  ;;  %v1108_v39 = vadd.f32 %v1043_v11, %v948_v40  ;;  %v1109_v35 = vadd.f32 %v1043_v11, %v949_v36  ;;  %v1110_v49 = vadd.f32 %v1043_v11, %v950_v44  ;;  %v962_v11 = vld [vmem:[%s3191_s19 + $0x18] sm:$0xff] }
  0xd9   : > { %552 = vperm.xlu1 %2959, %v3200_v14  }
  0xda   : > { %v1171_v51 = vmul.f32 0.2, %v1107_v25  ;;  %v1172_v53 = vmul.f32 0.2, %v1108_v39  ;;  %v1173_v48 = vmul.f32 0.2, %v1109_v35 }
  0xdb   : > { %v1174_v43 = vmul.f32 0.2, %v1110_v49 }
  0xdc   : > { %2962 = vset.pattern.permute.xlu2 %v4634_v4  ;;  %v1235_v63 = vmax.f32 %v1107_v25, %v1171_v51  ;;  %v1236_v2 = vmax.f32 %v1108_v39, %v1172_v53  ;;  %v1237_v7 = vmax.f32 %v1109_v35, %v1173_v48  ;;  %v669_v25 = vmul.f32 %v3286_v60, %v3362_v13  ;;  %v2282_v51 = vld [vmem:[%s3504_s14] sm:$0xff] }
  0xdd   : > { %v3481_v5 = vpop.permute.xlu1 %435  ;;  %760 = vperm.xlu2 %2962, %v3207_v15   ;;  %v1238_v29 = vmax.f32 %v1110_v49, %v1174_v43  ;;  %v2802_v15 = vld [vmem:[%s3191_s19 + $0x168] sm:$0xff]  ;;  %v527_v39 = vmul.f32 %v3273_v54, %v3397_v19  ;;  %v528_v35 = vmul.f32 %v3275_v55, %v3397_v19  ;;  %v529_v49 = vmul.f32 %v3277_v56, %v3397_v19 }
  0xde   : > { %v3484_v37 = vpop.permute.xlu2 %425  ;;  %1882 = vperm.xlu0 %2954, %v2799_v1   ;;  %v1287_v31 = vpack.c.bf16 %v1235_v63, %v1231_v52  ;;  %v1288_v40 = vpack.c.bf16 %v1236_v2, %v1232_v9  ;;  %v1289_v32 = vpack.c.bf16 %v1237_v7, %v1233_v27  ;;  %v871_v53 = vmul.f32 %v3310_v20, %v3351_v6  ;;  %v2739_v27 = vld [vmem:[%s3191_s19 + $0xf0] sm:$0xff] }
  0xdf   : > { %v1290_v36 = vpack.c.bf16 %v1238_v29, %v1234_v16  ;;  %v872_v48 = vmul.f32 %v3312_v22, %v3351_v6  ;;  %v873_v43 = vmul.f32 %v3314_v8, %v3351_v6  ;;  %v733_v52 = vadd.f32 %v669_v25, %v529_v49  ;;  %v2285_v25 = vld [vmem:[%s3504_s14 + $0x18] sm:$0xff] }
  0xe0   : > { %1441 = vmatpush.bf16.msra.mxu0 %v1287_v31  ;;  %1490 = vmatpush.bf16.msra.mxu1 %v1288_v40  ;;  %v532_v63 = vmul.f32 %v3275_v55, %v3299_v12  ;;  %v533_v2 = vmul.f32 %v3277_v56, %v3299_v12  ;;  %v874_v7 = vmul.f32 %v3316_v26, %v3351_v6 }
  0xe1   : > { %2961 = vset.pattern.permute.xlu1 %v4634_v4  ;;  %1539 = vmatpush.bf16.msra.mxu2 %v1289_v32  ;;  %v731_v4 = vadd.f32 %v667_v23, %v527_v39  ;;  %v734_v9 = vadd.f32 %v670_v3, %v530_v28  ;;  %v671_v29 = vmul.f32 %v3279_v57, %v3421_v10 }
  0xe2   : > { %756 = vperm.xlu1 %2961, %v3200_v14   ;;  %1588 = vmatpush.bf16.msra.mxu3 %v1290_v36  ;;  %v668_v14 = vmul.f32 %v3284_v59, %v3362_v13  ;;  %v531_v13 = vmul.f32 %v3273_v54, %v3299_v12  ;;  %v672_v31 = vmul.f32 %v3284_v59, %v3421_v10 }
  0xe3   : > { %v673_v40 = vmul.f32 %v3286_v60, %v3421_v10  ;;  %v674_v32 = vmul.f32 %v3288_v61, %v3421_v10  ;;  %v534_v6 = vmul.f32 %v3282_v58, %v3299_v12  ;;  %v935_v36 = vadd.f32 %v871_v53, %v731_v4  ;;  %v2735_v10 = vld [vmem:[%s3191_s19 + $0xd0] sm:$0xff] }
  0xe4   : > { %v732_v1 = vadd.f32 %v668_v14, %v528_v35  ;;  %v877_v23 = vmul.f32 %v3314_v8, %v3468_v33  ;;  %v878_v14 = vmul.f32 %v3316_v26, %v3468_v33  ;;  %v938_v49 = vadd.f32 %v874_v7, %v734_v9 }
  0xe5   : > { %2964 = vset.pattern.permute.xlu2 %v4635_v30  ;;  %v1095_v12 = vadd.f32 %v3475_v41, %v935_v36  ;;  %v736_v3 = vadd.f32 %v672_v31, %v532_v63  ;;  %v737_v28 = vadd.f32 %v673_v40, %v533_v2  ;;  %v514_v17 = vmul.f32 %v3282_v58, %v3484_v37 }
  0xe6   : > { %v3491_v24 = vpop.permute.xlu1 %584  ;;  %977 = vperm.xlu2 %2964, %v959_v0   ;;  %1897 = vperm.xlu0 %2954, %v2802_v15   ;;  %v936_v0 = vadd.f32 %v872_v48, %v732_v1  ;;  %v937_v15 = vadd.f32 %v873_v43, %v733_v52  ;;  %v1098_v53 = vadd.f32 %v3475_v41, %v938_v49 }
  0xe7   : > { %v3493_v44 = vpop.permute.xlu2 %580  ;;  %v941_v4 = vadd.f32 %v877_v23, %v737_v28 }
  0xe8   : > { %v1096_v39 = vadd.f32 %v3475_v41, %v936_v0  ;;  %v1097_v35 = vadd.f32 %v3475_v41, %v937_v15  ;;  %v1162_v41 = vmul.f32 0.2, %v1098_v53 }
  0xea   : > { %2963 = vset.pattern.permute.xlu1 %v4635_v30  ;;  %v875_v30 = vmul.f32 %v3310_v20, %v3468_v33  ;;  %v1160_v36 = vmul.f32 0.2, %v1096_v39  ;;  %v1161_v0 = vmul.f32 0.2, %v1097_v35  ;;  %v1226_v49 = vmax.f32 %v1098_v53, %v1162_v41  ;;  %v2729_v53 = vld [vmem:[%s3191_s19 + $0xa0] sm:$0xff] }
  0xeb   : > { %992 = vperm.xlu1 %2963, %v962_v11   ;;  %v876_v11 = vmul.f32 %v3312_v22, %v3468_v33  ;;  %v2738_v33 = vld [vmem:[%s3191_s19 + $0xe8] sm:$0xff] }
  0xed   : > { %v940_v43 = vadd.f32 %v876_v11, %v736_v3 }
  0xee   : > { %1389 = vperm.xlu2 %2964, %v2740_v50   ;;  %2300 = vperm.xlu0 %2954, %v2282_v51   ;;  %v735_v50 = vadd.f32 %v671_v29, %v531_v13  ;;  %v738_v51 = vadd.f32 %v674_v32, %v534_v6  ;;  %v2734_v29 = vld [vmem:[%s3191_s19 + $0xc8] sm:$0xff]  ;;  %v2288_v6 = vld [vmem:[%s3504_s14 + $0x30] sm:$0xff] }
  0xef   : > { %v3529_v19 = vpop.permute.xlu1 %792 }
  0xf0   : > { %v3538_v16 = vpop.permute.xlu2 %784  ;;  %v939_v48 = vadd.f32 %v875_v30, %v735_v50  ;;  %v942_v1 = vadd.f32 %v878_v14, %v738_v51  ;;  %v1224_v30 = vmax.f32 %v1096_v39, %v1160_v36  ;;  %v520_v36 = vmul.f32 %v3275_v55, %v3481_v5 }
  0xf3   : > { %1384 = vperm.xlu1 %2963, %v2739_v27   ;;  %v1159_v27 = vmul.f32 0.2, %v1095_v12 }
  0xf5   : > { %v1223_v15 = vmax.f32 %v1095_v12, %v1159_v27  ;;  %v659_v12 = vmul.f32 %v3279_v57, %v3491_v24  ;;  %v2291_v27 = vld [vmem:[%s3504_s14 + $0x48] sm:$0xff] }
  0xf6   : > { %1364 = vperm.xlu2 %2964, %v2735_v10   ;;  %2315 = vperm.xlu0 %2954, %v2285_v25   ;;  %v1225_v10 = vmax.f32 %v1097_v35, %v1161_v0  ;;  %v431_v35 = vpop.permute.xlu0 %430  ;;  %v521_v0 = vmul.f32 %v3277_v56, %v3481_v5 }
  0xf8   : > { %v1033_v52 = vpop.permute.xlu1 %1032 }
  0xf9   : > { %v3565_v7 = vpop.permute.xlu2 %415  ;;  %v1099_v13 = vadd.f32 %v1033_v52, %v939_v48  ;;  %v1100_v63 = vadd.f32 %v1033_v52, %v940_v43  ;;  %v1101_v2 = vadd.f32 %v1033_v52, %v941_v4  ;;  %v1102_v9 = vadd.f32 %v1033_v52, %v942_v1 }
  0xfa   : > { %v519_v4 = vmul.f32 %v3273_v54, %v3481_v5  ;;  %v660_v1 = vmul.f32 %v3284_v59, %v3491_v24  ;;  %v661_v52 = vmul.f32 %v3286_v60, %v3491_v24 }
  0xfb   : > { %1379 = vperm.xlu1 %2963, %v2738_v33   ;;  %v1163_v31 = vmul.f32 0.2, %v1099_v13  ;;  %v1164_v40 = vmul.f32 0.2, %v1100_v63  ;;  %v1165_v32 = vmul.f32 0.2, %v1101_v2 }
  0xfc   : > { %v1166_v11 = vmul.f32 0.2, %v1102_v9  ;;  %v2733_v33 = vld [vmem:[%s3191_s19 + $0xc0] sm:$0xff]  ;;  %v725_v41 = vadd.f32 %v661_v52, %v521_v0  ;;  %v870_v0 = vmul.f32 %v3316_v26, %v3529_v19 }
  0xfd   : > { %v1227_v23 = vmax.f32 %v1099_v13, %v1163_v31  ;;  %v1228_v14 = vmax.f32 %v1100_v63, %v1164_v40  ;;  %v1229_v25 = vmax.f32 %v1101_v2, %v1165_v32  ;;  %v662_v13 = vmul.f32 %v3288_v61, %v3491_v24  ;;  %v2732_v31 = vld [vmem:[%s3191_s19 + $0xb8] sm:$0xff] }
  0xfe   : > { %1359 = vperm.xlu2 %2964, %v2734_v29   ;;  %v1230_v50 = vmax.f32 %v1102_v9, %v1166_v11  ;;  %2330 = vperm.xlu0 %2954, %v2288_v6   ;;  %v723_v63 = vadd.f32 %v659_v12, %v519_v4  ;;  %v863_v2 = vmul.f32 %v3310_v20, %v3250_v34 }
  0xff   : > { %v1283_v3 = vpack.c.bf16 %v1227_v23, %v1223_v15  ;;  %v1284_v28 = vpack.c.bf16 %v1228_v14, %v1224_v30  ;;  %v1285_v51 = vpack.c.bf16 %v1229_v25, %v1225_v10  ;;  %v522_v9 = vmul.f32 %v3282_v58, %v3481_v5 }
 0x100   : > { %v1286_v48 = vpack.c.bf16 %v1230_v50, %v1226_v49  ;;  %v724_v29 = vadd.f32 %v660_v1, %v520_v36  ;;  %v864_v40 = vmul.f32 %v3312_v22, %v3250_v34  ;;  %v865_v24 = vmul.f32 %v3314_v8, %v3250_v34  ;;  %v2294_v50 = vld [vmem:[%s3504_s14 + $0x60] sm:$0xff] }
 0x101   : > { %v3570_v43 = vpop.permute.xlu1 %576  ;;  %1442 = vmatpush.bf16.msra.mxu0 %v1283_v3  ;;  %1491 = vmatpush.bf16.msra.mxu1 %v1284_v28  ;;  %v866_v32 = vmul.f32 %v3316_v26, %v3250_v34  ;;  %v726_v6 = vadd.f32 %v662_v13, %v522_v9  ;;  %v927_v30 = vadd.f32 %v863_v2, %v723_v63  ;;  %v2728_v34 = vld [vmem:[%s3191_s19 + $0x98] sm:$0xff]  ;;  %v2727_v63 = vld [vmem:[%s3191_s19 + $0x90] sm:$0xff] }
 0x102   : > { %1540 = vmatpush.bf16.msra.mxu2 %v1285_v51  ;;  %v3574_v39 = vpop.permute.xlu2 %572  ;;  %1589 = vmatpush.bf16.msra.mxu3 %v1286_v48  ;;  %v3605_v5 = vmul.f32 %v3310_v20, %v3262_v38  ;;  %v3609_v11 = vmul.f32 %v3312_v22, %v3262_v38  ;;  %v523_v23 = vmul.f32 %v3273_v54, %v3401_v46 }
 0x103   : > { %1354 = vperm.xlu1 %2963, %v2733_v33   ;;  %v524_v14 = vmul.f32 %v3275_v55, %v3401_v46  ;;  %v663_v10 = vmul.f32 %v3279_v57, %v3438_v42  ;;  %v664_v25 = vmul.f32 %v3284_v59, %v3438_v42  ;;  %v928_v3 = vadd.f32 %v864_v40, %v724_v29 }
 0x104   : > { %v929_v28 = vadd.f32 %v865_v24, %v725_v41  ;;  %v525_v51 = vmul.f32 %v3277_v56, %v3401_v46  ;;  %v526_v33 = vmul.f32 %v3282_v58, %v3401_v46  ;;  %v665_v48 = vmul.f32 %v3286_v60, %v3438_v42 }
 0x105   : > { %v666_v12 = vmul.f32 %v3288_v61, %v3438_v42  ;;  %v3633_v4 = vmul.f32 %v3314_v8, %v3262_v38  ;;  %v3637_v1 = vmul.f32 %v3316_v26, %v3262_v38  ;;  %v930_v46 = vadd.f32 %v866_v32, %v726_v6 }
 0x106   : > { %1334 = vperm.xlu2 %2964, %v2729_v53   ;;  %2345 = vperm.xlu0 %2954, %v2291_v27   ;;  %v1018_v53 = vpop.permute.xlu0 %1017  ;;  %v867_v27 = vmul.f32 %v3310_v20, %v3529_v19  ;;  %v868_v36 = vmul.f32 %v3312_v22, %v3529_v19  ;;  %v869_v42 = vmul.f32 %v3314_v8, %v3529_v19 }
 0x107   : > { %v3639_v52 = vadd.f32 %v1018_v53, %v927_v30  ;;  %v727_v38 = vadd.f32 %v663_v10, %v523_v23  ;;  %v728_v13 = vadd.f32 %v664_v25, %v524_v14  ;;  %v1088_v2 = vadd.f32 %v1018_v53, %v928_v3  ;;  %v2789_v23 = vld [vmem:[%s3191_s19 + $0x100] sm:$0xff] }
 0x108   : > { %v1089_v9 = vadd.f32 %v1018_v53, %v929_v28  ;;  %v729_v29 = vadd.f32 %v665_v48, %v525_v51  ;;  %v730_v41 = vadd.f32 %v666_v12, %v526_v33  ;;  %v516_v40 = vmul.f32 %v3275_v55, %v431_v35  ;;  %v2297_v28 = vld [vmem:[%s3504_s14 + $0x78] sm:$0xff] }
 0x109   : > { %v517_v24 = vmul.f32 %v3277_v56, %v431_v35  ;;  %v518_v32 = vmul.f32 %v3282_v58, %v431_v35  ;;  %v1151_v19 = vmul.f32 0.2, %v3639_v52  ;;  %v1090_v6 = vadd.f32 %v1018_v53, %v930_v46 }
 0x10a   : > { %v3601_v15 = vpop.permute.xlu1 %780  ;;  %v931_v14 = vadd.f32 %v867_v27, %v727_v38  ;;  %v933_v10 = vadd.f32 %v869_v42, %v729_v29  ;;  %v934_v25 = vadd.f32 %v870_v0, %v730_v41  ;;  %v512_v3 = vmul.f32 %v3275_v55, %v3484_v37 }
 0x10b   : > { %1349 = vperm.xlu1 %2963, %v2732_v31   ;;  %v3620_v49 = vpop.permute.xlu2 %1007  ;;  %v515_v31 = vmul.f32 %v3273_v54, %v431_v35  ;;  %v1152_v51 = vmul.f32 0.2, %v1088_v2  ;;  %v1153_v33 = vmul.f32 0.2, %v1089_v9  ;;  %v3663_v46 = vmul.f32 %v3277_v56, %v3484_v37 }
 0x10c   : > { %v655_v27 = vmul.f32 %v3279_v57, %v3493_v44  ;;  %v1154_v0 = vmul.f32 0.2, %v1090_v6  ;;  %v657_v38 = vmul.f32 %v3286_v60, %v3493_v44  ;;  %v658_v41 = vmul.f32 %v3288_v61, %v3493_v44 }
 0x10d   : > { %v651_v21 = vmul.f32 %v3279_v57, %v3570_v43 }
 0x10e   : > { %1329 = vperm.xlu2 %2964, %v2728_v34   ;;  %2360 = vperm.xlu0 %2954, %v2294_v50   ;;  %v932_v34 = vadd.f32 %v868_v36, %v728_v13  ;;  %v511_v50 = vmul.f32 %v3273_v54, %v3484_v37  ;;  %v656_v36 = vmul.f32 %v3284_v59, %v3493_v44 }
 0x10f   : > { %v719_v45 = vadd.f32 %v655_v27, %v515_v31 }
 0x110   : > { %v715_v27 = vadd.f32 %v651_v21, %v511_v50  ;;  %v647_v21 = vmul.f32 %v3279_v57, %v3574_v39 }
 0x113   : > { %1324 = vperm.xlu1 %2963, %v2727_v63   ;;  %v1023_v30 = vpop.permute.xlu1 %1022  ;;  %v3669_v42 = vpop.permute.xlu2 %410 }
 0x114   : > { %v1091_v35 = vadd.f32 %v1023_v30, %v931_v14  ;;  %v1092_v48 = vadd.f32 %v1023_v30, %v932_v34  ;;  %v1093_v12 = vadd.f32 %v1023_v30, %v933_v10  ;;  %v1094_v53 = vadd.f32 %v1023_v30, %v934_v25  ;;  %4636 = vst [vmem:[#allocation11_spill] sm:$0xff] %v3669_v42  ;;  %v2726_v30 = vld [vmem:[%s3191_s19 + $0x88] sm:$0xff] }
 0x115   : > { %v1215_v14 = vmax.f32 %v3639_v52, %v1151_v19  ;;  %v1216_v34 = vmax.f32 %v1088_v2, %v1152_v51  ;;  %v1217_v42 = vmax.f32 %v1089_v9, %v1153_v33  ;;  %v3681_v2 = vadd.f32 %v656_v36, %v516_v40  ;;  %v421_v9 = vpop.permute.xlu0 %420  ;;  %v2792_v40 = vld [vmem:[%s3191_s19 + $0x118] sm:$0xff] }
 0x116   : > { %1832 = vperm.xlu2 %2964, %v2789_v23   ;;  %2375 = vperm.xlu0 %2954, %v2297_v28   ;;  %v1155_v13 = vmul.f32 0.2, %v1091_v35  ;;  %v1156_v63 = vmul.f32 0.2, %v1092_v48  ;;  %v1157_v29 = vmul.f32 0.2, %v1093_v12  ;;  %v1218_v28 = vmax.f32 %v1090_v6, %v1154_v0 }
 0x117   : > { %v1158_v10 = vmul.f32 0.2, %v1094_v53  ;;  %v3683_v19 = vadd.f32 %v657_v38, %v517_v24  ;;  %v652_v51 = vmul.f32 %v3284_v59, %v3570_v43  ;;  %v3687_v6 = vadd.f32 %v658_v41, %v518_v32 }
 0x118   : > { %v1219_v25 = vmax.f32 %v1091_v35, %v1155_v13  ;;  %v1220_v18 = vmax.f32 %v1092_v48, %v1156_v63  ;;  %v1221_v23 = vmax.f32 %v1093_v12, %v1157_v29  ;;  %v507_v33 = vmul.f32 %v3273_v54, %v421_v9  ;;  %v2791_v13 = vld [vmem:[%s3191_s19 + $0x110] sm:$0xff] }
 0x119   : > { %v1222_v62 = vmax.f32 %v1094_v53, %v1158_v10  ;;  %v508_v35 = vmul.f32 %v3275_v55, %v421_v9  ;;  %v859_v24 = vmul.f32 %v3310_v20, %v3538_v16  ;;  %v653_v48 = vmul.f32 %v3286_v60, %v3570_v43 }
 0x11a   : > { %v1279_v44 = vpack.c.bf16 %v1219_v25, %v1215_v14  ;;  %v1280_v47 = vpack.c.bf16 %v1220_v18, %v1216_v34  ;;  %v1281_v52 = vpack.c.bf16 %v1221_v23, %v1217_v42  ;;  %v855_v18 = vmul.f32 %v3310_v20, %v3601_v15 }
 0x11b   : > { %1319 = vperm.xlu1 %2963, %v2726_v30   ;;  %v1282_v31 = vpack.c.bf16 %v1222_v62, %v1218_v28  ;;  %v856_v62 = vmul.f32 %v3312_v22, %v3601_v15  ;;  %v509_v32 = vmul.f32 %v3277_v56, %v421_v9  ;;  %v510_v12 = vmul.f32 %v3282_v58, %v421_v9 }
 0x11c   : > { %v569_v37 = vpop.permute.xlu1 %568  ;;  %1443 = vmatpush.bf16.msra.mxu0 %v1279_v44  ;;  %1492 = vmatpush.bf16.msra.mxu1 %v1280_v47  ;;  %v654_v53 = vmul.f32 %v3288_v61, %v3570_v43  ;;  %v860_v36 = vmul.f32 %v3312_v22, %v3538_v16  ;;  %v861_v42 = vmul.f32 %v3314_v8, %v3538_v16  ;;  %v3710_v38 = vpop.permute.xlu2 %764 }
 0x11d   : > { %1541 = vmatpush.bf16.msra.mxu2 %v1281_v52  ;;  %1590 = vmatpush.bf16.msra.mxu3 %v1282_v31  ;;  %v716_v0 = vadd.f32 %v652_v51, %v512_v3  ;;  %v857_v47 = vmul.f32 %v3314_v8, %v3601_v15  ;;  %v862_v63 = vmul.f32 %v3316_v26, %v3538_v16  ;;  %v2795_v52 = vld [vmem:[%s3191_s19 + $0x130] sm:$0xff] }
 0x11e   : > { %1847 = vperm.xlu2 %2964, %v2792_v40   ;;  %v858_v43 = vmul.f32 %v3316_v26, %v3601_v15  ;;  %v919_v50 = vadd.f32 %v855_v18, %v715_v27  ;;  %v503_v3 = vmul.f32 %v3273_v54, %v3565_v7  ;;  %v717_v29 = vadd.f32 %v653_v48, %v3663_v46 }
 0x11f   : > { %v3722_v41 = vadd.f32 %v859_v24, %v719_v45  ;;  %v920_v30 = vadd.f32 %v856_v62, %v716_v0  ;;  %v504_v14 = vmul.f32 %v3275_v55, %v3565_v7  ;;  %v505_v16 = vmul.f32 %v3277_v56, %v3565_v7  ;;  %v2794_v0 = vld [vmem:[%s3191_s19 + $0x128] sm:$0xff] }
 0x120   : > { %v718_v34 = vadd.f32 %v654_v53, %v514_v17  ;;  %v643_v10 = vmul.f32 %v3279_v57, %v569_v37  ;;  %v648_v15 = vmul.f32 %v3284_v59, %v3574_v39  ;;  %v649_v25 = vmul.f32 %v3286_v60, %v3574_v39 }
 0x121   : > { %v650_v45 = vmul.f32 %v3288_v61, %v3574_v39  ;;  %v921_v46 = vadd.f32 %v857_v47, %v717_v29  ;;  %v711_v23 = vadd.f32 %v647_v21, %v507_v33  ;;  %v644_v28 = vmul.f32 %v3284_v59, %v569_v37 }
 0x122   : > { %v3738_v17 = vadd.f32 %v3620_v49, %v919_v50  ;;  %v922_v9 = vadd.f32 %v858_v43, %v718_v34  ;;  %v645_v51 = vmul.f32 %v3286_v60, %v569_v37  ;;  %v646_v31 = vmul.f32 %v3288_v61, %v569_v37 }
 0x123   : > { %1842 = vperm.xlu1 %2963, %v2791_v13   ;;  %v3744_v40 = vadd.f32 %v3620_v49, %v920_v30  ;;  %v707_v39 = vadd.f32 %v643_v10, %v503_v3  ;;  %v506_v62 = vmul.f32 %v3282_v58, %v3565_v7  ;;  %v712_v53 = vadd.f32 %v648_v15, %v508_v35 }
 0x124   : > { %v713_v27 = vadd.f32 %v649_v25, %v509_v32  ;;  %v3753_v37 = vadd.f32 %v3620_v49, %v921_v46  ;;  %v714_v47 = vadd.f32 %v650_v45, %v510_v12  ;;  %v708_v13 = vadd.f32 %v644_v28, %v504_v14  ;;  %v1003_v12 = vpop.permute.xlu0 %1002  ;;  %v2798_v25 = vld [vmem:[%s3191_s19 + $0x148] sm:$0xff] }
 0x125   : > { %v777_v44 = vpop.permute.xlu1 %776  ;;  %v3756_v21 = vadd.f32 %v3620_v49, %v922_v9  ;;  %v709_v50 = vadd.f32 %v645_v51, %v505_v16  ;;  %v710_v3 = vadd.f32 %v646_v31, %v506_v62  ;;  %v998_v29 = vpop.permute.xlu2 %997  ;;  %v1143_v30 = vmul.f32 0.2, %v3738_v17  ;;  %v2797_v9 = vld [vmem:[%s3191_s19 + $0x140] sm:$0xff] }
 0x126   : > { %v851_v18 = vmul.f32 %v3310_v20, %v777_v44  ;;  %v852_v33 = vmul.f32 %v3312_v22, %v777_v44  ;;  %v853_v24 = vmul.f32 %v3314_v8, %v777_v44  ;;  %v854_v48 = vmul.f32 %v3316_v26, %v777_v44  ;;  %1862 = vperm.xlu2 %2964, %v2795_v52  }
 0x127   : > { %v1144_v7 = vmul.f32 0.2, %v3744_v40  ;;  %v911_v35 = vadd.f32 %v3605_v5, %v707_v39  ;;  %v924_v14 = vadd.f32 %v860_v36, %v3681_v2  ;;  %v925_v49 = vadd.f32 %v861_v42, %v3683_v19 }
 0x128   : > { %v915_v43 = vadd.f32 %v851_v18, %v711_v23  ;;  %v916_v32 = vadd.f32 %v852_v33, %v712_v53  ;;  %v917_v34 = vadd.f32 %v853_v24, %v713_v27  ;;  %v918_v10 = vadd.f32 %v854_v48, %v714_v47 }
 0x129   : > { %v1145_v15 = vmul.f32 0.2, %v3753_v37  ;;  %v926_v16 = vadd.f32 %v862_v63, %v3687_v6  ;;  %v1146_v45 = vmul.f32 0.2, %v3756_v21  ;;  %v1071_v46 = vadd.f32 %v998_v29, %v911_v35 }
 0x12a   : > { %v1075_v23 = vadd.f32 %v1003_v12, %v915_v43  ;;  %v912_v5 = vadd.f32 %v3609_v11, %v708_v13  ;;  %v1207_v44 = vmax.f32 %v3738_v17, %v1143_v30  ;;  %v1208_v52 = vmax.f32 %v3744_v40, %v1144_v7 }
 0x12b   : > { %1857 = vperm.xlu1 %2963, %v2794_v0   ;;  %v913_v2 = vadd.f32 %v3633_v4, %v709_v50  ;;  %v914_v19 = vadd.f32 %v3637_v1, %v710_v3  ;;  %v1076_v42 = vadd.f32 %v1003_v12, %v916_v32  ;;  %v1077_v6 = vadd.f32 %v1003_v12, %v917_v34 }
 0x12c   : > { %v1072_v36 = vadd.f32 %v998_v29, %v912_v5  ;;  %v1078_v63 = vadd.f32 %v1003_v12, %v918_v10  ;;  %v1135_v39 = vmul.f32 0.2, %v1071_v46  ;;  %v1139_v17 = vmul.f32 0.2, %v1075_v23 }
 0x12d   : > { %v1073_v33 = vadd.f32 %v998_v29, %v913_v2  ;;  %v1074_v40 = vadd.f32 %v998_v29, %v914_v19  ;;  %v1209_v1 = vmax.f32 %v3753_v37, %v1145_v15  ;;  %v1210_v53 = vmax.f32 %v3756_v21, %v1146_v45  ;;  %v2800_v21 = vld [vmem:[%s3191_s19 + $0x158] sm:$0xff]  ;;  %v2803_v19 = vld [vmem:[%s3191_s19 + $0x170] sm:$0xff] }
 0x12e   : > { %v1013_v28 = vpop.permute.xlu1 %1012  ;;  %1877 = vperm.xlu2 %2964, %v2798_v25   ;;  %v1140_v27 = vmul.f32 0.2, %v1076_v42  ;;  %v1141_v0 = vmul.f32 0.2, %v1077_v6  ;;  %v1142_v50 = vmul.f32 0.2, %v1078_v63  ;;  %v1203_v37 = vmax.f32 %v1075_v23, %v1139_v17  ;;  %v557_v2 = vpop.permute.xlu2 %556 }
 0x12f   : > { %v1083_v51 = vadd.f32 %v1013_v28, %v3722_v41  ;;  %v1084_v31 = vadd.f32 %v1013_v28, %v924_v14  ;;  %v1085_v11 = vadd.f32 %v1013_v28, %v925_v49  ;;  %v1086_v18 = vadd.f32 %v1013_v28, %v926_v16  ;;  %v2801_v41 = vld [vmem:[%s3191_s19 + $0x160] sm:$0xff] }
 0x130   : > { %v1136_v30 = vmul.f32 0.2, %v1072_v36  ;;  %v1137_v29 = vmul.f32 0.2, %v1073_v33  ;;  %v1138_v7 = vmul.f32 0.2, %v1074_v40  ;;  %v1204_v12 = vmax.f32 %v1076_v42, %v1140_v27 }
 0x131   : > { %v1147_v24 = vmul.f32 0.2, %v1083_v51  ;;  %v1148_v4 = vmul.f32 0.2, %v1084_v31  ;;  %v1149_v48 = vmul.f32 0.2, %v1085_v11  ;;  %v1205_v14 = vmax.f32 %v1077_v6, %v1141_v0 }
 0x132   : > { %v1150_v62 = vmul.f32 0.2, %v1086_v18  ;;  %v1199_v49 = vmax.f32 %v1071_v46, %v1135_v39  ;;  %v1206_v15 = vmax.f32 %v1078_v63, %v1142_v50  ;;  %v1200_v25 = vmax.f32 %v1072_v36, %v1136_v30  ;;  %v2804_v46 = vld [vmem:[%s3191_s19 + $0x178] sm:$0xff]  ;;  %v4638_v39 = vld [vmem:[#allocation5_spill] sm:$0xff]  ;;  %v4642_v30 = vld [vmem:[#allocation8_spill] sm:$0xff]  ;;  %s373_s19 = scalar_lea.vmem %s4584_s5, %s3151_s11  ;;  %s338_s11 = sand.u32 1, %s3035_s22  }
 0x133   : > { %1872 = vperm.xlu1 %2963, %v2797_v9   ;;  %v1211_v47 = vmax.f32 %v1083_v51, %v1147_v24  ;;  %v1212_v13 = vmax.f32 %v1084_v31, %v1148_v4  ;;  %v1213_v43 = vmax.f32 %v1085_v11, %v1149_v48  ;;  %v1201_v45 = vmax.f32 %v1073_v33, %v1137_v29  ;;  %v2284_v51 = vld [vmem:[%s3504_s14 + $0x10] sm:$0xff]  ;;  %v4637_v31 = vld [vmem:[#allocation9_spill] sm:$0xff]  ;;  %v988_v48 = vpop.permute.xlu0 %987  ;;  %v4641_v50 = vld [vmem:[#allocation7_spill] sm:$0xff]  ;;  %s2715_s20 = sshll.u32 %s338_s11, 2  ;;  %s2561_s24 = scalar_lea.sflag [#allocation3], %s338_s11 }
 0x134   : > { %v1214_v3 = vmax.f32 %v1086_v18, %v1150_v62  ;;  %v1271_v5 = vpack.c.bf16 %v1203_v37, %v1199_v49  ;;  %v1202_v28 = vmax.f32 %v1074_v40, %v1138_v7  ;;  %v1272_v23 = vpack.c.bf16 %v1204_v12, %v1200_v25  ;;  %s340_s13 = scalar_lea.vmem [#allocation2], %s2715_s20 }
 0x135   : > { %v1275_v35 = vpack.c.bf16 %v1211_v47, %v1207_v44  ;;  %v1276_v32 = vpack.c.bf16 %v1212_v13, %v1208_v52  ;;  %v1277_v34 = vpack.c.bf16 %v1213_v43, %v1209_v1  ;;  %v1273_v44 = vpack.c.bf16 %v1205_v14, %v1201_v45  ;;  %v4640_v13 = vld [vmem:[#allocation6_spill] sm:$0xff] }
 0x136   : > { %v1278_v10 = vpack.c.bf16 %v1214_v3, %v1210_v53  ;;  %1892 = vperm.xlu2 %2964, %v2801_v41   ;;  %v1274_v52 = vpack.c.bf16 %v1206_v15, %v1202_v28  ;;  %v839_v36 = vmul.f32 %v3310_v20, %v3710_v38  ;;  %v840_v6 = vmul.f32 %v3312_v22, %v3710_v38  ;;  %v2283_v41 = vld [vmem:[%s3504_s14 + $0x8] sm:$0xff] }
 0x137   : > { %1444 = vmatpush.bf16.msra.mxu0 %v1275_v35  ;;  %1493 = vmatpush.bf16.msra.mxu1 %v1276_v32  ;;  %v841_v63 = vmul.f32 %v3314_v8, %v3710_v38  ;;  %v842_v9 = vmul.f32 %v3316_v26, %v3710_v38  ;;  %v3795_v11 = vmul.f32 %v3273_v54, %v4637_v31  ;;  %v4639_v38 = vld [vmem:[#allocation10_spill] sm:$0xff]  ;;  %v761_v1 = vpop.permute.xlu2 %760 }
 0x138   : > { %1542 = vmatpush.bf16.msra.mxu2 %v1277_v34  ;;  %1591 = vmatpush.bf16.msra.mxu3 %v1278_v10  ;;  %v3799_v18 = vmul.f32 %v3275_v55, %v4637_v31  ;;  %v903_v17 = vadd.f32 %v839_v36, %v4638_v39  ;;  %v3804_v33 = vmul.f32 %v3277_v56, %v4637_v31  ;;  %v4643_v10 = vld [vmem:[#allocation11_spill] sm:$0xff] }
 0x139   : > { %v3778_v16 = vpop.permute.xlu1 %564  ;;  %v3808_v40 = vmul.f32 %v3282_v58, %v4637_v31  ;;  %v491_v24 = vmul.f32 %v3273_v54, %v4639_v38  ;;  %v492_v4 = vmul.f32 %v3275_v55, %v4639_v38  ;;  %v493_v62 = vmul.f32 %v3277_v56, %v4639_v38 }
 0x13a   : > { %v631_v53 = vmul.f32 %v3279_v57, %v557_v2  ;;  %v632_v27 = vmul.f32 %v3284_v59, %v557_v2  ;;  %v633_v0 = vmul.f32 %v3286_v60, %v557_v2  ;;  %v634_v47 = vmul.f32 %v3288_v61, %v557_v2 }
 0x13b   : > { %1887 = vperm.xlu1 %2963, %v2800_v21   ;;  %1445 = vmatpush.bf16.msra.mxu0 %v1271_v5  ;;  %v904_v43 = vadd.f32 %v840_v6, %v4640_v13  ;;  %v905_v3 = vadd.f32 %v841_v63, %v4641_v50  ;;  %v906_v29 = vadd.f32 %v842_v9, %v4642_v30 }
 0x13c   : > { %1494 = vmatpush.bf16.msra.mxu1 %v1272_v23  ;;  %1543 = vmatpush.bf16.msra.mxu2 %v1273_v44  ;;  %v835_v7 = vmul.f32 %v3310_v20, %v761_v1  ;;  %v836_v35 = vmul.f32 %v3312_v22, %v761_v1  ;;  %v837_v32 = vmul.f32 %v3314_v8, %v761_v1  ;;  %v2287_v23 = vld [vmem:[%s3504_s14 + $0x28] sm:$0xff] }
 0x13d   : > { %1592 = vmatpush.bf16.msra.mxu3 %v1274_v52  ;;  %v3827_v34 = vadd.f32 %v988_v48, %v903_v17  ;;  %v494_v37 = vmul.f32 %v3282_v58, %v4639_v38  ;;  %v499_v12 = vmul.f32 %v3273_v54, %v4643_v10  ;;  %v500_v14 = vmul.f32 %v3275_v55, %v4643_v10  ;;  %v2286_v17 = vld [vmem:[%s3504_s14 + $0x20] sm:$0xff]  ;;  %v983_v38 = vpop.permute.xlu0 %982 }
 0x13e   : > { %1907 = vperm.xlu2 %2964, %v2804_v46   ;;  %v838_v21 = vmul.f32 %v3316_v26, %v761_v1  ;;  %v501_v15 = vmul.f32 %v3277_v56, %v4643_v10  ;;  %v695_v25 = vadd.f32 %v631_v53, %v491_v24  ;;  %v696_v45 = vadd.f32 %v632_v27, %v492_v4 }
 0x13f   : > { %v697_v5 = vadd.f32 %v633_v0, %v493_v62  ;;  %v698_v28 = vadd.f32 %v634_v47, %v494_v37  ;;  %v3839_v44 = vadd.f32 %v988_v48, %v904_v43  ;;  %v3841_v52 = vadd.f32 %v988_v48, %v905_v3 }
 0x140   : > { %v3843_v54 = vadd.f32 %v988_v48, %v906_v29  ;;  %v3846_v55 = vmul.f32 0.2, %v3827_v34  ;;  %v899_v2 = vadd.f32 %v835_v7, %v695_v25  ;;  %v900_v46 = vadd.f32 %v836_v35, %v696_v45  ;;  %v2290_v29 = vld [vmem:[%s3504_s14 + $0x40] sm:$0xff] }
 0x141   : > { %v639_v56 = vmul.f32 %v3279_v57, %v3778_v16  ;;  %v640_v36 = vmul.f32 %v3284_v59, %v3778_v16  ;;  %v641_v6 = vmul.f32 %v3286_v60, %v3778_v16  ;;  %v902_v63 = vadd.f32 %v838_v21, %v698_v28  ;;  %v978_v21 = vpop.permute.xlu2 %977 }
 0x142   : > { %v3784_v42 = vpop.permute.xlu1 %768  ;;  %v502_v24 = vmul.f32 %v3282_v58, %v4643_v10  ;;  %v3862_v4 = vmul.f32 0.2, %v3839_v44  ;;  %v3865_v48 = vmul.f32 0.2, %v3841_v52  ;;  %v1060_v1 = vadd.f32 %v983_v38, %v900_v46 }
 0x143   : > { %1902 = vperm.xlu1 %2963, %v2803_v19   ;;  %v901_v19 = vadd.f32 %v837_v32, %v697_v5  ;;  %v703_v53 = vadd.f32 %v639_v56, %v499_v12  ;;  %v704_v27 = vadd.f32 %v640_v36, %v500_v14  ;;  %v705_v0 = vadd.f32 %v641_v6, %v501_v15 }
 0x144   : > { %v3872_v58 = vadd.f32 %v983_v38, %v902_v63  ;;  %v844_v10 = vmul.f32 %v3312_v22, %v3784_v42  ;;  %v845_v12 = vmul.f32 %v3314_v8, %v3784_v42  ;;  %v846_v14 = vmul.f32 %v3316_v26, %v3784_v42 }
 0x145   : > { %v1061_v62 = vadd.f32 %v983_v38, %v901_v19 }
 0x146   : > { %2310 = vperm.xlu2 %2964, %v2284_v51   ;;  %v909_v56 = vadd.f32 %v845_v12, %v705_v0 }
 0x147   : > { %v1125_v35 = vmul.f32 0.2, %v1061_v62 }
 0x14b   : > { %2305 = vperm.xlu1 %2963, %v2283_v41   ;;  %v553_v49 = vpop.permute.xlu1 %552 }
 0x14c   : > { %v627_v9 = vmul.f32 %v3279_v57, %v553_v49  ;;  %v628_v51 = vmul.f32 %v3284_v59, %v553_v49  ;;  %v629_v31 = vmul.f32 %v3286_v60, %v553_v49  ;;  %v630_v39 = vmul.f32 %v3288_v61, %v553_v49  ;;  %v2289_v49 = vld [vmem:[%s3504_s14 + $0x38] sm:$0xff] }
 0x14d   : > { %v3868_v57 = vmul.f32 0.2, %v3843_v54  ;;  %v642_v59 = vmul.f32 %v3288_v61, %v3778_v16  ;;  %v1059_v60 = vadd.f32 %v983_v38, %v899_v2 }
 0x14e   : > { %2325 = vperm.xlu2 %2964, %v2287_v23   ;;  %v691_v41 = vadd.f32 %v627_v9, %v3795_v11  ;;  %v692_v47 = vadd.f32 %v628_v51, %v3799_v18  ;;  %v693_v13 = vadd.f32 %v629_v31, %v3804_v33  ;;  %v694_v43 = vadd.f32 %v630_v39, %v3808_v40  ;;  %v2293_v9 = vld [vmem:[%s3504_s14 + $0x58] sm:$0xff] }
 0x14f   : > { %v843_v11 = vmul.f32 %v3310_v20, %v3784_v42  ;;  %v1123_v7 = vmul.f32 0.2, %v1059_v60  ;;  %v1124_v18 = vmul.f32 0.2, %v1060_v1  ;;  %v706_v28 = vadd.f32 %v642_v59, %v502_v24 }
 0x150   : > { %v908_v42 = vadd.f32 %v844_v10, %v704_v27  ;;  %v2852_v10 = vld [vmem:[%s3909_s17 + $0x38] sm:$0xff] }
 0x151   : > { %v1187_v23 = vmax.f32 %v1059_v60, %v1123_v7  ;;  %v1188_v2 = vmax.f32 %v1060_v1, %v1124_v18  ;;  %v907_v46 = vadd.f32 %v843_v11, %v703_v53  ;;  %v910_v36 = vadd.f32 %v846_v14, %v706_v28  ;;  %v2292_v1 = vld [vmem:[%s3504_s14 + $0x50] sm:$0xff] }
 0x152   : > { %v1194_v11 = vmax.f32 %v3843_v54, %v3868_v57  ;;  %v2526_v54 = vld [vmem:[%s373_s19] sm:$0x1]  ;;  %v2848_v57 = vld [vmem:[%s3909_s17 + $0x18] sm:$0xff]  ;;  %s2993_s19 = scalar_lea.hbm %s4585_s6, 8 }
 0x153   : > { %2320 = vperm.xlu1 %2963, %v2286_v17  }
 0x154   : > { %v757_v50 = vpop.permute.xlu1 %756 }
 0x155   : > { %v831_v61 = vmul.f32 %v3310_v20, %v757_v50  ;;  %v832_v16 = vmul.f32 %v3312_v22, %v757_v50  ;;  %v833_v3 = vmul.f32 %v3314_v8, %v757_v50  ;;  %v834_v30 = vmul.f32 %v3316_v26, %v757_v50 }
 0x156   : > { %2340 = vperm.xlu2 %2964, %v2290_v29   ;;  %v1126_v20 = vmul.f32 0.2, %v3872_v58  ;;  %v1189_v22 = vmax.f32 %v1061_v62, %v1125_v35 }
 0x157   : > { %v895_v33 = vadd.f32 %v831_v61, %v691_v41  ;;  %v896_v32 = vadd.f32 %v832_v16, %v692_v47  ;;  %v897_v40 = vadd.f32 %v833_v3, %v693_v13  ;;  %v898_v37 = vadd.f32 %v834_v30, %v694_v43 }
 0x158   : > { %v1190_v17 = vmax.f32 %v3872_v58, %v1126_v20  ;;  %v1191_v43 = vmax.f32 %v3827_v34, %v3846_v55  ;;  %v1192_v58 = vmax.f32 %v3839_v44, %v3862_v4  ;;  %v1193_v30 = vmax.f32 %v3841_v52, %v3865_v48  ;;  %v2295_v44 = vld [vmem:[%s3504_s14 + $0x68] sm:$0xff]  ;;  %v2845_v52 = vld [vmem:[%s3909_s17] sm:$0xff]  ;;  %v2847_v48 = vld [vmem:[%s3909_s17 + $0x10] sm:$0xff] }
 0x159   : > { %v1055_v15 = vadd.f32 %v978_v21, %v895_v33  ;;  %v1056_v25 = vadd.f32 %v978_v21, %v896_v32  ;;  %v1057_v45 = vadd.f32 %v978_v21, %v897_v40  ;;  %v1058_v5 = vadd.f32 %v978_v21, %v898_v37  ;;  %v2296_v33 = vld [vmem:[%s3504_s14 + $0x70] sm:$0xff]  ;;  %v2846_v4 = vld [vmem:[%s3909_s17 + $0x8] sm:$0xff]  ;;  %v2849_v32 = vld [vmem:[%s3909_s17 + $0x20] sm:$0xff]  ;;  %s2575_s14 = sshll.u32 %s340_s13, 4  ;;  %s2576_s14 = int_to_ptr.vmem [resolvable:$true] %s2575_s14 }
 0x15a   : > { %v2850_v40 = vld [vmem:[%s3909_s17 + $0x28] sm:$0xff]  ;;  %v2851_v37 = vld [vmem:[%s3909_s17 + $0x30] sm:$0xff] }
 0x15b   : > { %2335 = vperm.xlu1 %2963, %v2289_v49   ;;  %v1119_v8 = vmul.f32 0.2, %v1055_v15  ;;  %v1120_v19 = vmul.f32 0.2, %v1056_v25  ;;  %v1121_v26 = vmul.f32 0.2, %v1057_v45 }
 0x15c   : > { %v1122_v6 = vmul.f32 0.2, %v1058_v5 }
 0x15d   : > { %v993_v63 = vpop.permute.xlu1 %992  ;;  %v1183_v51 = vmax.f32 %v1055_v15, %v1119_v8  ;;  %v1184_v31 = vmax.f32 %v1056_v25, %v1120_v19  ;;  %v1185_v39 = vmax.f32 %v1057_v45, %v1121_v26 }
 0x15e   : > { %v1067_v38 = vadd.f32 %v993_v63, %v907_v46  ;;  %v1068_v24 = vadd.f32 %v993_v63, %v908_v42  ;;  %v1069_v59 = vadd.f32 %v993_v63, %v909_v56  ;;  %v1070_v60 = vadd.f32 %v993_v63, %v910_v36  ;;  %2355 = vperm.xlu2 %2964, %v2293_v9  }
 0x15f   : > { %v1263_v62 = vpack.c.bf16 %v1187_v23, %v1183_v51  ;;  %v1264_v53 = vpack.c.bf16 %v1188_v2, %v1184_v31  ;;  %v1265_v41 = vpack.c.bf16 %v1189_v22, %v1185_v39  ;;  %v1186_v47 = vmax.f32 %v1058_v5, %v1122_v6 }
 0x160   : > { %v1131_v27 = vmul.f32 0.2, %v1067_v38  ;;  %v1132_v0 = vmul.f32 0.2, %v1068_v24  ;;  %v1133_v13 = vmul.f32 0.2, %v1069_v59 }
 0x161   : > { %v1134_v50 = vmul.f32 0.2, %v1070_v60  ;;  %v1266_v61 = vpack.c.bf16 %v1190_v17, %v1186_v47 }
 0x162   : > { %v1195_v16 = vmax.f32 %v1067_v38, %v1131_v27  ;;  %v1196_v3 = vmax.f32 %v1068_v24, %v1132_v0  ;;  %v1197_v29 = vmax.f32 %v1069_v59, %v1133_v13 }
 0x163   : > { %2350 = vperm.xlu1 %2963, %v2292_v1   ;;  %v1198_v7 = vmax.f32 %v1070_v60, %v1134_v50  ;;  %v3982_v1 = vpop.permute.xlu0 %1374 }
 0x164   : > { %v1267_v18 = vpack.c.bf16 %v1195_v16, %v1191_v43  ;;  %v1268_v34 = vpack.c.bf16 %v1196_v3, %v1192_v58  ;;  %v1269_v55 = vpack.c.bf16 %v1197_v29, %v1193_v30  ;;  %4644 = vst [vmem:[#allocation9_spill] sm:$0xff] %v3982_v1 }
 0x165   : > { %v1270_v35 = vpack.c.bf16 %v1198_v7, %v1194_v11  ;;  %v3964_v9 = vpop.permute.xlu1 %1384 }
 0x166   : > { %1446 = vmatpush.bf16.msra.mxu0 %v1267_v18  ;;  %1495 = vmatpush.bf16.msra.mxu1 %v1268_v34 }
 0x167   : > { %1544 = vmatpush.bf16.msra.mxu2 %v1269_v55  ;;  %1593 = vmatpush.bf16.msra.mxu3 %v1270_v35 }
 0x168   : > { %2370 = vperm.xlu2 %2964, %v2296_v33  }
 0x16a   : > { %1447 = vmatpush.bf16.msra.mxu0 %v1263_v62  ;;  %1496 = vmatpush.bf16.msra.mxu1 %v1264_v53  ;;  %v3986_v53 = vpop.permute.xlu2 %1389 }
 0x16b   : > { %1545 = vmatpush.bf16.msra.mxu2 %v1265_v41  ;;  %1594 = vmatpush.bf16.msra.mxu3 %v1266_v61  ;;  %4646 = vst [vmem:[#allocation10_spill] sm:$0xff] %v3986_v53  ;;  %v3996_v13 = vpop.permute.xlu0 %1369 }
 0x16c   : > { %2365 = vperm.xlu1 %2963, %v2295_v44  }
 0x16d   : > { %1448 = vmatmul.bf16.vlgmr.msra.gmra.mxu0 %v2845_v52  ;;  %1497 = vmatmul.bf16.vlgmr.msra.gmra.mxu1 %v2845_v52  ;;  %v3984_v62 = vpop.permute.xlu1 %1379 }
 0x16e   : > { %1546 = vmatmul.bf16.vlgmr.msra.gmra.mxu2 %v2845_v52  ;;  %1595 = vmatmul.bf16.vlgmr.msra.gmra.mxu3 %v2845_v52  ;;  %4645 = vst [vmem:[#allocation5_spill] sm:$0xff] %v3984_v62 }
 0x172   : > { %v4000_v58 = vpop.permute.xlu2 %1364 }
 0x173   : > { %v4010_v30 = vpop.permute.xlu0 %1344 }
 0x174   : > { %2529 = vperm.xlu1 %2963, %v2526_v54  }
 0x175   : > { %v3998_v43 = vpop.permute.xlu1 %1354 }
 0x17a   : > { %v4022_v55 = vpop.permute.xlu2 %1359 }
 0x17b   : > { %v1340_v54 = vpop.permute.xlu0 %1339 }
 0x17d   : > { %1453 = vmatmul.bf16.gmra.mxu0 %v2846_v4  ;;  %1502 = vmatmul.bf16.gmra.mxu1 %v2846_v4  ;;  %v4012_v29 = vpop.permute.xlu1 %1349 }
 0x17e   : > { %1551 = vmatmul.bf16.gmra.mxu2 %v2846_v4  ;;  %1600 = vmatmul.bf16.gmra.mxu3 %v2846_v4 }
 0x185   : > { %v1325_v4 = vpop.permute.xlu1 %1324 }
 0x18d   : > { %1458 = vmatmul.bf16.gmra.mxu0 %v2847_v48  ;;  %1507 = vmatmul.bf16.gmra.mxu1 %v2847_v48  ;;  %v1320_v53 = vpop.permute.xlu1 %1319 }
 0x18e   : > { %1556 = vmatmul.bf16.gmra.mxu2 %v2847_v48  ;;  %1605 = vmatmul.bf16.gmra.mxu3 %v2847_v48  ;;  %v1335_v48 = vpop.permute.xlu2 %1334 }
 0x19d   : > { %1463 = vmatmul.bf16.gmra.mxu0 %v2848_v57  ;;  %1512 = vmatmul.bf16.gmra.mxu1 %v2848_v57 }
 0x19e   : > { %1561 = vmatmul.bf16.gmra.mxu2 %v2848_v57  ;;  %1610 = vmatmul.bf16.gmra.mxu3 %v2848_v57 }
 0x1ad   : > { %1468 = vmatmul.bf16.gmra.mxu0 %v2849_v32  ;;  %1517 = vmatmul.bf16.gmra.mxu1 %v2849_v32 }
 0x1ae   : > { %1566 = vmatmul.bf16.gmra.mxu2 %v2849_v32  ;;  %1615 = vmatmul.bf16.gmra.mxu3 %v2849_v32 }
 0x1bd   : > { %1473 = vmatmul.bf16.gmra.mxu0 %v2850_v40  ;;  %1522 = vmatmul.bf16.gmra.mxu1 %v2850_v40 }
 0x1be   : > { %1571 = vmatmul.bf16.gmra.mxu2 %v2850_v40  ;;  %1620 = vmatmul.bf16.gmra.mxu3 %v2850_v40 }
 0x1cd   : > { %1478 = vmatmul.bf16.gmra.mxu0 %v2851_v37  ;;  %1527 = vmatmul.bf16.gmra.mxu1 %v2851_v37 }
 0x1ce   : > { %1576 = vmatmul.bf16.gmra.mxu2 %v2851_v37  ;;  %1625 = vmatmul.bf16.gmra.mxu3 %v2851_v37 }
 0x1dd   : > { %1483 = vmatmul.bf16.gmra.mxu0 %v2852_v10  ;;  %1532 = vmatmul.bf16.gmra.mxu1 %v2852_v10 }
 0x1de   : > { %1581 = vmatmul.bf16.gmra.mxu2 %v2852_v10  ;;  %1630 = vmatmul.bf16.gmra.mxu3 %v2852_v10  ;;  %v1315_v10 = vpop.permute.xlu0 %1314 }
 0x1ea   : > { %v3924_v12 = vpop.f32.mrf.mxu0  ;;  %v3926_v14 = vpop.f32.mrf.mxu1 }
 0x1f1   : > { %v3928_v21 = vpop.f32.mrf.mxu2  ;;  %v3930_v49 = vpop.f32.mrf.mxu3 }
 0x1f2   : > { %v3932_v20 = vpop.f32.mrf.mxu0  ;;  %v3934_v15 = vpop.f32.mrf.mxu1 }
 0x1f9   : > { %v3936_v25 = vpop.f32.mrf.mxu2  ;;  %v3938_v45 = vpop.f32.mrf.mxu3 }
 0x1fa   : > { %v1454_v5 = vpop.f32.mrf.mxu0  ;;  %v1503_v28 = vpop.f32.mrf.mxu1 }
 0x1fb   : > { %v4054_v62 = vadd.f32 %v1503_v28, %v1325_v4  ;;  %v4075_v28 = vadd.f32 %v3928_v21, %v1315_v10 }
 0x1fd   : > { %4660 = vst [vmem:[#allocation21_spill] sm:$0xff] %v4054_v62 }
 0x1fe   : > { %4666 = vst [vmem:[#allocation27_spill] sm:$0xff] %v4075_v28 }
 0x201   : > { %v3940_v23 = vpop.f32.mrf.mxu2  ;;  %v3942_v2 = vpop.f32.mrf.mxu3 }
 0x202   : > { %v3944_v22 = vpop.f32.mrf.mxu0  ;;  %v3946_v46 = vpop.f32.mrf.mxu1 }
 0x209   : > { %v3948_v8 = vpop.f32.mrf.mxu2  ;;  %v3950_v19 = vpop.f32.mrf.mxu3 }
 0x20a   : > { %v3952_v26 = vpop.f32.mrf.mxu0  ;;  %v3954_v42 = vpop.f32.mrf.mxu1 }
 0x20b   : > { %v4096_v21 = vadd.f32 %v3954_v42, %v1335_v48 }
 0x20d   : > { %4673 = vst [vmem:[#allocation34_spill] sm:$0xff] %v4096_v21 }
 0x211   : > { %v3956_v56 = vpop.f32.mrf.mxu2  ;;  %v3958_v36 = vpop.f32.mrf.mxu3 }
 0x212   : > { %v3960_v6 = vpop.f32.mrf.mxu0  ;;  %v3962_v63 = vpop.f32.mrf.mxu1 }
 0x219   : > { %v3966_v51 = vpop.f32.mrf.mxu2  ;;  %v3968_v31 = vpop.f32.mrf.mxu3 }
 0x21a   : > { %v3970_v39 = vpop.f32.mrf.mxu0  ;;  %v3972_v17 = vpop.f32.mrf.mxu1 }
 0x221   : > { %v3974_v38 = vpop.f32.mrf.mxu2  ;;  %v3976_v24 = vpop.f32.mrf.mxu3 }
 0x222   : > { %v3978_v59 = vpop.f32.mrf.mxu0  ;;  %v3980_v60 = vpop.f32.mrf.mxu1 }
 0x229   : > { %v3988_v41 = vpop.f32.mrf.mxu2  ;;  %v3990_v47 = vpop.f32.mrf.mxu3 }
 0x22a   : > { %v3992_v27 = vpop.f32.mrf.mxu0  ;;  %v3994_v0 = vpop.f32.mrf.mxu1 }
 0x231   : > { %v4002_v50 = vpop.f32.mrf.mxu2  ;;  %v4004_v61 = vpop.f32.mrf.mxu3 }
 0x232   : > { %v4006_v16 = vpop.f32.mrf.mxu0  ;;  %v4008_v3 = vpop.f32.mrf.mxu1 }
 0x239   : > { %v4014_v11 = vpop.f32.mrf.mxu2  ;;  %v4016_v7 = vpop.f32.mrf.mxu3 }
 0x23a   : > { %4647 = vst [vmem:[#allocation6_spill] sm:$0xff] %v4014_v11  ;;  %v4018_v18 = vpop.f32.mrf.mxu0  ;;  %v4020_v34 = vpop.f32.mrf.mxu1  ;;  %v4050_v11 = vadd.f32 %v3934_v15, %v1320_v53 }
 0x23b   : > { %4648 = vst [vmem:[#allocation7_spill] sm:$0xff] %v4016_v7  ;;  %v4047_v7 = vadd.f32 %v3932_v20, %v1320_v53 }
 0x23c   : > { %4658 = vst [vmem:[#allocation19_spill] sm:$0xff] %v4050_v11 }
 0x23d   : > { %4657 = vst [vmem:[#allocation18_spill] sm:$0xff] %v4047_v7 }
 0x241   : > { %v4024_v35 = vpop.f32.mrf.mxu2  ;;  %v4026_v33 = vpop.f32.mrf.mxu3 }
 0x242   : > { %4649 = vst [vmem:[#allocation8_spill] sm:$0xff] %v4024_v35  ;;  %v4028_v44 = vpop.f32.mrf.mxu0  ;;  %v4030_v52 = vpop.f32.mrf.mxu1  ;;  %v4041_v35 = vadd.f32 %v3924_v12, %v1315_v10 }
 0x243   : > { %4650 = vst [vmem:[#allocation11_spill] sm:$0xff] %v4026_v33  ;;  %v4044_v33 = vadd.f32 %v3926_v14, %v1315_v10 }
 0x244   : > { %4655 = vst [vmem:[#allocation16_spill] sm:$0xff] %v4041_v35  ;;  %v4061_v12 = vmul.f32 0.2, %v4041_v35  ;;  %v4081_v35 = vmul.f32 0.2, %v4047_v7 }
 0x245   : > { %4656 = vst [vmem:[#allocation17_spill] sm:$0xff] %v4044_v33  ;;  %v4064_v14 = vmul.f32 0.2, %v4044_v33  ;;  %v4084_v33 = vmul.f32 0.2, %v4050_v11  ;;  %v4186_v11 = vadd.f32 %v3974_v38, %v4010_v30  ;;  %v4208_v38 = vadd.f32 %v3988_v41, %v4012_v29 }
 0x246   : > { %4662 = vst [vmem:[#allocation23_spill] sm:$0xff] %v4061_v12  ;;  %v4230_v41 = vadd.f32 %v4018_v18, %v4000_v58  ;;  %v4250_v18 = vadd.f32 %v4030_v52, %v3996_v13 }
 0x247   : > { %4663 = vst [vmem:[#allocation24_spill] sm:$0xff] %v4064_v14  ;;  %v4093_v14 = vadd.f32 %v3952_v26, %v1335_v48 }
 0x248   : > { %4668 = vst [vmem:[#allocation29_spill] sm:$0xff] %v4081_v35 }
 0x249   : > { %v4032_v57 = vpop.f32.mrf.mxu2  ;;  %v4034_v32 = vpop.f32.mrf.mxu3  ;;  %4669 = vst [vmem:[#allocation30_spill] sm:$0xff] %v4084_v33  ;;  %v4204_v33 = vadd.f32 %v4008_v3, %v4022_v55  ;;  %v4226_v3 = vadd.f32 %v4002_v50, %v3998_v43 }
 0x24a   : > { %4651 = vst [vmem:[#allocation12_spill] sm:$0xff] %v4032_v57  ;;  %v4036_v40 = vpop.f32.mrf.mxu0  ;;  %v4038_v37 = vpop.f32.mrf.mxu1 }
 0x24b   : > { %4652 = vst [vmem:[#allocation13_spill] sm:$0xff] %v4034_v32  ;;  %v1330_v57 = vpop.permute.xlu2 %1329  ;;  %v4052_v32 = vadd.f32 %v1454_v5, %v1325_v4 }
 0x24c   : > { %4653 = vst [vmem:[#allocation14_spill] sm:$0xff] %v4036_v40  ;;  %v4067_v20 = vadd.f32 %v3944_v22, %v1330_v57  ;;  %v4070_v15 = vadd.f32 %v3946_v46, %v1330_v57  ;;  %v4087_v22 = vadd.f32 %v3936_v25, %v1320_v53  ;;  %v4090_v46 = vadd.f32 %v3938_v45, %v1320_v53 }
 0x24d   : > { %4654 = vst [vmem:[#allocation15_spill] sm:$0xff] %v4038_v37  ;;  %v4108_v25 = vadd.f32 %v3960_v6, %v1340_v54  ;;  %v4111_v45 = vadd.f32 %v3942_v2, %v1325_v4  ;;  %v4120_v53 = vadd.f32 %v3962_v63, %v1340_v54  ;;  %v4123_v28 = vadd.f32 %v3948_v8, %v1330_v57 }
 0x24e   : > { %4659 = vst [vmem:[#allocation20_spill] sm:$0xff] %v4052_v32  ;;  %v4114_v26 = vmul.f32 0.2, %v4067_v20  ;;  %v4117_v42 = vmul.f32 0.2, %v4070_v15  ;;  %v4130_v6 = vadd.f32 %v3970_v39, %v4010_v30  ;;  %v4134_v2 = vadd.f32 %v3972_v17, %v4010_v30 }
 0x24f   : > { %4664 = vst [vmem:[#allocation25_spill] sm:$0xff] %v4067_v20  ;;  %v4140_v63 = vmul.f32 0.2, %v4096_v21  ;;  %v4144_v8 = vadd.f32 %v3978_v59, %v4012_v29  ;;  %v4151_v39 = vadd.f32 %v3956_v56, %v1335_v48  ;;  %v4154_v17 = vadd.f32 %v3958_v36, %v1335_v48 }
 0x250   : > { %4665 = vst [vmem:[#allocation26_spill] sm:$0xff] %v4070_v15  ;;  %v4166_v12 = vmul.f32 0.2, %v4120_v53  ;;  %v4172_v56 = vadd.f32 %v3968_v31, %v1340_v54  ;;  %v4176_v36 = vadd.f32 %v3994_v0, %v3998_v43  ;;  %v4194_v31 = vadd.f32 %v3976_v24, %v4010_v30 }
 0x251   : > { %v4056_v37 = vpop.f32.mrf.mxu2  ;;  %v4058_v40 = vpop.f32.mrf.mxu3  ;;  %4670 = vst [vmem:[#allocation31_spill] sm:$0xff] %v4087_v22  ;;  %v4197_v0 = vmul.f32 0.2, %v4144_v8  ;;  %v4219_v30 = vadd.f32 %v4028_v44, %v3996_v13 }
 0x252   : > { %4661 = vst [vmem:[#allocation22_spill] sm:$0xff] %v4058_v40  ;;  %v1481_v5 = vpop.f32.mrf.mxu0  ;;  %v4072_v1 = vpop.f32.mrf.mxu1  ;;  %v4078_v40 = vadd.f32 %v3930_v49, %v1315_v10  ;;  %v4099_v49 = vmul.f32 0.2, %v4052_v32  ;;  %v4102_v10 = vmul.f32 0.2, %v4054_v62 }
 0x253   : > { %4671 = vst [vmem:[#allocation32_spill] sm:$0xff] %v4090_v46  ;;  %v4161_v46 = vadd.f32 %v3992_v27, %v3998_v43  ;;  %v4179_v27 = vmul.f32 0.2, %v4130_v6  ;;  %v4222_v7 = vmul.f32 0.2, %v4176_v36 }
 0x254   : > { %4667 = vst [vmem:[#allocation28_spill] sm:$0xff] %v4078_v40  ;;  %v4105_v40 = vadd.f32 %v3940_v23, %v1325_v4  ;;  %v4126_v23 = vadd.f32 %v3950_v19, %v1330_v57  ;;  %v4137_v4 = vmul.f32 0.2, %v4093_v14  ;;  %v4148_v19 = vadd.f32 %v3980_v60, %v4012_v29 }
 0x255   : > { %4672 = vst [vmem:[#allocation33_spill] sm:$0xff] %v4093_v14  ;;  %v4157_v57 = vmul.f32 0.2, %v4108_v25  ;;  %v4169_v60 = vadd.f32 %v3966_v51, %v1340_v54  ;;  %v4190_v51 = vadd.f32 %v4006_v16, %v4022_v55  ;;  %v4212_v16 = vadd.f32 %v3990_v47, %v4012_v29 }
 0x256   : > { %4674 = vst [vmem:[#allocation35_spill] sm:$0xff] %v4099_v49  ;;  %v4200_v54 = vmul.f32 0.2, %v4148_v19  ;;  %v4215_v24 = vmul.f32 0.2, %v4161_v46  ;;  %v4234_v47 = vadd.f32 %v4020_v34, %v4000_v58  ;;  %v4238_v29 = vadd.f32 %v4004_v61, %v3998_v43  ;;  %v4700_v34 = vld [vmem:[#allocation9_spill] sm:$0xff] }
 0x257   : > { %4675 = vst [vmem:[#allocation36_spill] sm:$0xff] %v4102_v10  ;;  %v4241_v44 = vmul.f32 0.2, %v4190_v51  ;;  %v4702_v10 = vld [vmem:[#allocation5_spill] sm:$0xff]  ;;  %v4703_v61 = vld [vmem:[#allocation6_spill] sm:$0xff] }
 0x258   : > { %4676 = vst [vmem:[#allocation37_spill] sm:$0xff] %v4105_v40  ;;  %v4182_v40 = vmul.f32 0.2, %v4134_v2  ;;  %v1482_v43 = vadd.f32 %v1481_v5, %v4702_v10  ;;  %v4257_v32 = vadd.f32 %v4703_v61, %v4022_v55  ;;  %v1531_v52 = vadd.f32 %v4072_v1, %v4702_v10  ;;  %v4705_v61 = vld [vmem:[#allocation8_spill] sm:$0xff]  ;;  %v4707_v1 = vld [vmem:[#allocation10_spill] sm:$0xff] }
 0x259   : > { %4677 = vst [vmem:[#allocation38_spill] sm:$0xff] %v4108_v25  ;;  %v1579_v22 = vpop.f32.mrf.mxu2  ;;  %v4163_v59 = vpop.f32.mrf.mxu3  ;;  %v4272_v5 = vmul.f32 0.2, %v4234_v47  ;;  %v4276_v15 = vadd.f32 %v4705_v61, %v4000_v58 }
 0x25a   : > { %4678 = vst [vmem:[#allocation39_spill] sm:$0xff] %v4111_v45  ;;  %v1484_v48 = vpop.f32.mrf.mxu0  ;;  %v1533_v45 = vpop.f32.mrf.mxu1  ;;  %v1688_v61 = vmul.f32 0.2, %v1482_v43 }
 0x25b   : > { %4679 = vst [vmem:[#allocation40_spill] sm:$0xff] %v4114_v26  ;;  %v1485_v35 = vadd.f32 %v1484_v48, %v3964_v9  ;;  %v1534_v50 = vadd.f32 %v1533_v45, %v3964_v9  ;;  %v4704_v48 = vld [vmem:[#allocation7_spill] sm:$0xff]  ;;  %v4264_v45 = vmul.f32 0.2, %v4219_v30 }
 0x25c   : > { %4680 = vst [vmem:[#allocation41_spill] sm:$0xff] %v4117_v42  ;;  %v4261_v49 = vadd.f32 %v4704_v48, %v4022_v55  ;;  %v4706_v55 = vld [vmem:[#allocation15_spill] sm:$0xff] }
 0x25d   : > { %4681 = vst [vmem:[#allocation42_spill] sm:$0xff] %v4120_v53  ;;  %v1529_v48 = vadd.f32 %v4706_v55, %v4700_v34  ;;  %v1692_v26 = vmul.f32 0.2, %v1485_v35  ;;  %v1689_v55 = vmul.f32 0.2, %v1531_v52 }
 0x25e   : > { %4682 = vst [vmem:[#allocation43_spill] sm:$0xff] %v4123_v28  ;;  %v4701_v28 = vld [vmem:[#allocation14_spill] sm:$0xff] }
 0x25f   : > { %4683 = vst [vmem:[#allocation44_spill] sm:$0xff] %v4126_v23  ;;  %v4246_v23 = vmul.f32 0.2, %v4204_v33  ;;  %v1480_v62 = vadd.f32 %v4701_v28, %v4700_v34  ;;  %v4269_v28 = vmul.f32 0.2, %v4230_v41 }
 0x260   : > { %4684 = vst [vmem:[#allocation45_spill] sm:$0xff] %v4130_v6  ;;  %v1685_v25 = vmul.f32 0.2, %v1529_v48 }
 0x261   : > { %4685 = vst [vmem:[#allocation46_spill] sm:$0xff] %v4134_v2  ;;  %v4709_v2 = vld [vmem:[#allocation12_spill] sm:$0xff] }
 0x262   : > { %4686 = vst [vmem:[#allocation47_spill] sm:$0xff] %v4137_v4  ;;  %v1486_v42 = vpop.f32.mrf.mxu0  ;;  %v1535_v20 = vpop.f32.mrf.mxu1  ;;  %v1681_v4 = vmul.f32 0.2, %v4250_v18 }
 0x263   : > { %4687 = vst [vmem:[#allocation48_spill] sm:$0xff] %v4140_v63  ;;  %v1536_v21 = vadd.f32 %v1535_v20, %v4707_v1  ;;  %v4708_v63 = vld [vmem:[#allocation11_spill] sm:$0xff] }
 0x264   : > { %4688 = vst [vmem:[#allocation49_spill] sm:$0xff] %v4151_v39  ;;  %v1631_v39 = vpop.f32.mrf.mxu3  ;;  %v4284_v14 = vadd.f32 %v4708_v63, %v4000_v58  ;;  %v1756_v58 = vmax.f32 %v1485_v35, %v1692_v26 }
 0x265   : > { %4689 = vst [vmem:[#allocation50_spill] sm:$0xff] %v4154_v17  ;;  %v1582_v17 = vpop.f32.mrf.mxu2 }
 0x266   : > { %4690 = vst [vmem:[#allocation51_spill] sm:$0xff] %v4157_v57  ;;  %v4290_v57 = vadd.f32 %v1579_v22, %v4702_v10  ;;  %v1583_v20 = vadd.f32 %v1582_v17, %v3964_v9  ;;  %v1629_v22 = vadd.f32 %v4163_v59, %v4702_v10  ;;  %v1752_v17 = vmax.f32 %v1482_v43, %v1688_v61 }
 0x267   : > { %4691 = vst [vmem:[#allocation52_spill] sm:$0xff] %v4166_v12  ;;  %v1697_v12 = vmul.f32 0.2, %v1536_v21  ;;  %v1745_v59 = vmax.f32 %v4250_v18, %v1681_v4 }
 0x268   : > { %4692 = vst [vmem:[#allocation53_spill] sm:$0xff] %v4169_v60  ;;  %v1487_v60 = vadd.f32 %v1486_v42, %v4707_v1  ;;  %v1632_v42 = vadd.f32 %v1631_v39, %v3964_v9  ;;  %v1690_v10 = vmul.f32 0.2, %v4290_v57 }
 0x269   : > { %4693 = vst [vmem:[#allocation54_spill] sm:$0xff] %v4172_v56  ;;  %v1693_v56 = vmul.f32 0.2, %v1534_v50 }
 0x26a   : > { %4694 = vst [vmem:[#allocation55_spill] sm:$0xff] %v4179_v27  ;;  %v1696_v53 = vmul.f32 0.2, %v1487_v60  ;;  %v1753_v27 = vmax.f32 %v1531_v52, %v1689_v55  ;;  %v1754_v18 = vmax.f32 %v4290_v57, %v1690_v10  ;;  %v1732_v57 = vmax.f32 %v4161_v46, %v4215_v24 }
 0x26b   : > { %4695 = vst [vmem:[#allocation56_spill] sm:$0xff] %v4182_v40  ;;  %v1757_v63 = vmax.f32 %v1534_v50, %v1693_v56  ;;  %v4296_v40 = vadd.f32 %v4709_v2, %v3996_v13  ;;  %v1749_v50 = vmax.f32 %v1529_v48, %v1685_v25  ;;  %v1741_v25 = vmax.f32 %v4234_v47, %v4272_v5 }
 0x26c   : > { %4696 = vst [vmem:[#allocation57_spill] sm:$0xff] %v4186_v11  ;;  %v1744_v11 = vmax.f32 %v4219_v30, %v4264_v45  ;;  %v1578_v30 = vadd.f32 %v4056_v37, %v4700_v34  ;;  %v4710_v45 = vld [vmem:[#allocation22_spill] sm:$0xff]  ;;  %v1633_v35 = vpop.f32.mrf.mxu3  ;;  %v4711_v37 = vld [vmem:[#allocation13_spill] sm:$0xff]  ;;  %v1678_v47 = vmul.f32 0.2, %v4276_v15  ;;  %v1728_v46 = vmax.f32 %v4144_v8, %v4197_v0 }
 0x26d   : > { %4697 = vst [vmem:[#allocation58_spill] sm:$0xff] %v4194_v31  ;;  %v1684_v31 = vmul.f32 0.2, %v1480_v62  ;;  %v1627_v6 = vadd.f32 %v4710_v45, %v4700_v34  ;;  %v1584_v9 = vpop.f32.mrf.mxu2  ;;  %v1634_v39 = vadd.f32 %v1633_v35, %v4707_v1  ;;  %v1806_v55 = vpack.c.bf16 %v1753_v27, %v1749_v50 }
 0x26e   : > { %4698 = vst [vmem:[#allocation59_spill] sm:$0xff] %v4208_v38  ;;  %v1761_v38 = vmax.f32 %v1536_v21, %v1697_v12  ;;  %v1694_v12 = vmul.f32 0.2, %v1583_v20  ;;  %v1695_v21 = vmul.f32 0.2, %v1632_v42  ;;  %v1585_v2 = vadd.f32 %v1584_v9, %v4707_v1 }
 0x26f   : > { %4699 = vst [vmem:[#allocation60_spill] sm:$0xff] %v4212_v16  ;;  %v1760_v16 = vmax.f32 %v1487_v60, %v1696_v53  ;;  %v4308_v60 = vadd.f32 %v4711_v37, %v3996_v13  ;;  %v1748_v56 = vmax.f32 %v1480_v62, %v1684_v31  ;;  %v1699_v34 = vmul.f32 0.2, %v1634_v39 }
 0x270   : > { %v1810_v53 = vpack.c.bf16 %v1761_v38, %v1757_v63  ;;  %v1698_v38 = vmul.f32 0.2, %v1585_v2  ;;  %v1686_v43 = vmul.f32 0.2, %v1578_v30  ;;  %v1687_v52 = vmul.f32 0.2, %v1627_v6 }
 0x271   : > { %v1809_v26 = vpack.c.bf16 %v1760_v16, %v1756_v58  ;;  %v1691_v16 = vmul.f32 0.2, %v1629_v22  ;;  %v1805_v61 = vpack.c.bf16 %v1752_v17, %v1748_v56  ;;  %v1758_v1 = vmax.f32 %v1583_v20, %v1694_v12  ;;  %v4713_v12 = vld [vmem:[#allocation45_spill] sm:$0xff] }
 0x272   : > { %2007 = vmatpush.bf16.msrb.mxu1 %v1810_v53  ;;  %v1759_v58 = vmax.f32 %v1632_v42, %v1695_v21  ;;  %v1762_v63 = vmax.f32 %v1585_v2, %v1698_v38  ;;  %v1763_v13 = vmax.f32 %v1634_v39, %v1699_v34  ;;  %v1740_v62 = vmax.f32 %v4230_v41, %v4269_v28  ;;  %v4712_v53 = vld [vmem:[#allocation55_spill] sm:$0xff]  ;;  %v4714_v2 = vld [vmem:[#allocation56_spill] sm:$0xff]  ;;  %v4715_v39 = vld [vmem:[#allocation46_spill] sm:$0xff] }
 0x273   : > { %1958 = vmatpush.bf16.msrb.mxu0 %v1809_v26  ;;  %v1682_v31 = vmul.f32 0.2, %v4296_v40  ;;  %v1683_v4 = vmul.f32 0.2, %v4308_v60  ;;  %v1755_v48 = vmax.f32 %v1629_v22, %v1691_v16  ;;  %v1736_v42 = vmax.f32 %v4190_v51, %v4241_v44  ;;  %v4719_v16 = vld [vmem:[#allocation38_spill] sm:$0xff]  ;;  %v4720_v34 = vld [vmem:[#allocation52_spill] sm:$0xff] }
 0x274   : > { %v1811_v27 = vpack.c.bf16 %v1762_v63, %v1758_v1  ;;  %v1812_v20 = vpack.c.bf16 %v1763_v13, %v1759_v58  ;;  %v1737_v41 = vmax.f32 %v4204_v33, %v4246_v23  ;;  %v1801_v28 = vpack.c.bf16 %v1744_v11, %v1740_v62  ;;  %v4723_v1 = vld [vmem:[#allocation58_spill] sm:$0xff]  ;;  %v4725_v13 = vld [vmem:[#allocation33_spill] sm:$0xff] }
 0x275   : > { %v1802_v45 = vpack.c.bf16 %v1745_v59, %v1741_v25  ;;  %v1679_v5 = vmul.f32 0.2, %v4284_v14  ;;  %v1750_v17 = vmax.f32 %v1578_v30, %v1686_v43  ;;  %v1751_v9 = vmax.f32 %v1627_v6, %v1687_v52  ;;  %v4716_v8 = vld [vmem:[#allocation59_spill] sm:$0xff]  ;;  %v4721_v43 = vld [vmem:[#allocation42_spill] sm:$0xff]  ;;  %v4726_v25 = vld [vmem:[#allocation48_spill] sm:$0xff] }
 0x276   : > { %2008 = vmatpush.bf16.msrb.mxu1 %v1806_v55  ;;  %2056 = vmatpush.bf16.msrb.mxu2 %v1811_v27  ;;  %v1733_v22 = vmax.f32 %v4176_v36, %v4222_v7  ;;  %v1674_v51 = vmul.f32 0.2, %v4257_v32  ;;  %v1675_v33 = vmul.f32 0.2, %v4261_v49  ;;  %v1746_v11 = vmax.f32 %v4296_v40, %v1682_v31  ;;  %v4718_v59 = vld [vmem:[#allocation51_spill] sm:$0xff]  ;;  %v4727_v31 = vld [vmem:[#allocation34_spill] sm:$0xff] }
 0x277   : > { %1959 = vmatpush.bf16.msrb.mxu0 %v1805_v61  ;;  %2105 = vmatpush.bf16.msrb.mxu3 %v1812_v20  ;;  %v1747_v23 = vmax.f32 %v4308_v60, %v1683_v4  ;;  %v1807_v44 = vpack.c.bf16 %v1754_v18, %v1750_v17  ;;  %v1808_v6 = vpack.c.bf16 %v1755_v48, %v1751_v9  ;;  %v1670_v36 = vmul.f32 0.2, %v4226_v3  ;;  %v4717_v60 = vld [vmem:[#allocation60_spill] sm:$0xff]  ;;  %v4722_v61 = vld [vmem:[#allocation57_spill] sm:$0xff]  ;;  %v4729_v27 = vld [vmem:[#allocation54_spill] sm:$0xff] }
 0x278   : > { %v1797_v30 = vpack.c.bf16 %v1736_v42, %v1732_v57  ;;  %v1798_v35 = vpack.c.bf16 %v1737_v41, %v1733_v22  ;;  %v1729_v7 = vmax.f32 %v4148_v19, %v4200_v54  ;;  %v1671_v24 = vmul.f32 0.2, %v4238_v29  ;;  %v4728_v18 = vld [vmem:[#allocation53_spill] sm:$0xff]  ;;  %v4733_v57 = vld [vmem:[#allocation26_spill] sm:$0xff] }
 0x279   : > { %v1742_v26 = vmax.f32 %v4276_v15, %v1678_v47  ;;  %v1743_v40 = vmax.f32 %v4284_v14, %v1679_v5  ;;  %v1724_v21 = vmax.f32 %v4713_v12, %v4712_v53  ;;  %v1725_v37 = vmax.f32 %v4715_v39, %v4714_v2  ;;  %v4730_v47 = vld [vmem:[#allocation40_spill] sm:$0xff]  ;;  %v4731_v5 = vld [vmem:[#allocation25_spill] sm:$0xff] }
 0x27a   : > { %2009 = vmatpush.bf16.msrb.mxu1 %v1802_v45  ;;  %2057 = vmatpush.bf16.msrb.mxu2 %v1807_v44  ;;  %v1666_v0 = vmul.f32 0.2, %v4716_v8  ;;  %v1667_v19 = vmul.f32 0.2, %v4717_v60  ;;  %v1738_v54 = vmax.f32 %v4257_v32, %v1674_v51  ;;  %v1739_v15 = vmax.f32 %v4261_v49, %v1675_v33  ;;  %v4724_v49 = vld [vmem:[#allocation47_spill] sm:$0xff]  ;;  %v4732_v9 = vld [vmem:[#allocation41_spill] sm:$0xff] }
 0x27b   : > { %1960 = vmatpush.bf16.msrb.mxu0 %v1801_v28  ;;  %2106 = vmatpush.bf16.msrb.mxu3 %v1808_v6  ;;  %v1803_v56 = vpack.c.bf16 %v1746_v11, %v1742_v26  ;;  %v1804_v14 = vpack.c.bf16 %v1747_v23, %v1743_v40  ;;  %v1793_v50 = vpack.c.bf16 %v1728_v46, %v1724_v21  ;;  %v1662_v55 = vmul.f32 0.2, %v4722_v61  ;;  %v4734_v51 = vld [vmem:[#allocation49_spill] sm:$0xff]  ;;  %v4735_v11 = vld [vmem:[#allocation50_spill] sm:$0xff]  ;;  %v4740_v26 = vld [vmem:[#allocation43_spill] sm:$0xff] }
 0x27c   : > { %v1794_v10 = vpack.c.bf16 %v1729_v7, %v1725_v37  ;;  %v1720_v38 = vmax.f32 %v4719_v16, %v4718_v59  ;;  %v1721_v52 = vmax.f32 %v4721_v43, %v4720_v34  ;;  %v1663_v58 = vmul.f32 0.2, %v4723_v1  ;;  %v4738_v7 = vld [vmem:[#allocation36_spill] sm:$0xff]  ;;  %v4747_v59 = vld [vmem:[#allocation39_spill] sm:$0xff] }
 0x27d   : > { %v1734_v63 = vmax.f32 %v4226_v3, %v1670_v36  ;;  %v1735_v32 = vmax.f32 %v4238_v29, %v1671_v24  ;;  %v1716_v62 = vmax.f32 %v4725_v13, %v4724_v49  ;;  %v1717_v4 = vmax.f32 %v4727_v31, %v4726_v25  ;;  %v4739_v36 = vld [vmem:[#allocation21_spill] sm:$0xff]  ;;  %v4741_v53 = vld [vmem:[#allocation44_spill] sm:$0xff]  ;;  %v4748_v43 = vld [vmem:[#allocation23_spill] sm:$0xff] }
 0x27e   : > { %2010 = vmatpush.bf16.msrb.mxu1 %v1798_v35  ;;  %2058 = vmatpush.bf16.msrb.mxu2 %v1803_v56  ;;  %v1658_v48 = vmul.f32 0.2, %v4728_v18  ;;  %v1659_v20 = vmul.f32 0.2, %v4729_v27  ;;  %v1730_v3 = vmax.f32 %v4716_v8, %v1666_v0  ;;  %v1731_v29 = vmax.f32 %v4717_v60, %v1667_v19  ;;  %v4737_v35 = vld [vmem:[#allocation20_spill] sm:$0xff]  ;;  %v4742_v60 = vld [vmem:[#allocation29_spill] sm:$0xff] }
 0x27f   : > { %1961 = vmatpush.bf16.msrb.mxu0 %v1797_v30  ;;  %2107 = vmatpush.bf16.msrb.mxu3 %v1804_v14  ;;  %v1799_v42 = vpack.c.bf16 %v1738_v54, %v1734_v63  ;;  %v1800_v41 = vpack.c.bf16 %v1739_v15, %v1735_v32  ;;  %v1789_v28 = vpack.c.bf16 %v1720_v38, %v1716_v62  ;;  %v1654_v33 = vmul.f32 0.2, %v4734_v51  ;;  %v4736_v30 = vld [vmem:[#allocation35_spill] sm:$0xff]  ;;  %v4743_v19 = vld [vmem:[#allocation18_spill] sm:$0xff]  ;;  %v4753_v49 = vld [vmem:[#allocation32_spill] sm:$0xff] }
 0x280   : > { %v1790_v45 = vpack.c.bf16 %v1721_v52, %v1717_v4  ;;  %v1712_v17 = vmax.f32 %v4731_v5, %v4730_v47  ;;  %v1713_v22 = vmax.f32 %v4733_v57, %v4732_v9  ;;  %v1655_v23 = vmul.f32 0.2, %v4735_v11  ;;  %v4744_v15 = vld [vmem:[#allocation30_spill] sm:$0xff]  ;;  %v4745_v56 = vld [vmem:[#allocation19_spill] sm:$0xff]  ;;  %v4749_v52 = vld [vmem:[#allocation16_spill] sm:$0xff] }
 0x281   : > { %v1726_v44 = vmax.f32 %v4722_v61, %v1662_v55  ;;  %v1727_v6 = vmax.f32 %v4723_v1, %v1663_v58  ;;  %v1708_v46 = vmax.f32 %v4737_v35, %v4736_v30  ;;  %v1709_v24 = vmax.f32 %v4739_v36, %v4738_v7  ;;  %v4750_v55 = vld [vmem:[#allocation24_spill] sm:$0xff]  ;;  %v4751_v1 = vld [vmem:[#allocation17_spill] sm:$0xff]  ;;  %v4752_v63 = vld [vmem:[#allocation31_spill] sm:$0xff]  ;;  %v1833_v30 = vpop.permute.xlu2 %1832  ;;  %v4411_v35 = vpop.permute.xlu0 %1837 }
 0x282   : > { %2011 = vmatpush.bf16.msrb.mxu1 %v1794_v10  ;;  %2059 = vmatpush.bf16.msrb.mxu2 %v1799_v42  ;;  %v1650_v40 = vmul.f32 0.2, %v4740_v26  ;;  %v1651_v12 = vmul.f32 0.2, %v4741_v53  ;;  %v1722_v39 = vmax.f32 %v4728_v18, %v1658_v48  ;;  %v1723_v37 = vmax.f32 %v4729_v27, %v1659_v20  ;;  %v4754_v27 = vld [vmem:[#allocation27_spill] sm:$0xff]  ;;  %v4755_v42 = vld [vmem:[#allocation28_spill] sm:$0xff] }
 0x283   : > { %1962 = vmatpush.bf16.msrb.mxu0 %v1793_v50  ;;  %2108 = vmatpush.bf16.msrb.mxu3 %v1800_v41  ;;  %v1795_v21 = vpack.c.bf16 %v1730_v3, %v1726_v44  ;;  %v1796_v2 = vpack.c.bf16 %v1731_v29, %v1727_v6  ;;  %v1785_v8 = vpack.c.bf16 %v1712_v17, %v1708_v46  ;;  %v4746_v50 = vld [vmem:[#allocation37_spill] sm:$0xff]  ;;  %v1647_v16 = vmul.f32 0.2, %v4747_v59  ;;  %v2857_v44 = vld [vmem:[%s3909_s17 + $0x60] sm:$0xff]  ;;  %v4413_v46 = vpop.permute.xlu1 %1842  ;;  %v2859_v7 = vld [vmem:[%s3909_s17 + $0x70] sm:$0xff] }
 0x284   : > { %v1786_v0 = vpack.c.bf16 %v1713_v22, %v1709_v24  ;;  %v1704_v54 = vmax.f32 %v4743_v19, %v4742_v60  ;;  %v1705_v14 = vmax.f32 %v4745_v56, %v4744_v15  ;;  %v1646_v10 = vmul.f32 0.2, %v4746_v50  ;;  %v2858_v6 = vld [vmem:[%s3909_s17 + $0x68] sm:$0xff] }
 0x285   : > { %v1718_v38 = vmax.f32 %v4734_v51, %v1654_v33  ;;  %v1719_v34 = vmax.f32 %v4735_v11, %v1655_v23  ;;  %v1700_v61 = vmax.f32 %v4749_v52, %v4748_v43  ;;  %v1701_v58 = vmax.f32 %v4751_v1, %v4750_v55  ;;  %v2854_v33 = vld [vmem:[%s3909_s17 + $0x48] sm:$0xff]  ;;  %v2855_v11 = vld [vmem:[%s3909_s17 + $0x50] sm:$0xff]  ;;  %v2856_v23 = vld [vmem:[%s3909_s17 + $0x58] sm:$0xff] }
 0x286   : > { %2012 = vmatpush.bf16.msrb.mxu1 %v1790_v45  ;;  %2060 = vmatpush.bf16.msrb.mxu2 %v1795_v21  ;;  %v1642_v32 = vmul.f32 0.2, %v4752_v63  ;;  %v1643_v13 = vmul.f32 0.2, %v4753_v49  ;;  %v1714_v31 = vmax.f32 %v4740_v26, %v1650_v40  ;;  %v1715_v4 = vmax.f32 %v4741_v53, %v1651_v12  ;;  %v2860_v53 = vld [vmem:[%s3909_s17 + $0x78] sm:$0xff] }
 0x287   : > { %1963 = vmatpush.bf16.msrb.mxu0 %v1789_v28  ;;  %2109 = vmatpush.bf16.msrb.mxu3 %v1796_v2  ;;  %v1791_v62 = vpack.c.bf16 %v1722_v39, %v1718_v38  ;;  %v1792_v25 = vpack.c.bf16 %v1723_v37, %v1719_v34  ;;  %v1781_v18 = vpack.c.bf16 %v1704_v54, %v1700_v61  ;;  %v1638_v20 = vmul.f32 0.2, %v4754_v27  ;;  %v2853_v28 = vld [vmem:[%s3909_s17 + $0x40] sm:$0xff]  ;;  %s2989_s17 = scalar_lea.hbm %s2988_s16, 4 }
 0x288   : > { %v1782_v48 = vpack.c.bf16 %v1705_v14, %v1701_v58  ;;  %v1639_v41 = vmul.f32 0.2, %v4755_v42  ;;  %v1710_v3 = vmax.f32 %v4746_v50, %v1646_v10  ;;  %v1711_v29 = vmax.f32 %v4747_v59, %v1647_v16  ;;  %p2990_p12 = scmp.ne.s32.totalorder %s2988_s16, %s2989_s17  ;;  %p2995_p2 = scmp.lt.s32.totalorder %s2993_s19, %s2989_s17 }
 0x289   : > { %v1706_v5 = vmax.f32 %v4752_v63, %v1642_v32  ;;  %v1707_v17 = vmax.f32 %v4753_v49, %v1643_v13  ;;  %v1702_v9 = vmax.f32 %v4754_v27, %v1638_v20  ;;  %v4416_v36 = vpop.permute.xlu2 %1847  ;;  %v4418_v24 = vpop.permute.xlu0 %1852 }
 0x28a   : > { %2013 = vmatpush.bf16.msrb.mxu1 %v1786_v0  ;;  %2061 = vmatpush.bf16.msrb.mxu2 %v1791_v62  ;;  %v1787_v45 = vpack.c.bf16 %v1714_v31, %v1710_v3  ;;  %v1788_v47 = vpack.c.bf16 %v1715_v4, %v1711_v29  ;;  %v1703_v57 = vmax.f32 %v4755_v42, %v1639_v41  ;;  %p2991_p13 = pnand %p2990_p12, %p3131_p4  ;;  %p2996_p3 = por %p2995_p2, %p2994_p1 }
 0x28b   : > { %1964 = vmatpush.bf16.msrb.mxu0 %v1785_v8  ;;  %2110 = vmatpush.bf16.msrb.mxu3 %v1792_v25  ;;  %v1783_v22 = vpack.c.bf16 %v1706_v5, %v1702_v9  ;;  %v4420_v26 = vpop.permute.xlu1 %1857 }
 0x28c   : > { %v1784_v51 = vpack.c.bf16 %v1707_v17, %v1703_v57  ;;  %p2992_p0 = pneg %p2991_p13 }
 0x28e   : > { %2014 = vmatpush.bf16.msrb.mxu1 %v1782_v48  ;;  %2062 = vmatpush.bf16.msrb.mxu2 %v1787_v45  ;;  %p2997_p5 = pnand %p2996_p3, %p2992_p0 }
 0x28f   : > { %1965 = vmatpush.bf16.msrb.mxu0 %v1781_v18  ;;  %2111 = vmatpush.bf16.msrb.mxu3 %v1788_v47 }
 0x291   : > { %2015 = vmatmul.bf16.vlgmr.msrb.gmra.mxu1 %v2853_v28  ;;  %v4422_v40 = vpop.permute.xlu2 %1862  ;;  %v4425_v12 = vpop.permute.xlu0 %1867 }
 0x292   : > { %1966 = vmatmul.bf16.vlgmr.msrb.gmra.mxu0 %v2853_v28  ;;  %2063 = vmatpush.bf16.msrb.mxu2 %v1783_v22 }
 0x293   : > { %2112 = vmatpush.bf16.msrb.mxu3 %v1784_v51  ;;  %v4427_v21 = vpop.permute.xlu1 %1872 }
 0x295   : > { %2064 = vmatmul.bf16.vlgmr.msrb.gmra.mxu2 %v2853_v28 }
 0x296   : > { %2113 = vmatmul.bf16.vlgmr.msrb.gmra.mxu3 %v2853_v28 }
 0x299   : > { %v4429_v2 = vpop.permute.xlu2 %1877  ;;  %v4431_v39 = vpop.permute.xlu0 %1882 }
 0x29b   : > { %v4433_v37 = vpop.permute.xlu1 %1887 }
 0x2a1   : > { %2020 = vmatmul.bf16.gmra.mxu1 %v2854_v33  ;;  %v4435_v60 = vpop.permute.xlu2 %1892  ;;  %v4437_v15 = vpop.permute.xlu0 %1897 }
 0x2a2   : > { %1971 = vmatmul.bf16.gmra.mxu0 %v2854_v33 }
 0x2a3   : > { %v4439_v56 = vpop.permute.xlu1 %1902 }
 0x2a5   : > { %2069 = vmatmul.bf16.gmra.mxu2 %v2854_v33 }
 0x2a6   : > { %2118 = vmatmul.bf16.gmra.mxu3 %v2854_v33 }
 0x2a9   : > { %v4443_v58 = vpop.permute.xlu2 %1907  ;;  %v2301_v49 = vpop.permute.xlu0 %2300 }
 0x2ab   : > { %v2306_v13 = vpop.permute.xlu1 %2305 }
 0x2b1   : > { %2025 = vmatmul.bf16.gmra.mxu1 %v2855_v11 }
 0x2b2   : > { %1976 = vmatmul.bf16.gmra.mxu0 %v2855_v11 }
 0x2b5   : > { %2074 = vmatmul.bf16.gmra.mxu2 %v2855_v11 }
 0x2b6   : > { %2123 = vmatmul.bf16.gmra.mxu3 %v2855_v11 }
 0x2c1   : > { %2030 = vmatmul.bf16.gmra.mxu1 %v2856_v23 }
 0x2c2   : > { %1981 = vmatmul.bf16.gmra.mxu0 %v2856_v23 }
 0x2c5   : > { %2079 = vmatmul.bf16.gmra.mxu2 %v2856_v23 }
 0x2c6   : > { %2128 = vmatmul.bf16.gmra.mxu3 %v2856_v23 }
 0x2d1   : > { %2035 = vmatmul.bf16.gmra.mxu1 %v2857_v44 }
 0x2d2   : > { %1986 = vmatmul.bf16.gmra.mxu0 %v2857_v44 }
 0x2d5   : > { %2084 = vmatmul.bf16.gmra.mxu2 %v2857_v44 }
 0x2d6   : > { %2133 = vmatmul.bf16.gmra.mxu3 %v2857_v44  ;;  %v2311_v44 = vpop.permute.xlu2 %2310 }
 0x2e1   : > { %2040 = vmatmul.bf16.gmra.mxu1 %v2858_v6 }
 0x2e2   : > { %1991 = vmatmul.bf16.gmra.mxu0 %v2858_v6 }
 0x2e5   : > { %2089 = vmatmul.bf16.gmra.mxu2 %v2858_v6 }
 0x2e6   : > { %2138 = vmatmul.bf16.gmra.mxu3 %v2858_v6 }
 0x2f1   : > { %2045 = vmatmul.bf16.gmra.mxu1 %v2859_v7 }
 0x2f2   : > { %1996 = vmatmul.bf16.gmra.mxu0 %v2859_v7 }
 0x2f5   : > { %2094 = vmatmul.bf16.gmra.mxu2 %v2859_v7 }
 0x2f6   : > { %2143 = vmatmul.bf16.gmra.mxu3 %v2859_v7 }
 0x301   : > { %2050 = vmatmul.bf16.gmra.mxu1 %v2860_v53 }
 0x302   : > { %2001 = vmatmul.bf16.gmra.mxu0 %v2860_v53 }
 0x305   : > { %2099 = vmatmul.bf16.gmra.mxu2 %v2860_v53 }
 0x306   : > { %2148 = vmatmul.bf16.gmra.mxu3 %v2860_v53 }
 0x30e   : > { %v2016_v0 = vpop.f32.mrf.mxu1 }
 0x30f   : > { %v1967_v8 = vpop.f32.mrf.mxu0  ;;  %v2017_v54 = vadd.f32 %v2016_v0, %v1833_v30 }
 0x310   : > { %v1968_v19 = vadd.f32 %v1967_v8, %v1833_v30 }
 0x311   : > { %v2155_v50 = vmul.f32 0.2, %v2017_v54 }
 0x312   : > { %v2154_v14 = vmul.f32 0.2, %v1968_v19 }
 0x313   : > { %v2219_v43 = vmax.f32 %v2017_v54, %v2155_v50 }
 0x314   : > { %v2218_v34 = vmax.f32 %v1968_v19, %v2154_v14 }
 0x315   : > { %v2379_v4 = vmul.f32 %v2301_v49, %v2219_v43 }
 0x316   : > { %v2018_v59 = vpop.f32.mrf.mxu1  ;;  %v2378_v31 = vmul.f32 %v2301_v49, %v2218_v34 }
 0x317   : > { %v1969_v10 = vpop.f32.mrf.mxu0  ;;  %v2019_v38 = vadd.f32 %v2018_v59, %v4411_v35 }
 0x318   : > { %v1970_v16 = vadd.f32 %v1969_v10, %v4411_v35  ;;  %v2065_v55 = vpop.f32.mrf.mxu2 }
 0x319   : > { %v2159_v61 = vmul.f32 0.2, %v2019_v38  ;;  %v2114_v1 = vpop.f32.mrf.mxu3  ;;  %v2066_v62 = vadd.f32 %v2065_v55, %v1833_v30 }
 0x31a   : > { %v2158_v52 = vmul.f32 0.2, %v1970_v16  ;;  %v2115_v25 = vadd.f32 %v2114_v1, %v1833_v30 }
 0x31b   : > { %v2223_v32 = vmax.f32 %v2019_v38, %v2159_v61  ;;  %v2156_v3 = vmul.f32 0.2, %v2066_v62 }
 0x31c   : > { %v2222_v63 = vmax.f32 %v1970_v16, %v2158_v52  ;;  %v2157_v29 = vmul.f32 0.2, %v2115_v25 }
 0x31d   : > { %v2383_v48 = vmul.f32 %v2306_v13, %v2223_v32  ;;  %v2220_v51 = vmax.f32 %v2066_v62, %v2156_v3 }
 0x31e   : > { %v2382_v18 = vmul.f32 %v2306_v13, %v2222_v63  ;;  %v2021_v20 = vpop.f32.mrf.mxu1  ;;  %v2221_v33 = vmax.f32 %v2115_v25, %v2157_v29  ;;  %v2316_v25 = vpop.permute.xlu0 %2315 }
 0x31f   : > { %v1972_v27 = vpop.f32.mrf.mxu0  ;;  %v2463_v41 = vadd.f32 %v2383_v48, %v2379_v4  ;;  %v2022_v45 = vadd.f32 %v2021_v20, %v4413_v46  ;;  %v2380_v10 = vmul.f32 %v2301_v49, %v2220_v51 }
 0x320   : > { %v2442_v42 = vadd.f32 %v2382_v18, %v2378_v31  ;;  %v1973_v28 = vadd.f32 %v1972_v27, %v4413_v46  ;;  %v2067_v17 = vpop.f32.mrf.mxu2  ;;  %v2381_v59 = vmul.f32 %v2301_v49, %v2221_v33 }
 0x321   : > { %v2163_v5 = vmul.f32 0.2, %v2022_v45  ;;  %v2116_v9 = vpop.f32.mrf.mxu3  ;;  %v2068_v57 = vadd.f32 %v2067_v17, %v4411_v35 }
 0x322   : > { %v2162_v47 = vmul.f32 0.2, %v1973_v28  ;;  %v2117_v22 = vadd.f32 %v2116_v9, %v4411_v35 }
 0x323   : > { %v2227_v23 = vmax.f32 %v2022_v45, %v2163_v5  ;;  %v2160_v6 = vmul.f32 0.2, %v2068_v57 }
 0x324   : > { %v2226_v11 = vmax.f32 %v1973_v28, %v2162_v47  ;;  %v2161_v30 = vmul.f32 0.2, %v2117_v22 }
 0x325   : > { %v2387_v53 = vmul.f32 %v2311_v44, %v2227_v23  ;;  %v2224_v19 = vmax.f32 %v2068_v57, %v2160_v6  ;;  %v2321_v23 = vpop.permute.xlu1 %2320 }
 0x326   : > { %v2386_v7 = vmul.f32 %v2311_v44, %v2226_v11  ;;  %v2023_v0 = vpop.f32.mrf.mxu1  ;;  %v2225_v54 = vmax.f32 %v2117_v22, %v2161_v30 }
 0x327   : > { %v1974_v8 = vpop.f32.mrf.mxu0  ;;  %v2024_v50 = vadd.f32 %v2023_v0, %v4416_v36  ;;  %v2464_v16 = vadd.f32 %v2463_v41, %v2387_v53  ;;  %v2384_v38 = vmul.f32 %v2306_v13, %v2224_v19 }
 0x328   : > { %v1975_v14 = vadd.f32 %v1974_v8, %v4416_v36  ;;  %v2443_v35 = vadd.f32 %v2442_v42, %v2386_v7  ;;  %v2385_v34 = vmul.f32 %v2306_v13, %v2225_v54  ;;  %v2070_v61 = vpop.f32.mrf.mxu2 }
 0x329   : > { %v2167_v52 = vmul.f32 0.2, %v2024_v50  ;;  %v2119_v55 = vpop.f32.mrf.mxu3  ;;  %v2484_v1 = vadd.f32 %v2384_v38, %v2380_v10  ;;  %v2071_v31 = vadd.f32 %v2070_v61, %v4413_v46 }
 0x32a   : > { %v2166_v43 = vmul.f32 0.2, %v1975_v14  ;;  %v2505_v63 = vadd.f32 %v2385_v34, %v2381_v59  ;;  %v2120_v4 = vadd.f32 %v2119_v55, %v4413_v46 }
 0x32b   : > { %v2231_v62 = vmax.f32 %v2024_v50, %v2167_v52  ;;  %v2164_v49 = vmul.f32 0.2, %v2071_v31 }
 0x32c   : > { %v2230_v32 = vmax.f32 %v1975_v14, %v2166_v43  ;;  %v2165_v27 = vmul.f32 0.2, %v2120_v4 }
 0x32d   : > { %v2391_v48 = vmul.f32 %v2316_v25, %v2231_v62  ;;  %v2228_v28 = vmax.f32 %v2071_v31, %v2164_v49 }
 0x32e   : > { %v2390_v18 = vmul.f32 %v2316_v25, %v2230_v32  ;;  %v2026_v42 = vpop.f32.mrf.mxu1  ;;  %v2229_v45 = vmax.f32 %v2120_v4, %v2165_v27 }
 0x32f   : > { %v1977_v20 = vpop.f32.mrf.mxu0  ;;  %v2465_v41 = vadd.f32 %v2464_v16, %v2391_v48  ;;  %v2027_v29 = vadd.f32 %v2026_v42, %v4418_v24  ;;  %v2388_v17 = vmul.f32 %v2311_v44, %v2228_v28 }
 0x330   : > { %v2444_v13 = vadd.f32 %v2443_v35, %v2390_v18  ;;  %v1978_v3 = vadd.f32 %v1977_v20, %v4418_v24  ;;  %v2389_v9 = vmul.f32 %v2311_v44, %v2229_v45  ;;  %v2072_v57 = vpop.f32.mrf.mxu2 }
 0x331   : > { %v2171_v5 = vmul.f32 0.2, %v2027_v29  ;;  %v2121_v46 = vpop.f32.mrf.mxu3  ;;  %v2073_v33 = vadd.f32 %v2072_v57, %v4416_v36  ;;  %v2485_v6 = vadd.f32 %v2484_v1, %v2388_v17 }
 0x332   : > { %v2170_v47 = vmul.f32 0.2, %v1978_v3  ;;  %v2122_v11 = vadd.f32 %v2121_v46, %v4416_v36  ;;  %v2506_v30 = vadd.f32 %v2505_v63, %v2389_v9 }
 0x333   : > { %v2235_v51 = vmax.f32 %v2027_v29, %v2171_v5  ;;  %v2168_v8 = vmul.f32 0.2, %v2073_v33 }
 0x334   : > { %v2234_v22 = vmax.f32 %v1978_v3, %v2170_v47  ;;  %v2169_v0 = vmul.f32 0.2, %v2122_v11 }
 0x335   : > { %v2395_v53 = vmul.f32 %v2321_v23, %v2235_v51  ;;  %v2232_v50 = vmax.f32 %v2073_v33, %v2168_v8 }
 0x336   : > { %v2394_v7 = vmul.f32 %v2321_v23, %v2234_v22  ;;  %v2028_v54 = vpop.f32.mrf.mxu1  ;;  %v2233_v10 = vmax.f32 %v2122_v11, %v2169_v0 }
 0x337   : > { %v1979_v19 = vpop.f32.mrf.mxu0  ;;  %v4459_v44 = vadd.f32 %v2465_v41, %v2395_v53  ;;  %v2392_v59 = vmul.f32 %v2316_v25, %v2232_v50  ;;  %v2029_v5 = vadd.f32 %v2028_v54, %v4420_v26 }
 0x338   : > { %v4457_v14 = vadd.f32 %v2444_v13, %v2394_v7  ;;  %v2393_v35 = vmul.f32 %v2316_v25, %v2233_v10  ;;  %v2075_v16 = vpop.f32.mrf.mxu2  ;;  %v1980_v47 = vadd.f32 %v1979_v19, %v4420_v26 }
 0x339   : > { %v2124_v38 = vpop.f32.mrf.mxu3  ;;  %v2486_v36 = vadd.f32 %v2485_v6, %v2392_v59  ;;  %v2076_v43 = vadd.f32 %v2075_v16, %v4418_v24  ;;  %v2175_v51 = vmul.f32 0.2, %v2029_v5 }
 0x33a   : > { %v2507_v34 = vadd.f32 %v2506_v30, %v2393_v35  ;;  %v2125_v52 = vadd.f32 %v2124_v38, %v4418_v24  ;;  %v2174_v22 = vmul.f32 0.2, %v1980_v47  ;;  %v2326_v38 = vpop.permute.xlu2 %2325 }
 0x33b   : > { %v2172_v61 = vmul.f32 0.2, %v2076_v43  ;;  %v2239_v19 = vmax.f32 %v2029_v5, %v2175_v51 }
 0x33c   : > { %v2173_v55 = vmul.f32 0.2, %v2125_v52  ;;  %v2238_v0 = vmax.f32 %v1980_v47, %v2174_v22 }
 0x33d   : > { %v2236_v32 = vmax.f32 %v2076_v43, %v2172_v61  ;;  %v2399_v43 = vmul.f32 %v2326_v38, %v2239_v19 }
 0x33e   : > { %v2031_v63 = vpop.f32.mrf.mxu1  ;;  %v2237_v62 = vmax.f32 %v2125_v52, %v2173_v55  ;;  %v2331_v55 = vpop.permute.xlu0 %2330 }
 0x33f   : > { %v1982_v1 = vpop.f32.mrf.mxu0  ;;  %v2396_v31 = vmul.f32 %v2321_v23, %v2236_v32  ;;  %v2032_v9 = vadd.f32 %v2031_v63, %v4422_v40 }
 0x340   : > { %v2397_v4 = vmul.f32 %v2321_v23, %v2237_v62  ;;  %v2077_v18 = vpop.f32.mrf.mxu2  ;;  %v1983_v17 = vadd.f32 %v1982_v1, %v4422_v40 }
 0x341   : > { %v2126_v48 = vpop.f32.mrf.mxu3  ;;  %v4463_v49 = vadd.f32 %v2486_v36, %v2396_v31  ;;  %v2078_v33 = vadd.f32 %v2077_v18, %v4420_v26  ;;  %v2179_v23 = vmul.f32 0.2, %v2032_v9 }
 0x342   : > { %v4465_v25 = vadd.f32 %v2507_v34, %v2397_v4  ;;  %v2178_v11 = vmul.f32 0.2, %v1983_v17  ;;  %v2127_v6 = vadd.f32 %v2126_v48, %v4420_v26  ;;  %v2398_v26 = vmul.f32 %v2326_v38, %v2238_v0 }
 0x343   : > { %v2176_v54 = vmul.f32 0.2, %v2078_v33  ;;  %v2243_v10 = vmax.f32 %v2032_v9, %v2179_v23 }
 0x344   : > { %v2242_v50 = vmax.f32 %v1983_v17, %v2178_v11  ;;  %v2177_v59 = vmul.f32 0.2, %v2127_v6 }
 0x345   : > { %v2240_v1 = vmax.f32 %v2078_v33, %v2176_v54  ;;  %v2403_v31 = vmul.f32 %v2331_v55, %v2243_v10 }
 0x346   : > { %v2033_v20 = vpop.f32.mrf.mxu1  ;;  %v2402_v62 = vmul.f32 %v2331_v55, %v2242_v50  ;;  %v2241_v4 = vmax.f32 %v2127_v6, %v2177_v59 }
 0x347   : > { %v1984_v27 = vpop.f32.mrf.mxu0  ;;  %v2034_v8 = vadd.f32 %v2033_v20, %v4425_v12  ;;  %v2400_v9 = vmul.f32 %v2326_v38, %v2240_v1 }
 0x348   : > { %v2080_v42 = vpop.f32.mrf.mxu2  ;;  %v1985_v53 = vadd.f32 %v1984_v27, %v4425_v12  ;;  %v2401_v23 = vmul.f32 %v2326_v38, %v2241_v4 }
 0x349   : > { %v2129_v13 = vpop.f32.mrf.mxu3  ;;  %v2183_v34 = vmul.f32 0.2, %v2034_v8  ;;  %v2081_v52 = vadd.f32 %v2080_v42, %v4422_v40  ;;  %v2446_v42 = vadd.f32 %v4457_v14, %v2398_v26 }
 0x34a   : > { %v2182_v36 = vmul.f32 0.2, %v1985_v53  ;;  %v2130_v61 = vadd.f32 %v2129_v13, %v4422_v40  ;;  %v2467_v40 = vadd.f32 %v4459_v44, %v2399_v43 }
 0x34b   : > { %v2247_v20 = vmax.f32 %v2034_v8, %v2183_v34  ;;  %v2180_v13 = vmul.f32 0.2, %v2081_v52  ;;  %v2447_v33 = vadd.f32 %v2446_v42, %v2402_v62  ;;  %v2341_v62 = vpop.permute.xlu2 %2340 }
 0x34c   : > { %v2246_v27 = vmax.f32 %v1985_v53, %v2182_v36  ;;  %v2181_v17 = vmul.f32 0.2, %v2130_v61  ;;  %v2468_v11 = vadd.f32 %v2467_v40, %v2403_v31 }
 0x34d   : > { %v2244_v8 = vmax.f32 %v2081_v52, %v2180_v13 }
 0x34e   : > { %v2036_v24 = vpop.f32.mrf.mxu1  ;;  %v2245_v0 = vmax.f32 %v2130_v61, %v2181_v17  ;;  %v2346_v17 = vpop.permute.xlu0 %2345 }
 0x34f   : > { %v1987_v41 = vpop.f32.mrf.mxu0  ;;  %v2037_v32 = vadd.f32 %v2036_v24, %v4427_v21 }
 0x350   : > { %v2082_v3 = vpop.f32.mrf.mxu2  ;;  %v1988_v63 = vadd.f32 %v1987_v41, %v4427_v21  ;;  %v2336_v41 = vpop.permute.xlu1 %2335 }
 0x351   : > { %v2131_v29 = vpop.f32.mrf.mxu3  ;;  %v2083_v47 = vadd.f32 %v2082_v3, %v4425_v12  ;;  %v2187_v22 = vmul.f32 0.2, %v2037_v32  ;;  %v2406_v14 = vmul.f32 %v2336_v41, %v2246_v27 }
 0x352   : > { %v2132_v5 = vadd.f32 %v2131_v29, %v4425_v12  ;;  %v2186_v24 = vmul.f32 0.2, %v1988_v63  ;;  %v2407_v29 = vmul.f32 %v2336_v41, %v2247_v20 }
 0x353   : > { %v2184_v44 = vmul.f32 0.2, %v2083_v47  ;;  %v2251_v10 = vmax.f32 %v2037_v32, %v2187_v22  ;;  %v2448_v52 = vadd.f32 %v2447_v33, %v2406_v14 }
 0x354   : > { %v2185_v53 = vmul.f32 0.2, %v2132_v5  ;;  %v2250_v50 = vmax.f32 %v1988_v63, %v2186_v24  ;;  %v2469_v61 = vadd.f32 %v2468_v11, %v2407_v29 }
 0x355   : > { %v2248_v1 = vmax.f32 %v2083_v47, %v2184_v44  ;;  %v2411_v31 = vmul.f32 %v2341_v62, %v2251_v10 }
 0x356   : > { %v2038_v45 = vpop.f32.mrf.mxu1  ;;  %v2410_v32 = vmul.f32 %v2341_v62, %v2250_v50 }
 0x357   : > { %v1989_v28 = vpop.f32.mrf.mxu0  ;;  %v2039_v6 = vadd.f32 %v2038_v45, %v4429_v2  ;;  %v2509_v45 = vadd.f32 %v4465_v25, %v2401_v23  ;;  %v2470_v33 = vadd.f32 %v2469_v61, %v2411_v31 }
 0x358   : > { %v2085_v57 = vpop.f32.mrf.mxu2  ;;  %v1990_v51 = vadd.f32 %v1989_v28, %v4429_v2  ;;  %v2488_v28 = vadd.f32 %v4463_v49, %v2400_v9 }
 0x359   : > { %v2134_v46 = vpop.f32.mrf.mxu3  ;;  %v2086_v19 = vadd.f32 %v2085_v57, %v4427_v21  ;;  %v2191_v38 = vmul.f32 0.2, %v2039_v6  ;;  %v2249_v57 = vmax.f32 %v2132_v5, %v2185_v53  ;;  %v2408_v5 = vmul.f32 %v2336_v41, %v2248_v1 }
 0x35a   : > { %v2135_v54 = vadd.f32 %v2134_v46, %v4427_v21  ;;  %v2190_v59 = vmul.f32 0.2, %v1990_v51  ;;  %v2404_v21 = vmul.f32 %v2331_v55, %v2244_v8  ;;  %v2405_v46 = vmul.f32 %v2331_v55, %v2245_v0 }
 0x35b   : > { %v2188_v49 = vmul.f32 0.2, %v2086_v19  ;;  %v2409_v40 = vmul.f32 %v2336_v41, %v2249_v57 }
 0x35c   : > { %v2189_v63 = vmul.f32 0.2, %v2135_v54  ;;  %v2254_v4 = vmax.f32 %v1990_v51, %v2190_v59  ;;  %v2489_v9 = vadd.f32 %v2488_v28, %v2404_v21  ;;  %v2510_v24 = vadd.f32 %v2509_v45, %v2405_v46 }
 0x35d   : > { %v2252_v22 = vmax.f32 %v2086_v19, %v2188_v49 }
 0x35e   : > { %v2041_v7 = vpop.f32.mrf.mxu1  ;;  %v2253_v51 = vmax.f32 %v2135_v54, %v2189_v63  ;;  %v2414_v11 = vmul.f32 %v2346_v17, %v2254_v4  ;;  %v2490_v41 = vadd.f32 %v2489_v9, %v2408_v5  ;;  %v2511_v53 = vadd.f32 %v2510_v24, %v2409_v40  ;;  %v2351_v54 = vpop.permute.xlu1 %2350 }
 0x35f   : > { %v1992_v30 = vpop.f32.mrf.mxu0  ;;  %v2042_v34 = vadd.f32 %v2041_v7, %v4431_v39 }
 0x360   : > { %v4475_v35 = vpop.f32.mrf.mxu2  ;;  %v1993_v36 = vadd.f32 %v1992_v30, %v4431_v39  ;;  %v2255_v30 = vmax.f32 %v2039_v6, %v2191_v38  ;;  %v2413_v0 = vmul.f32 %v2341_v62, %v2253_v51 }
 0x361   : > { %v4477_v16 = vpop.f32.mrf.mxu3  ;;  %v2088_v25 = vadd.f32 %v4475_v35, %v4429_v2  ;;  %v2195_v7 = vmul.f32 0.2, %v2042_v34  ;;  %v2449_v35 = vadd.f32 %v2448_v52, %v2410_v32 }
 0x362   : > { %v2194_v27 = vmul.f32 0.2, %v1993_v36  ;;  %v2137_v20 = vadd.f32 %v4477_v16, %v4429_v2  ;;  %v2415_v6 = vmul.f32 %v2346_v17, %v2255_v30  ;;  %v2512_v46 = vadd.f32 %v2511_v53, %v2413_v0 }
 0x363   : > { %v2192_v23 = vmul.f32 0.2, %v2088_v25  ;;  %v2259_v2 = vmax.f32 %v2042_v34, %v2195_v7  ;;  %v2450_v50 = vadd.f32 %v2449_v35, %v2414_v11 }
 0x364   : > { %v2258_v14 = vmax.f32 %v1993_v36, %v2194_v27  ;;  %v2193_v16 = vmul.f32 0.2, %v2137_v20  ;;  %v2471_v38 = vadd.f32 %v2470_v33, %v2415_v6 }
 0x365   : > { %v2256_v10 = vmax.f32 %v2088_v25, %v2192_v23  ;;  %v2419_v34 = vmul.f32 %v2351_v54, %v2259_v2 }
 0x366   : > { %v2043_v48 = vpop.f32.mrf.mxu1  ;;  %v2418_v36 = vmul.f32 %v2351_v54, %v2258_v14  ;;  %v2257_v52 = vmax.f32 %v2137_v20, %v2193_v16  ;;  %v2366_v0 = vpop.permute.xlu1 %2365 }
 0x367   : > { %v1994_v18 = vpop.f32.mrf.mxu0  ;;  %v2044_v13 = vadd.f32 %v2043_v48, %v4433_v37  ;;  %v2412_v48 = vmul.f32 %v2341_v62, %v2252_v22  ;;  %v2416_v32 = vmul.f32 %v2346_v17, %v2256_v10  ;;  %v2472_v25 = vadd.f32 %v2471_v38, %v2419_v34 }
 0x368   : > { %v4489_v3 = vpop.f32.mrf.mxu2  ;;  %v1995_v55 = vadd.f32 %v1994_v18, %v4433_v37  ;;  %v2451_v4 = vadd.f32 %v2450_v50, %v2418_v36  ;;  %v2417_v30 = vmul.f32 %v2346_v17, %v2257_v52 }
 0x369   : > { %v4491_v12 = vpop.f32.mrf.mxu3  ;;  %v2199_v8 = vmul.f32 0.2, %v2044_v13  ;;  %v2091_v59 = vadd.f32 %v4489_v3, %v4431_v39  ;;  %v2491_v21 = vadd.f32 %v2490_v41, %v2412_v48  ;;  %v4513_v3 = vpop.permute.xlu2 %2355 }
 0x36a   : > { %v2198_v18 = vmul.f32 0.2, %v1995_v55  ;;  %v2140_v45 = vadd.f32 %v4491_v12, %v4431_v39  ;;  %v2513_v33 = vadd.f32 %v2512_v46, %v2417_v30 }
 0x36b   : > { %v2263_v62 = vmax.f32 %v2044_v13, %v2199_v8  ;;  %v2196_v39 = vmul.f32 0.2, %v2091_v59  ;;  %v4523_v35 = vadd.f32 %v2491_v21, %v2416_v32 }
 0x36c   : > { %v2262_v57 = vmax.f32 %v1995_v55, %v2198_v18  ;;  %v2197_v12 = vmul.f32 0.2, %v2140_v45 }
 0x36d   : > { %v2423_v40 = vmul.f32 %v4513_v3, %v2263_v62  ;;  %v2260_v17 = vmax.f32 %v2091_v59, %v2196_v39 }
 0x36e   : > { %v2046_v43 = vpop.f32.mrf.mxu1  ;;  %v2422_v5 = vmul.f32 %v4513_v3, %v2262_v57 }
 0x36f   : > { %v1997_v26 = vpop.f32.mrf.mxu0  ;;  %v2047_v19 = vadd.f32 %v2046_v43, %v4435_v60 }
 0x370   : > { %v2092_v42 = vpop.f32.mrf.mxu2  ;;  %v1998_v28 = vadd.f32 %v1997_v26, %v4435_v60  ;;  %v2452_v16 = vadd.f32 %v2451_v4, %v2422_v5 }
 0x371   : > { %v2141_v47 = vpop.f32.mrf.mxu3  ;;  %v2203_v63 = vmul.f32 0.2, %v2047_v19  ;;  %v2093_v31 = vadd.f32 %v2092_v42, %v4433_v37  ;;  %v4521_v42 = vpop.permute.xlu0 %2360 }
 0x372   : > { %v2202_v49 = vmul.f32 0.2, %v1998_v28  ;;  %v2142_v27 = vadd.f32 %v2141_v47, %v4433_v37  ;;  %v2261_v37 = vmax.f32 %v2140_v45, %v2197_v12 }
 0x373   : > { %v2267_v24 = vmax.f32 %v2047_v19, %v2203_v63  ;;  %v2200_v47 = vmul.f32 0.2, %v2093_v31 }
 0x374   : > { %v2266_v9 = vmax.f32 %v1998_v28, %v2202_v49  ;;  %v2201_v11 = vmul.f32 0.2, %v2142_v27  ;;  %v2420_v28 = vmul.f32 %v2351_v54, %v2260_v17  ;;  %v2421_v19 = vmul.f32 %v2351_v54, %v2261_v37 }
 0x375   : > { %v2427_v18 = vmul.f32 %v4521_v42, %v2267_v24  ;;  %v2264_v59 = vmax.f32 %v2093_v31, %v2200_v47 }
 0x376   : > { %v2048_v44 = vpop.f32.mrf.mxu1  ;;  %v2426_v53 = vmul.f32 %v4521_v42, %v2266_v9  ;;  %v2265_v45 = vmax.f32 %v2142_v27, %v2201_v11 }
 0x377   : > { %v1999_v29 = vpop.f32.mrf.mxu0  ;;  %v2049_v43 = vadd.f32 %v2048_v44, %v4437_v15  ;;  %v2424_v39 = vmul.f32 %v4513_v3, %v2264_v59 }
 0x378   : > { %v2095_v61 = vpop.f32.mrf.mxu2  ;;  %v2000_v26 = vadd.f32 %v1999_v29, %v4437_v15  ;;  %v2473_v29 = vadd.f32 %v2472_v25, %v2423_v40 }
 0x379   : > { %v2144_v1 = vpop.f32.mrf.mxu3  ;;  %v2207_v13 = vmul.f32 0.2, %v2049_v43  ;;  %v2096_v8 = vadd.f32 %v2095_v61, %v4435_v60  ;;  %v2376_v5 = vpop.permute.xlu0 %2375 }
 0x37a   : > { %v2206_v55 = vmul.f32 0.2, %v2000_v26  ;;  %v2145_v48 = vadd.f32 %v2144_v1, %v4435_v60  ;;  %v2371_v60 = vpop.permute.xlu2 %2370  ;;  %v2453_v1 = vadd.f32 %v2452_v16, %v2426_v53 }
 0x37b   : > { %v2271_v41 = vmax.f32 %v2049_v43, %v2207_v13  ;;  %v2474_v43 = vadd.f32 %v2473_v29, %v2427_v18  ;;  %v2204_v54 = vmul.f32 0.2, %v2096_v8 }
 0x37c   : > { %v2270_v44 = vmax.f32 %v2000_v26, %v2206_v55  ;;  %v2205_v21 = vmul.f32 0.2, %v2145_v48 }
 0x37d   : > { %v2431_v62 = vmul.f32 %v2366_v0, %v2271_v41  ;;  %v2268_v40 = vmax.f32 %v2096_v8, %v2204_v54 }
 0x37e   : > { %v2051_v20 = vpop.f32.mrf.mxu1  ;;  %v2430_v57 = vmul.f32 %v2366_v0, %v2270_v44  ;;  %v2269_v55 = vmax.f32 %v2145_v48, %v2205_v21 }
 0x37f   : > { %v2002_v7 = vpop.f32.mrf.mxu0  ;;  %v2052_v51 = vadd.f32 %v2051_v20, %v4439_v56  ;;  %v2475_v27 = vadd.f32 %v2474_v43, %v2431_v62  ;;  %v2428_v16 = vmul.f32 %v4521_v42, %v2268_v40 }
 0x380   : > { %v2003_v22 = vadd.f32 %v2002_v7, %v4439_v56  ;;  %v2097_v14 = vpop.f32.mrf.mxu2  ;;  %v2454_v30 = vadd.f32 %v2453_v1, %v2430_v57  ;;  %v2429_v29 = vmul.f32 %v4521_v42, %v2269_v55  ;;  %v2530_v1 = vpop.permute.xlu1 %2529 }
 0x381   : > { %v2211_v6 = vmul.f32 0.2, %v2052_v51  ;;  %v2146_v2 = vpop.f32.mrf.mxu3  ;;  %v2098_v38 = vadd.f32 %v2097_v14, %v4437_v15 }
 0x382   : > { %v2210_v23 = vmul.f32 0.2, %v2003_v22  ;;  %v2147_v36 = vadd.f32 %v2146_v2, %v4437_v15  ;;  %v2425_v15 = vmul.f32 %v4513_v3, %v2265_v45 }
 0x383   : > { %v2275_v10 = vmax.f32 %v2052_v51, %v2211_v6  ;;  %v2208_v12 = vmul.f32 0.2, %v2098_v38  ;;  %v2514_v6 = vadd.f32 %v2513_v33, %v2421_v19 }
 0x384   : > { %v2274_v50 = vmax.f32 %v2003_v22, %v2210_v23  ;;  %v2209_v31 = vmul.f32 0.2, %v2147_v36  ;;  %v2493_v23 = vadd.f32 %v4523_v35, %v2420_v28 }
 0x385   : > { %v2435_v49 = vmul.f32 %v2371_v60, %v2275_v10  ;;  %v2272_v3 = vmax.f32 %v2098_v38, %v2208_v12  ;;  %v2515_v8 = vadd.f32 %v2514_v6, %v2425_v15  ;;  %v2532_v15 = vperm.slane %v2530_v1, 0 }
 0x386   : > { %v2053_v52 = vpop.f32.mrf.mxu1  ;;  %v2434_v46 = vmul.f32 %v2371_v60, %v2274_v50  ;;  %v2273_v37 = vmax.f32 %v2147_v36, %v2209_v31  ;;  %v2494_v18 = vadd.f32 %v2493_v23, %v2424_v39 }
 0x387   : > { %v2004_v34 = vpop.f32.mrf.mxu0  ;;  %v2054_v61 = vadd.f32 %v2053_v52, %v4443_v58  ;;  %v2476_v22 = vadd.f32 %v2475_v27, %v2435_v49  ;;  %v2432_v48 = vmul.f32 %v2366_v0, %v2272_v3  ;;  %v2516_v19 = vadd.f32 %v2515_v8, %v2429_v29 }
 0x388   : > { %v2005_v26 = vadd.f32 %v2004_v34, %v4443_v58  ;;  %v2100_v4 = vpop.f32.mrf.mxu2  ;;  %v2455_v24 = vadd.f32 %v2454_v30, %v2434_v46  ;;  %v2433_v50 = vmul.f32 %v2366_v0, %v2273_v37  ;;  %v2495_v28 = vadd.f32 %v2494_v18, %v2428_v16 }
 0x389   : > { %v2215_v32 = vmul.f32 0.2, %v2054_v61  ;;  %v2149_v25 = vpop.f32.mrf.mxu3  ;;  %v2101_v13 = vadd.f32 %v2100_v4, %v4439_v56 }
 0x38a   : > { %v2214_v63 = vmul.f32 0.2, %v2005_v26  ;;  %v2150_v9 = vadd.f32 %v2149_v25, %v4439_v56 }
 0x38b   : > { %v2279_v20 = vmax.f32 %v2054_v61, %v2215_v32  ;;  %v2212_v47 = vmul.f32 0.2, %v2101_v13  ;;  %v2517_v61 = vadd.f32 %v2516_v19, %v2433_v50 }
 0x38c   : > { %v2278_v7 = vmax.f32 %v2005_v26, %v2214_v63  ;;  %v2213_v11 = vmul.f32 0.2, %v2150_v9  ;;  %v2496_v26 = vadd.f32 %v2495_v28, %v2432_v48 }
 0x38d   : > { %v2439_v17 = vmul.f32 %v2376_v5, %v2279_v20  ;;  %v2276_v44 = vmax.f32 %v2101_v13, %v2212_v47 }
 0x38e   : > { %v2438_v51 = vmul.f32 %v2376_v5, %v2278_v7  ;;  %v2277_v41 = vmax.f32 %v2150_v9, %v2213_v11 }
 0x38f   : > { %v2477_v2 = vadd.f32 %v2476_v22, %v2439_v17  ;;  %v2436_v36 = vmul.f32 %v2371_v60, %v2276_v44 }
 0x390   : > { %v2456_v14 = vadd.f32 %v2455_v24, %v2438_v51  ;;  %v2102_v10 = vpop.f32.mrf.mxu2  ;;  %v2437_v42 = vmul.f32 %v2371_v60, %v2277_v41 }
 0x391   : > { %v2478_v53 = vrot.slane %v2477_v2, 4  ;;  %v2151_v59 = vpop.f32.mrf.mxu3  ;;  %v2103_v35 = vadd.f32 %v2102_v10, %v4443_v58  ;;  %v2497_v46 = vadd.f32 %v2496_v26, %v2436_v36 }
 0x392   : > { %v2457_v56 = vrot.slane %v2456_v14, 4  ;;  %v2152_v33 = vadd.f32 %v2151_v59, %v4443_v58  ;;  %v2518_v49 = vadd.f32 %v2517_v61, %v2437_v42 }
 0x393   : > { %v2479_v38 = vadd.f32 %v2478_v53, %v2477_v2  ;;  %v2216_v57 = vmul.f32 0.2, %v2103_v35 }
 0x394   : > { %v2458_v45 = vadd.f32 %v2457_v56, %v2456_v14  ;;  %v2217_v62 = vmul.f32 0.2, %v2152_v33  ;;  %v2555_v14 = vlaneseq }
 0x395   : > { %v2480_v52 = vrot.slane %v2479_v38, 2  ;;  %v2280_v54 = vmax.f32 %v2103_v35, %v2216_v57 }
 0x396   : > { %v2459_v34 = vrot.slane %v2458_v45, 2  ;;  %v2281_v21 = vmax.f32 %v2152_v33, %v2217_v62  ;;  %vm2557_vm3 = vcmp.lt.s32.totalorder %v2555_v14, 512 }
 0x397   : > { %v2481_v43 = vadd.f32 %v2480_v52, %v2479_v38  ;;  %v2440_v58 = vmul.f32 %v2376_v5, %v2280_v54 }
 0x398   : > { %v2460_v0 = vadd.f32 %v2459_v34, %v2458_v45  ;;  %v2441_v39 = vmul.f32 %v2376_v5, %v2281_v21 }
 0x399   : > { %v2482_v32 = vrot.slane %v2481_v43, 1  ;;  %v2498_v31 = vadd.f32 %v2497_v46, %v2440_v58 }
 0x39a   : > { %v2461_v63 = vrot.slane %v2460_v0, 1  ;;  %v2519_v4 = vadd.f32 %v2518_v49, %v2441_v39 }
 0x39b   : > { %v2483_v60 = vadd.f32 %v2482_v32, %v2481_v43  ;;  %v2499_v30 = vrot.slane %v2498_v31, 4 }
 0x39c   : > { %v2462_v12 = vadd.f32 %v2461_v63, %v2460_v0  ;;  %v2520_v27 = vrot.slane %v2519_v4, 4 }
 0x39d   : > { %v2534_v25 = vadd.f32 %v2532_v15, %v2483_v60  ;;  %v2500_v20 = vadd.f32 %v2499_v30, %v2498_v31 }
 0x39e   : > { %v2533_v7 = vadd.f32 %v2532_v15, %v2462_v12  ;;  %v2521_v40 = vadd.f32 %v2520_v27, %v2519_v4 }
 0x39f   : > { %2965 = vtanh.f32 %v2534_v25  ;;  %v2501_v55 = vrot.slane %v2500_v20, 2 }
 0x3a0   : > { %v2522_v13 = vrot.slane %v2521_v40, 2  ;;  %2967 = vtanh.f32 %v2533_v7 }
 0x3a1   : > { %v2502_v9 = vadd.f32 %v2501_v55, %v2500_v20 }
 0x3a2   : > { %v2523_v24 = vadd.f32 %v2522_v13, %v2521_v40 }
 0x3a3   : > { %v2503_v5 = vrot.slane %v2502_v9, 1 }
 0x3a4   : > { %v2524_v22 = vrot.slane %v2523_v24, 1 }
 0x3a5   : > { %v2966_v51 = vpop.eup %2965  ;;  %v2504_v17 = vadd.f32 %v2503_v5, %v2502_v9 }
 0x3a6   : > { %v2525_v3 = vadd.f32 %v2524_v22, %v2523_v24  ;;  %v2545_v37 = vrot.slane %v2966_v51, 7  ;;  %v2968_v47 = vpop.eup %2967 }
 0x3a7   : > { %v2535_v11 = vadd.f32 %v2532_v15, %v2504_v17 }
 0x3a8   : > { %v2536_v23 = vadd.f32 %v2532_v15, %v2525_v3  ;;  %v2549_v6 = vsel %vm2548_vm0, %v2968_v47, %v2545_v37 }
 0x3a9   : > { %2969 = vtanh.f32 %v2535_v11 }
 0x3aa   : > { %2971 = vtanh.f32 %v2536_v23 }
 0x3af   : > { %v2970_v2 = vpop.eup %2969 }
 0x3b0   : > { %v2972_v16 = vpop.eup %2971  ;;  %v2546_v29 = vrot.slane %v2970_v2, 6 }
 0x3b1   : > { %v2547_v44 = vrot.slane %v2972_v16, 5 }
 0x3b3   : > { %v2551_v41 = vsel %vm2550_vm1, %v2546_v29, %v2547_v44 }
 0x3b4   : > { %v2553_v56 = vsel %vm2552_vm2, %v2549_v6, %v2551_v41 }
 0x3b5   : > { %2559 = vst.msk [vmem:[%s340_s13] sm:$0xf] %vm2557_vm3, %v2553_v56 }
 0x3b6   : > { %3000 = shalt.err (!%p2997_p5)
}
 0x3b7   : > { %2862 = dma.vmem_to_hbm [thread:$0]  (%p3131_p4), %s2576_s14, 64, %s2578_s15, %s2561_s24  }
 0x3b8 PF: > { %p2868_p6 = scmp.ge.s32.totalorder %s3051_s26, 2  ;;  %s2589_s11 = sand.u32 1, %s3031_s21  }
 0x3b9   : > { %s2590_s28 = scalar_lea.sflag [#allocation3], %s2589_s11 }
 0x3ba   : > { %p2865_p7 = pnand %p2868_p6, %p3138_p8 }
 0x3bc   : > { %p2866_p9 = pneg %p2865_p7 }
 0x3be   : > { %3026 = dma.done.wait (%p2866_p9), %s2590_s28, 64  }
 0x3bf   : > { %3028 = vsyncadd (%p2866_p9), %s2590_s28, 4294967232  ;;  %s19_s26 = sadd.s32 1, %s3051_s26   ;;  %s4756_s21 = smov %s3035_s22 }
 0x3c0   : > { %p16_p10 = scmp.ge.s32.totalorder %s19_s26, 4   ;;  %s4757_s22 = smov %s3039_s23 }
 0x3c1   : > { %s4758_s23 = smov %s3144_s10  ;;  %s4759_s24 = smov %s3047_s25 }
 0x3c2   : > { %s4760_s25 = smov %s4762_s29  ;;  %18 = sbr.rel (!%p16_p10) target bundleno = 4 (0x4), region = 97 }
 0x3c7   :  { %2596 = vsyncpa [#allocation3], 1 }
 0x3c8   :  { %2598 = vsyncpa [#allocation3 + $0x1], 1 }

</bundles_post_ra>
